<compile_context>
chip_gen: v7x
topology: tpu7x:2x2x1
jax: 0.10.0
libtpu: 0.0.40
codegen_flags: <defaults>
</compile_context>

<pallas_src>
import functools
import math

import jax
import jax.numpy as jnp
from jax import lax
from jax.experimental import pallas as pl
from jax.experimental.pallas import tpu as pltpu


def _round_up(x, m):
    return (x + m - 1) // m * m


# ---- hyper-parameters from the PyTorch module ------------------------------
DIS_FILTER_SIZES = [2, 3, 4, 5]
DIS_NUM_FILTERS = [300, 300, 300, 300]
EMBED_DIM = 128
NUM_REP = 16
EMB_DIM_SINGLE = EMBED_DIM // NUM_REP            # 8
FEATURE_DIM = sum(DIS_NUM_FILTERS)               # 1200
OUT_HIDDEN = 100                                 # feature2out width

# dense, lane-aligned packing of the feature dimension
FEATURE_PAD = _round_up(FEATURE_DIM, 128)        # 1280 (was 1536)
HIDDEN_PAD = 128                                 # 100 -> 128
KMAX = max(DIS_FILTER_SIZES) * EMB_DIM_SINGLE    # 40: shared im2col window width
MAX_F = max(DIS_FILTER_SIZES)                    # 5
MIN_F = min(DIS_FILTER_SIZES)                    # 2

_BANK_OFFSETS = [0]
for _n in DIS_NUM_FILTERS:
    _BANK_OFFSETS.append(_BANK_OFFSETS[-1] + _n)  # [0, 300, 600, 900, 1200]


# ---- per-generation tiling / VMEM budget ------------------------------------
def _tpu_vmem_capacity_bytes():
    try:
        return int(pltpu.get_tpu_info().vmem_capacity_bytes)
    except Exception:
        return 64 * 1024 * 1024                  # conservative (v7x-sized) fallback


_VMEM_CAP = _tpu_vmem_capacity_bytes()
_ROW_TILE = 256 if _VMEM_CAP >= (96 << 20) else 128   # 256 on v5e/v6e, 128 on v7x
_VMEM_LIMIT = int(min((_VMEM_CAP * 3) // 4, 96 << 20))


# ---- fused conv(x4) + ReLU + max-pool + highway + feature2out + out2logits ---
def _conv_head_kernel(x_ref, wc_ref, bc_ref, whw_ref, bhw_ref,
                      wf_ref, bf_ref, wo_ref, bo_ref, o_ref,
                      *, seq_len, h_windows):
    x = x_ref[...]                                   # [tbm, lp]   bf16
    wc = wc_ref[...]                                 # [40, 1280]  bf16
    bc = bc_ref[...]                                 # [1, 1280]   f32

    # Static per-column "last valid window index" = seq_len - filter_size.
    # Built in-kernel from iota (no mask input / DMA needed).
    col = lax.broadcasted_iota(jnp.int32, (1, FEATURE_PAD), 1)
    last_valid = jnp.full((1, FEATURE_PAD), seq_len - DIS_FILTER_SIZES[0], jnp.int32)
    for off, f in zip(_BANK_OFFSETS[1:], DIS_FILTER_SIZES[1:]):
        last_valid = jnp.where(col >= off, seq_len - f, last_valid)
    last_valid = jnp.where(col >= FEATURE_DIM, -1, last_valid)   # pad cols never valid

    # conv x4 + ReLU + masked running-max pool, statically unrolled over h.
    # Every bank shares one KMAX-wide window; banks with f < MAX_F have zero
    # weight rows for the extra taps, and padded sequence rows embed to zero
    # (Linear without bias), so the shared-window trick is exact.
    pred = None
    for h in range(h_windows):
        win = x[:, EMB_DIM_SINGLE * h: EMB_DIM_SINGLE * h + KMAX]         # [tbm, 40]
        y = jnp.dot(win, wc, preferred_element_type=jnp.float32) + bc     # [tbm, 1280]
        y = jnp.maximum(y, 0.0)
        if h > seq_len - MAX_F:        # only the last few h need masking
            y = jnp.where(h <= last_valid, y, 0.0)   # exact: ReLU output >= 0
        pred = y if pred is None else jnp.maximum(pred, y)

    # highway
    hw = jnp.dot(pred.astype(jnp.bfloat16), whw_ref[...],
                 preferred_element_type=jnp.float32) + bhw_ref[...]
    sig = jax.nn.sigmoid(hw)
    blended = sig * jnp.maximum(hw, 0.0) + (1.0 - sig) * pred
    # TODO(synk): nn.Dropout(0.25) is stochastic; eval-mode identity is used here.

    feat = jnp.dot(blended.astype(jnp.bfloat16), wf_ref[...],
                   preferred_element_type=jnp.float32) + bf_ref[...]
    logits = jnp.dot(feat.astype(jnp.bfloat16), wo_ref[...],
                     preferred_element_type=jnp.float32) + bo_ref[...]
    o_ref[...] = logits                              # [tbm, 128]; column 0 is real


# ---- parameter packing into lane-dense bf16 kernel operands ------------------
def _pack_params(params):
    wc = jnp.zeros((KMAX, FEATURE_PAD), jnp.float32)
    bc = jnp.zeros((1, FEATURE_PAD), jnp.float32)
    for off, f, w, b in zip(_BANK_OFFSETS, DIS_FILTER_SIZES,
                            params["conv_w"], params["conv_b"]):
        n = w.shape[1]
        wc = wc.at[: f * EMB_DIM_SINGLE, off: off + n].set(w)
        bc = bc.at[0, off: off + n].set(b)

    whw = jnp.pad(params["w_hw"],
                  ((0, FEATURE_PAD - FEATURE_DIM), (0, FEATURE_PAD - FEATURE_DIM)))
    bhw = jnp.pad(params["b_hw"], (0, FEATURE_PAD - FEATURE_DIM)).reshape(1, FEATURE_PAD)

    wf = jnp.pad(params["w_f2o"],
                 ((0, FEATURE_PAD - FEATURE_DIM), (0, HIDDEN_PAD - OUT_HIDDEN)))
    bf = jnp.pad(params["b_f2o"], (0, HIDDEN_PAD - OUT_HIDDEN)).reshape(1, HIDDEN_PAD)

    wo = jnp.pad(params["w_out"], ((0, HIDDEN_PAD - OUT_HIDDEN), (0, HIDDEN_PAD - 1)))
    bo = jnp.pad(params["b_out"], (0, HIDDEN_PAD - 1)).reshape(1, HIDDEN_PAD)

    return {
        "w_conv": wc.astype(jnp.bfloat16), "b_conv": bc,
        "w_hw": whw.astype(jnp.bfloat16), "b_hw": bhw,
        "w_f2o": wf.astype(jnp.bfloat16), "b_f2o": bf,
        "w_out": wo.astype(jnp.bfloat16), "b_out": bo,
    }


# ---- forward -----------------------------------------------------------------
def relgan_d_forward(inp, params):
    """inp: [B, S, V] float32 -> logits [B * NUM_REP] float32."""
    B, S, V = inp.shape
    if S < MAX_F:
        raise ValueError(f"seq_len must be >= {MAX_F} (the PyTorch Conv2d would fail too)")
    s_pad = S + MAX_F - 2            # zero tail so every bank shares KMAX-wide windows
    h_windows = S - MIN_F + 1        # window positions of the widest-valid (f=2) bank

    kp = _pack_params(params)

    # embedding (Linear, no bias) + (b, rep) relayout: plain XLA so the matmul
    # and the transpose fuse into one HBM pass (perf-review item).
    w_emb = params["w_emb_t"].astype(jnp.bfloat16)                        # [V, 128]
    emb = jnp.dot(inp.astype(jnp.bfloat16), w_emb,
                  preferred_element_type=jnp.float32).astype(jnp.bfloat16)  # [B, S, 128]
    emb = emb.reshape(B, S, NUM_REP, EMB_DIM_SINGLE).transpose(0, 2, 1, 3)
    emb_r = emb.reshape(B * NUM_REP, S * EMB_DIM_SINGLE)                  # [B*16, S*8]

    m = B * NUM_REP
    lp = _round_up(s_pad * EMB_DIM_SINGLE, 128)      # lane-dense; tail stays zero

    # row tile: large for MXU fill, but guarantee >= 2 grid steps for small
    # batches so v7x's second TensorCore gets work.
    if m >= 2 * _ROW_TILE:
        tbm = _ROW_TILE
    elif m > 16:
        tbm = _round_up((m + 1) // 2, 8)
    else:
        tbm = _round_up(max(m, 8), 8)
    mp = _round_up(m, tbm)

    emb_r = jnp.pad(emb_r, ((0, mp - m), (0, lp - S * EMB_DIM_SINGLE)))

    logits_pad = pl.pallas_call(
        functools.partial(_conv_head_kernel, seq_len=S, h_windows=h_windows),
        out_shape=jax.ShapeDtypeStruct((mp, HIDDEN_PAD), jnp.float32),
        grid_spec=pltpu.PrefetchScalarGridSpec(
            num_scalar_prefetch=0,
            grid=(mp // tbm,),
            in_specs=[
                pl.BlockSpec((tbm, lp), lambda i: (i, 0)),
                pl.BlockSpec((KMAX, FEATURE_PAD), lambda i: (0, 0)),
                pl.BlockSpec((1, FEATURE_PAD), lambda i: (0, 0)),
                pl.BlockSpec((FEATURE_PAD, FEATURE_PAD), lambda i: (0, 0)),
                pl.BlockSpec((1, FEATURE_PAD), lambda i: (0, 0)),
                pl.BlockSpec((FEATURE_PAD, HIDDEN_PAD), lambda i: (0, 0)),
                pl.BlockSpec((1, HIDDEN_PAD), lambda i: (0, 0)),
                pl.BlockSpec((HIDDEN_PAD, HIDDEN_PAD), lambda i: (0, 0)),
                pl.BlockSpec((1, HIDDEN_PAD), lambda i: (0, 0)),
            ],
            out_specs=pl.BlockSpec((tbm, HIDDEN_PAD), lambda i: (i, 0)),
        ),
        compiler_params=pltpu.CompilerParams(
            dimension_semantics=("parallel",),
            vmem_limit_bytes=_VMEM_LIMIT,
        ),
    )(emb_r, kp["w_conv"], kp["b_conv"], kp["w_hw"], kp["b_hw"],
      kp["w_f2o"], kp["b_f2o"], kp["w_out"], kp["b_out"])

    return logits_pad[:m, 0]


# ---- deterministic init, mirrors PyTorch init_params (std = 1/sqrt(shape[0])) ----
def init_params(key, vocab_size):
    keys = jax.random.split(key, 15)
    p = {}
    # embeddings: Linear(vocab, 128, bias=False), weight [128, V]
    w_emb = jax.random.normal(keys[0], (EMBED_DIM, vocab_size), jnp.float32) / math.sqrt(EMBED_DIM)
    p["w_emb_t"] = w_emb.T                                     # [V, 128]

    conv_w, conv_b = [], []
    ki = 1
    for n, f in zip(DIS_NUM_FILTERS, DIS_FILTER_SIZES):
        w = jax.random.normal(keys[ki], (n, 1, f, EMB_DIM_SINGLE), jnp.float32) / math.sqrt(n)
        ki += 1
        b = jax.random.normal(keys[ki], (n,), jnp.float32) / math.sqrt(n)
        ki += 1
        conv_w.append(w.reshape(n, f * EMB_DIM_SINGLE).T)      # [f*8, n]
        conv_b.append(b)
    p["conv_w"], p["conv_b"] = conv_w, conv_b

    w_hw = jax.random.normal(keys[ki], (FEATURE_DIM, FEATURE_DIM), jnp.float32) / math.sqrt(FEATURE_DIM)
    ki += 1
    b_hw = jax.random.normal(keys[ki], (FEATURE_DIM,), jnp.float32) / math.sqrt(FEATURE_DIM)
    ki += 1
    p["w_hw"], p["b_hw"] = w_hw.T, b_hw                        # [in, out], [out]

    w_f2o = jax.random.normal(keys[ki], (OUT_HIDDEN, FEATURE_DIM), jnp.float32) / math.sqrt(OUT_HIDDEN)
    ki += 1
    b_f2o = jax.random.normal(keys[ki], (OUT_HIDDEN,), jnp.float32) / math.sqrt(OUT_HIDDEN)
    ki += 1
    p["w_f2o"], p["b_f2o"] = w_f2o.T, b_f2o                    # [1200, 100], [100]

    w_out = jax.random.normal(keys[ki], (1, OUT_HIDDEN), jnp.float32) / math.sqrt(1)
    ki += 1
    b_out = jax.random.normal(keys[ki], (1,), jnp.float32) / math.sqrt(1)
    ki += 1
    p["w_out"], p["b_out"] = w_out.T, b_out                    # [100, 1], [1]
    return p


# ---- pure-JAX f32 reference (for a loose numerical check) --------------------
def _reference_forward(inp, params):
    B, S, _ = inp.shape
    emb = inp @ params["w_emb_t"]                              # [B, S, 128]
    pools = []
    for f, w, b in zip(DIS_FILTER_SIZES, params["conv_w"], params["conv_b"]):
        H = S - f + 1
        win = jnp.stack(
            [emb[:, h:h + f, :].reshape(B, f, NUM_REP, EMB_DIM_SINGLE) for h in range(H)],
            axis=1)                                            # [B, H, f, 16, 8]
        win = win.transpose(0, 1, 3, 2, 4).reshape(B, H, NUM_REP, f * EMB_DIM_SINGLE)
        conv = jnp.einsum("bhrk,kn->bhrn", win, w) + b
        pools.append(jnp.max(jax.nn.relu(conv), axis=1))       # [B, 16, n]
    pred = jnp.concatenate(pools, axis=-1).reshape(B * NUM_REP, FEATURE_DIM)
    hw = pred @ params["w_hw"] + params["b_hw"]
    sig = jax.nn.sigmoid(hw)
    blended = sig * jax.nn.relu(hw) + (1.0 - sig) * pred
    feat = blended @ params["w_f2o"] + params["b_f2o"]
    logits = feat @ params["w_out"] + params["b_out"]
    return logits[:, 0]


if __name__ == "__main__":
    B, S, V = 2, 8, 32   # small shapes: batch=2, seq_len=8, vocab_size=32
    key = jax.random.PRNGKey(0)
    k_inp, k_par = jax.random.split(key)

    # RelGAN feeds (approximately one-hot) distributions over the vocab.
    inp = jax.nn.softmax(jax.random.normal(k_inp, (B, S, V), jnp.float32), axis=-1)
    params = init_params(k_par, V)

    fwd = jax.jit(relgan_d_forward)
    logits = jax.block_until_ready(fwd(inp, params))

    assert logits.shape == (B * NUM_REP,), logits.shape
    assert bool(jnp.all(jnp.isfinite(logits)))

    # loose, bf16-tolerant check against the f32 reference
    ref = _reference_forward(inp, params)
    rel_err = jnp.linalg.norm(logits - ref) / (jnp.linalg.norm(ref) + 1e-6)
    assert float(rel_err) < 0.1, float(rel_err)

    print("KERNEL_OK")
</pallas_src>

<mosaic_0001>
module attributes {stable_mosaic.version = 11 : i64} {
  func.func @_conv_head_kernel(%arg0: i32, %arg1: memref<16x128xbf16, #tpu.memory_space<vmem>>, %arg2: memref<40x1280xbf16, #tpu.memory_space<vmem>>, %arg3: memref<1x1280xf32, #tpu.memory_space<vmem>>, %arg4: memref<1280x1280xbf16, #tpu.memory_space<vmem>>, %arg5: memref<1x1280xf32, #tpu.memory_space<vmem>>, %arg6: memref<1280x128xbf16, #tpu.memory_space<vmem>>, %arg7: memref<1x128xf32, #tpu.memory_space<vmem>>, %arg8: memref<128x128xbf16, #tpu.memory_space<vmem>>, %arg9: memref<1x128xf32, #tpu.memory_space<vmem>>, %arg10: memref<16x128xf32, #tpu.memory_space<vmem>>) attributes {dimension_semantics = [#tpu.dimension_semantics<parallel>], iteration_bounds = array<i64: 2>, scalar_prefetch = 0 : i64, scratch_operands = 0 : i64, tpu.core_type = #tpu.core_type<tc>, window_params = [{transform_indices = @transform_0, window_bounds = array<i64: 16, 128>}, {pipeline_mode = #tpu.pipeline_mode<synchronous>, transform_indices = @transform_1, window_bounds = array<i64: 40, 1280>}, {pipeline_mode = #tpu.pipeline_mode<synchronous>, transform_indices = @transform_2, window_bounds = array<i64: 1, 1280>}, {pipeline_mode = #tpu.pipeline_mode<synchronous>, transform_indices = @transform_3, window_bounds = array<i64: 1280, 1280>}, {pipeline_mode = #tpu.pipeline_mode<synchronous>, transform_indices = @transform_4, window_bounds = array<i64: 1, 1280>}, {pipeline_mode = #tpu.pipeline_mode<synchronous>, transform_indices = @transform_5, window_bounds = array<i64: 1280, 128>}, {pipeline_mode = #tpu.pipeline_mode<synchronous>, transform_indices = @transform_6, window_bounds = array<i64: 1, 128>}, {pipeline_mode = #tpu.pipeline_mode<synchronous>, transform_indices = @transform_7, window_bounds = array<i64: 128, 128>}, {pipeline_mode = #tpu.pipeline_mode<synchronous>, transform_indices = @transform_8, window_bounds = array<i64: 1, 128>}, {transform_indices = @transform_9, window_bounds = array<i64: 16, 128>}]} {
    %c0 = arith.constant 0 : index
    %c0_0 = arith.constant 0 : index
    %0 = vector.load %arg1[%c0, %c0_0] : memref<16x128xbf16, #tpu.memory_space<vmem>>, vector<16x128xbf16>
    %c0_1 = arith.constant 0 : index
    %c0_2 = arith.constant 0 : index
    %1 = vector.load %arg2[%c0_1, %c0_2] : memref<40x1280xbf16, #tpu.memory_space<vmem>>, vector<40x1280xbf16>
    %c0_3 = arith.constant 0 : index
    %c0_4 = arith.constant 0 : index
    %2 = vector.load %arg3[%c0_3, %c0_4] : memref<1x1280xf32, #tpu.memory_space<vmem>>, vector<1x1280xf32>
    %3 = tpu.iota {dimensions = array<i32: 1>} : vector<1x1280xi32>
    %c6_i32 = arith.constant 6 : i32
    %4 = vector.broadcast %c6_i32 : i32 to vector<1x1280xi32>
    %c300_i32 = arith.constant 300 : i32
    %5 = vector.broadcast %c300_i32 : i32 to vector<1x1280xi32>
    %6 = arith.cmpi sge, %3, %5 : vector<1x1280xi32>
    %c5_i32 = arith.constant 5 : i32
    %7 = vector.broadcast %c5_i32 : i32 to vector<1x1280xi32>
    %8 = arith.select %6, %7, %4 : vector<1x1280xi1>, vector<1x1280xi32>
    %c600_i32 = arith.constant 600 : i32
    %9 = vector.broadcast %c600_i32 : i32 to vector<1x1280xi32>
    %10 = arith.cmpi sge, %3, %9 : vector<1x1280xi32>
    %c4_i32 = arith.constant 4 : i32
    %11 = vector.broadcast %c4_i32 : i32 to vector<1x1280xi32>
    %12 = arith.select %10, %11, %8 : vector<1x1280xi1>, vector<1x1280xi32>
    %c900_i32 = arith.constant 900 : i32
    %13 = vector.broadcast %c900_i32 : i32 to vector<1x1280xi32>
    %14 = arith.cmpi sge, %3, %13 : vector<1x1280xi32>
    %c3_i32 = arith.constant 3 : i32
    %15 = vector.broadcast %c3_i32 : i32 to vector<1x1280xi32>
    %16 = arith.select %14, %15, %12 : vector<1x1280xi1>, vector<1x1280xi32>
    %c1200_i32 = arith.constant 1200 : i32
    %17 = vector.broadcast %c1200_i32 : i32 to vector<1x1280xi32>
    %18 = arith.cmpi sge, %3, %17 : vector<1x1280xi32>
    %c-1_i32 = arith.constant -1 : i32
    %19 = vector.broadcast %c-1_i32 : i32 to vector<1x1280xi32>
    %20 = arith.select %18, %19, %16 : vector<1x1280xi1>, vector<1x1280xi32>
    %21 = vector.extract_strided_slice %0 {offsets = [0, 0], sizes = [16, 40], strides = [1, 1]} : vector<16x128xbf16> to vector<16x40xbf16>
    %cst = arith.constant dense<0.000000e+00> : vector<16x1280xf32>
    %22 = tpu.matmul %21, %1, %cst {dimension_numbers = #tpu.dot_dimension_numbers<[1], [0], [0], [1], [0, 0, 1, 1], [], []>} : vector<16x40xbf16>, vector<40x1280xbf16>, vector<16x1280xf32> -> vector<16x1280xf32>
    %23 = vector.broadcast %2 : vector<1x1280xf32> to vector<16x1280xf32>
    %24 = arith.addf %22, %23 : vector<16x1280xf32>
    %cst_5 = arith.constant 0.000000e+00 : f32
    %25 = vector.broadcast %cst_5 : f32 to vector<16x1280xf32>
    %26 = arith.maximumf %24, %25 : vector<16x1280xf32>
    %27 = vector.extract_strided_slice %0 {offsets = [0, 8], sizes = [16, 40], strides = [1, 1]} : vector<16x128xbf16> to vector<16x40xbf16>
    %cst_6 = arith.constant dense<0.000000e+00> : vector<16x1280xf32>
    %28 = tpu.matmul %27, %1, %cst_6 {dimension_numbers = #tpu.dot_dimension_numbers<[1], [0], [0], [1], [0, 0, 1, 1], [], []>} : vector<16x40xbf16>, vector<40x1280xbf16>, vector<16x1280xf32> -> vector<16x1280xf32>
    %29 = vector.broadcast %2 : vector<1x1280xf32> to vector<16x1280xf32>
    %30 = arith.addf %28, %29 : vector<16x1280xf32>
    %cst_7 = arith.constant 0.000000e+00 : f32
    %31 = vector.broadcast %cst_7 : f32 to vector<16x1280xf32>
    %32 = arith.maximumf %30, %31 : vector<16x1280xf32>
    %33 = arith.maximumf %26, %32 : vector<16x1280xf32>
    %34 = vector.extract_strided_slice %0 {offsets = [0, 16], sizes = [16, 40], strides = [1, 1]} : vector<16x128xbf16> to vector<16x40xbf16>
    %cst_8 = arith.constant dense<0.000000e+00> : vector<16x1280xf32>
    %35 = tpu.matmul %34, %1, %cst_8 {dimension_numbers = #tpu.dot_dimension_numbers<[1], [0], [0], [1], [0, 0, 1, 1], [], []>} : vector<16x40xbf16>, vector<40x1280xbf16>, vector<16x1280xf32> -> vector<16x1280xf32>
    %36 = vector.broadcast %2 : vector<1x1280xf32> to vector<16x1280xf32>
    %37 = arith.addf %35, %36 : vector<16x1280xf32>
    %cst_9 = arith.constant 0.000000e+00 : f32
    %38 = vector.broadcast %cst_9 : f32 to vector<16x1280xf32>
    %39 = arith.maximumf %37, %38 : vector<16x1280xf32>
    %40 = arith.maximumf %33, %39 : vector<16x1280xf32>
    %41 = vector.extract_strided_slice %0 {offsets = [0, 24], sizes = [16, 40], strides = [1, 1]} : vector<16x128xbf16> to vector<16x40xbf16>
    %cst_10 = arith.constant dense<0.000000e+00> : vector<16x1280xf32>
    %42 = tpu.matmul %41, %1, %cst_10 {dimension_numbers = #tpu.dot_dimension_numbers<[1], [0], [0], [1], [0, 0, 1, 1], [], []>} : vector<16x40xbf16>, vector<40x1280xbf16>, vector<16x1280xf32> -> vector<16x1280xf32>
    %43 = vector.broadcast %2 : vector<1x1280xf32> to vector<16x1280xf32>
    %44 = arith.addf %42, %43 : vector<16x1280xf32>
    %cst_11 = arith.constant 0.000000e+00 : f32
    %45 = vector.broadcast %cst_11 : f32 to vector<16x1280xf32>
    %46 = arith.maximumf %44, %45 : vector<16x1280xf32>
    %47 = arith.maximumf %40, %46 : vector<16x1280xf32>
    %48 = vector.extract_strided_slice %0 {offsets = [0, 32], sizes = [16, 40], strides = [1, 1]} : vector<16x128xbf16> to vector<16x40xbf16>
    %cst_12 = arith.constant dense<0.000000e+00> : vector<16x1280xf32>
    %49 = tpu.matmul %48, %1, %cst_12 {dimension_numbers = #tpu.dot_dimension_numbers<[1], [0], [0], [1], [0, 0, 1, 1], [], []>} : vector<16x40xbf16>, vector<40x1280xbf16>, vector<16x1280xf32> -> vector<16x1280xf32>
    %50 = vector.broadcast %2 : vector<1x1280xf32> to vector<16x1280xf32>
    %51 = arith.addf %49, %50 : vector<16x1280xf32>
    %cst_13 = arith.constant 0.000000e+00 : f32
    %52 = vector.broadcast %cst_13 : f32 to vector<16x1280xf32>
    %53 = arith.maximumf %51, %52 : vector<16x1280xf32>
    %c4_i32_14 = arith.constant 4 : i32
    %54 = vector.broadcast %c4_i32_14 : i32 to vector<1x1280xi32>
    %55 = arith.cmpi sge, %20, %54 : vector<1x1280xi32>
    %cst_15 = arith.constant 0.000000e+00 : f32
    %56 = vector.shape_cast %55 : vector<1x1280xi1> to vector<1x1280xi1>
    %57 = vector.broadcast %56 : vector<1x1280xi1> to vector<16x1280xi1>
    %58 = vector.broadcast %cst_15 : f32 to vector<16x1280xf32>
    %59 = arith.select %57, %53, %58 : vector<16x1280xi1>, vector<16x1280xf32>
    %60 = arith.maximumf %47, %59 : vector<16x1280xf32>
    %61 = vector.extract_strided_slice %0 {offsets = [0, 40], sizes = [16, 40], strides = [1, 1]} : vector<16x128xbf16> to vector<16x40xbf16>
    %cst_16 = arith.constant dense<0.000000e+00> : vector<16x1280xf32>
    %62 = tpu.matmul %61, %1, %cst_16 {dimension_numbers = #tpu.dot_dimension_numbers<[1], [0], [0], [1], [0, 0, 1, 1], [], []>} : vector<16x40xbf16>, vector<40x1280xbf16>, vector<16x1280xf32> -> vector<16x1280xf32>
    %63 = vector.broadcast %2 : vector<1x1280xf32> to vector<16x1280xf32>
    %64 = arith.addf %62, %63 : vector<16x1280xf32>
    %cst_17 = arith.constant 0.000000e+00 : f32
    %65 = vector.broadcast %cst_17 : f32 to vector<16x1280xf32>
    %66 = arith.maximumf %64, %65 : vector<16x1280xf32>
    %c5_i32_18 = arith.constant 5 : i32
    %67 = vector.broadcast %c5_i32_18 : i32 to vector<1x1280xi32>
    %68 = arith.cmpi sge, %20, %67 : vector<1x1280xi32>
    %cst_19 = arith.constant 0.000000e+00 : f32
    %69 = vector.shape_cast %68 : vector<1x1280xi1> to vector<1x1280xi1>
    %70 = vector.broadcast %69 : vector<1x1280xi1> to vector<16x1280xi1>
    %71 = vector.broadcast %cst_19 : f32 to vector<16x1280xf32>
    %72 = arith.select %70, %66, %71 : vector<16x1280xi1>, vector<16x1280xf32>
    %73 = arith.maximumf %60, %72 : vector<16x1280xf32>
    %74 = vector.extract_strided_slice %0 {offsets = [0, 48], sizes = [16, 40], strides = [1, 1]} : vector<16x128xbf16> to vector<16x40xbf16>
    %cst_20 = arith.constant dense<0.000000e+00> : vector<16x1280xf32>
    %75 = tpu.matmul %74, %1, %cst_20 {dimension_numbers = #tpu.dot_dimension_numbers<[1], [0], [0], [1], [0, 0, 1, 1], [], []>} : vector<16x40xbf16>, vector<40x1280xbf16>, vector<16x1280xf32> -> vector<16x1280xf32>
    %76 = vector.broadcast %2 : vector<1x1280xf32> to vector<16x1280xf32>
    %77 = arith.addf %75, %76 : vector<16x1280xf32>
    %cst_21 = arith.constant 0.000000e+00 : f32
    %78 = vector.broadcast %cst_21 : f32 to vector<16x1280xf32>
    %79 = arith.maximumf %77, %78 : vector<16x1280xf32>
    %c6_i32_22 = arith.constant 6 : i32
    %80 = vector.broadcast %c6_i32_22 : i32 to vector<1x1280xi32>
    %81 = arith.cmpi sge, %20, %80 : vector<1x1280xi32>
    %cst_23 = arith.constant 0.000000e+00 : f32
    %82 = vector.shape_cast %81 : vector<1x1280xi1> to vector<1x1280xi1>
    %83 = vector.broadcast %82 : vector<1x1280xi1> to vector<16x1280xi1>
    %84 = vector.broadcast %cst_23 : f32 to vector<16x1280xf32>
    %85 = arith.select %83, %79, %84 : vector<16x1280xi1>, vector<16x1280xf32>
    %86 = arith.maximumf %73, %85 : vector<16x1280xf32>
    %87 = arith.truncf %86 : vector<16x1280xf32> to vector<16x1280xbf16>
    %c0_24 = arith.constant 0 : index
    %c0_25 = arith.constant 0 : index
    %88 = vector.load %arg4[%c0_24, %c0_25] : memref<1280x1280xbf16, #tpu.memory_space<vmem>>, vector<1280x1280xbf16>
    %cst_26 = arith.constant dense<0.000000e+00> : vector<16x1280xf32>
    %89 = tpu.matmul %87, %88, %cst_26 {dimension_numbers = #tpu.dot_dimension_numbers<[1], [0], [0], [1], [0, 0, 1, 1], [], []>} : vector<16x1280xbf16>, vector<1280x1280xbf16>, vector<16x1280xf32> -> vector<16x1280xf32>
    %c0_27 = arith.constant 0 : index
    %c0_28 = arith.constant 0 : index
    %90 = vector.load %arg5[%c0_27, %c0_28] : memref<1x1280xf32, #tpu.memory_space<vmem>>, vector<1x1280xf32>
    %91 = vector.broadcast %90 : vector<1x1280xf32> to vector<16x1280xf32>
    %92 = arith.addf %89, %91 : vector<16x1280xf32>
    %93 = arith.negf %92 : vector<16x1280xf32>
    %94 = math.exp %93 : vector<16x1280xf32>
    %cst_29 = arith.constant 1.000000e+00 : f32
    %95 = vector.broadcast %cst_29 : f32 to vector<16x1280xf32>
    %96 = arith.addf %95, %94 : vector<16x1280xf32>
    %97 = arith.divf %95, %96 : vector<16x1280xf32>
    %cst_30 = arith.constant 0.000000e+00 : f32
    %98 = vector.broadcast %cst_30 : f32 to vector<16x1280xf32>
    %99 = arith.maximumf %92, %98 : vector<16x1280xf32>
    %100 = arith.mulf %97, %99 : vector<16x1280xf32>
    %cst_31 = arith.constant 1.000000e+00 : f32
    %101 = vector.broadcast %cst_31 : f32 to vector<16x1280xf32>
    %102 = arith.subf %101, %97 : vector<16x1280xf32>
    %103 = arith.mulf %102, %86 : vector<16x1280xf32>
    %104 = arith.addf %100, %103 : vector<16x1280xf32>
    %105 = arith.truncf %104 : vector<16x1280xf32> to vector<16x1280xbf16>
    %c0_32 = arith.constant 0 : index
    %c0_33 = arith.constant 0 : index
    %106 = vector.load %arg6[%c0_32, %c0_33] : memref<1280x128xbf16, #tpu.memory_space<vmem>>, vector<1280x128xbf16>
    %cst_34 = arith.constant dense<0.000000e+00> : vector<16x128xf32>
    %107 = tpu.matmul %105, %106, %cst_34 {dimension_numbers = #tpu.dot_dimension_numbers<[1], [0], [0], [1], [0, 0, 1, 1], [], []>} : vector<16x1280xbf16>, vector<1280x128xbf16>, vector<16x128xf32> -> vector<16x128xf32>
    %c0_35 = arith.constant 0 : index
    %c0_36 = arith.constant 0 : index
    %108 = vector.load %arg7[%c0_35, %c0_36] : memref<1x128xf32, #tpu.memory_space<vmem>>, vector<1x128xf32>
    %109 = vector.broadcast %108 : vector<1x128xf32> to vector<16x128xf32>
    %110 = arith.addf %107, %109 : vector<16x128xf32>
    %111 = arith.truncf %110 : vector<16x128xf32> to vector<16x128xbf16>
    %c0_37 = arith.constant 0 : index
    %c0_38 = arith.constant 0 : index
    %112 = vector.load %arg8[%c0_37, %c0_38] : memref<128x128xbf16, #tpu.memory_space<vmem>>, vector<128x128xbf16>
    %cst_39 = arith.constant dense<0.000000e+00> : vector<16x128xf32>
    %113 = tpu.matmul %111, %112, %cst_39 {dimension_numbers = #tpu.dot_dimension_numbers<[1], [0], [0], [1], [0, 0, 1, 1], [], []>} : vector<16x128xbf16>, vector<128x128xbf16>, vector<16x128xf32> -> vector<16x128xf32>
    %c0_40 = arith.constant 0 : index
    %c0_41 = arith.constant 0 : index
    %114 = vector.load %arg9[%c0_40, %c0_41] : memref<1x128xf32, #tpu.memory_space<vmem>>, vector<1x128xf32>
    %115 = vector.broadcast %114 : vector<1x128xf32> to vector<16x128xf32>
    %116 = arith.addf %113, %115 : vector<16x128xf32>
    %c0_42 = arith.constant 0 : index
    %c0_43 = arith.constant 0 : index
    %117 = vector.load %arg10[%c0_42, %c0_43] : memref<16x128xf32, #tpu.memory_space<vmem>>, vector<16x128xf32>
    tpu.vector_store %arg10[%c0_42, %c0_43], %116 {strides = array<i32>} : memref<16x128xf32, #tpu.memory_space<vmem>>, vector<16x128xf32>,
    return
  }
  func.func @transform_0(%arg0: i32) -> (i32, i32) {
    %c0_i32 = arith.constant 0 : i32
    %c0_i32_0 = arith.constant 0 : i32
    return %arg0, %c0_i32 : i32, i32
  }
  func.func @transform_1(%arg0: i32) -> (i32, i32) {
    %c0_i32 = arith.constant 0 : i32
    %c0_i32_0 = arith.constant 0 : i32
    %c0_i32_1 = arith.constant 0 : i32
    return %c0_i32, %c0_i32_0 : i32, i32
  }
  func.func @transform_2(%arg0: i32) -> (i32, i32) {
    %c0_i32 = arith.constant 0 : i32
    %c0_i32_0 = arith.constant 0 : i32
    %c0_i32_1 = arith.constant 0 : i32
    return %c0_i32, %c0_i32_0 : i32, i32
  }
  func.func @transform_3(%arg0: i32) -> (i32, i32) {
    %c0_i32 = arith.constant 0 : i32
    %c0_i32_0 = arith.constant 0 : i32
    %c0_i32_1 = arith.constant 0 : i32
    return %c0_i32, %c0_i32_0 : i32, i32
  }
  func.func @transform_4(%arg0: i32) -> (i32, i32) {
    %c0_i32 = arith.constant 0 : i32
    %c0_i32_0 = arith.constant 0 : i32
    %c0_i32_1 = arith.constant 0 : i32
    return %c0_i32, %c0_i32_0 : i32, i32
  }
  func.func @transform_5(%arg0: i32) -> (i32, i32) {
    %c0_i32 = arith.constant 0 : i32
    %c0_i32_0 = arith.constant 0 : i32
    %c0_i32_1 = arith.constant 0 : i32
    return %c0_i32, %c0_i32_0 : i32, i32
  }
  func.func @transform_6(%arg0: i32) -> (i32, i32) {
    %c0_i32 = arith.constant 0 : i32
    %c0_i32_0 = arith.constant 0 : i32
    %c0_i32_1 = arith.constant 0 : i32
    return %c0_i32, %c0_i32_0 : i32, i32
  }
  func.func @transform_7(%arg0: i32) -> (i32, i32) {
    %c0_i32 = arith.constant 0 : i32
    %c0_i32_0 = arith.constant 0 : i32
    %c0_i32_1 = arith.constant 0 : i32
    return %c0_i32, %c0_i32_0 : i32, i32
  }
  func.func @transform_8(%arg0: i32) -> (i32, i32) {
    %c0_i32 = arith.constant 0 : i32
    %c0_i32_0 = arith.constant 0 : i32
    %c0_i32_1 = arith.constant 0 : i32
    return %c0_i32, %c0_i32_0 : i32, i32
  }
  func.func @transform_9(%arg0: i32) -> (i32, i32) {
    %c0_i32 = arith.constant 0 : i32
    %c0_i32_0 = arith.constant 0 : i32
    return %arg0, %c0_i32 : i32, i32
  }
}

</mosaic_0001>

<bundles_post_ra>
// kernel: relgan_d_forward.1
= control target key start
LH: loop header
LB: loop body
LE: loop exit
PB: predicated region body
PF: predicated region fallthrough
CT: control target
= control target key end

     0   :  { %s12610_s30 = smov 0   ;;  %s16776_s0 = inlined_call_operand.vmem [shape: bf16[32,128], index: 0, kind: input, shape index: {}]   ;;  %s16777_s1 = inlined_call_operand.vmem [shape: bf16[40,1280], index: 1, kind: input, shape index: {}]   ;;  %s16778_s2 = inlined_call_operand.vmem [shape: f32[1,1280], index: 2, kind: input, shape index: {}]   ;;  %s16779_s3 = inlined_call_operand.vmem [shape: bf16[1280,1280], index: 3, kind: input, shape index: {}]   ;;  %s16780_s4 = inlined_call_operand.vmem [shape: f32[1,1280], index: 4, kind: input, shape index: {}]   ;;  %s16781_s5 = inlined_call_operand.vmem [shape: bf16[1280,128], index: 5, kind: input, shape index: {}]   ;;  %s16782_s6 = inlined_call_operand.vmem [shape: f32[1,128], index: 6, kind: input, shape index: {}]   ;;  %s16783_s7 = inlined_call_operand.vmem [shape: bf16[128,128], index: 7, kind: input, shape index: {}]   ;;  %s16784_s8 = inlined_call_operand.vmem [shape: f32[1,128], index: 8, kind: input, shape index: {}]   ;;  %s16785_s9 = inlined_call_operand.vmem [shape: f32[32,128], index: 9, kind: output, shape index: {}]  }
   0x1 LB: > { %s9811_s10 = sadd.s32 4294967295, %s12546_s30   ;;  %p9815_p0 = scmp.ge.s32.totalorder %s12546_s30, 1  ;;  %s12546_s30 = sphi %s12610_s30, %s19_s30  }
   0x2   : > { %p288_p1 = scmp.lt.s32.totalorder %s12546_s30, 3 }
   0x4   : > { %p289_p2 = pnand %p9815_p0, %p288_p1 }
   0x5   : > { %s9816_s11 = sshll.u32 (!%p289_p2), %s9811_s10, 1  ;;  %v12621_v0 = vld [vmem:[%s16777_s1 + $0x4] ss:$40 sps:$4 sm:$0xff] (!%p289_p2)   ;;  %v12626_v1 = vld [vmem:[%s16777_s1] ss:$40 sps:$4 sm:$0xff] (!%p289_p2)   ;;  %vm643_vm0 = vcmask (!%p289_p2), 1043456  }
   0x6   : > { %292 = sbr.rel (%p289_p2) target bundleno = 2033 (0x7f1), region = 56  ;;  %p325_p3 = scmp.lt.s32.totalorder (!%p289_p2), %s9816_s11, 3  ;;  %674 = vmatprep.subr.bf16.mxu0 (!%p289_p2), %v12621_v0  ;;  %v12632_v2 = vld [vmem:[%s16777_s1 + $0x54] ss:$40 sps:$4 sm:$0xff] (!%p289_p2)   ;;  %v12637_v3 = vld [vmem:[%s16777_s1 + $0x50] ss:$40 sps:$4 sm:$0xff] (!%p289_p2)  }
   0x7   : > { %v359_v4 = vld [vmem:[%s16777_s1 + $0xa0] sm:$0xff] (!%p289_p2)  ;;  %675 = vmatpush1.bf16.msra.mxu0 (!%p289_p2), %v12626_v1  ;;  %v12648_v5 = vld [vmem:[%s16777_s1 + $0xc] ss:$40 sps:$4 sm:$0xff] (!%p289_p2)   ;;  %v12656_v8 = vld [vmem:[%s16777_s1 + $0x8] ss:$40 sps:$4 sm:$0xff] (!%p289_p2)   ;;  %v12548_v9 = vmov (!%p289_p2), 0  }
   0x8   : > { %676 = vmatprep.subr.bf16.mxu0 (!%p289_p2), %v12632_v2  ;;  %v12651_v6 = vcombine.high (!%p289_p2), %v359_v4, %v359_v4  ;;  %v9841_v7 = vcombine.low (!%p289_p2), %v359_v4, %v359_v4  ;;  %717 = vmatprep.subr.bf16.mxu1 (!%p289_p2), %v12648_v5  ;;  %v12668_v10 = vld [vmem:[%s16777_s1 + $0x14] ss:$40 sps:$4 sm:$0xff] (!%p289_p2)   ;;  %v12688_v14 = vld [vmem:[%s16777_s1 + $0x58] ss:$40 sps:$4 sm:$0xff] (!%p289_p2)   ;;  %s12549_s17 = smov (!%p289_p2), 120   ;;  %s12550_s18 = smov (!%p289_p2), 104  }
   0x9   : > { %706 = vmatprep.mubr.bf16.mxu0 (!%p289_p2), %v12548_v9  ;;  %718 = vmatpush1.bf16.msra.mxu1 (!%p289_p2), %v12656_v8  ;;  %v12673_v11 = vld [vmem:[%s16777_s1 + $0x5c] ss:$40 sps:$4 sm:$0xff] (!%p289_p2)   ;;  %v360_v15 = vld [vmem:[%s16777_s1 + $0xa8] sm:$0xff] (!%p289_p2)  ;;  %vm639_vm1 = vcmask (!%p289_p2), 326656   ;;  %v12700_v16 = vld [vmem:[%s16777_s1 + $0x10] ss:$40 sps:$4 sm:$0xff] (!%p289_p2)  }
   0xa   : > { %749 = vmatprep.mubr.bf16.mxu1 (!%p289_p2), %v12548_v9  ;;  %v12682_v13 = vsel (!%p289_p2), %vm643_vm0, %v9841_v7, 0  ;;  %719 = vmatprep.subr.bf16.mxu1 (!%p289_p2), %v12673_v11  ;;  %v12705_v17 = vld [vmem:[%s16777_s1 + $0x64] ss:$40 sps:$4 sm:$0xff] (!%p289_p2)   ;;  %v12707_v18 = vcombine.high (!%p289_p2), %v360_v15, %v360_v15  ;;  %v9843_v19 = vcombine.low (!%p289_p2), %v360_v15, %v360_v15  ;;  %s12551_s27 = smov (!%p289_p2), 112   ;;  %s12552_s28 = smov (!%p289_p2), 96   ;;  %v361_v22 = vld [vmem:[%s16777_s1 + $0xb0] sm:$0xff] (!%p289_p2) }
   0xb   : > { %677 = vmatpush1.bf16.msra.mxu0 (!%p289_p2), %v12637_v3  ;;  %v12713_v20 = vld [vmem:[%s16777_s1 + $0x1c] ss:$40 sps:$4 sm:$0xff] (!%p289_p2)   ;;  %v12728_v23 = vld [vmem:[%s16777_s1 + $0x60] ss:$40 sps:$4 sm:$0xff] (!%p289_p2)   ;;  %v12740_v25 = vcombine.high (!%p289_p2), %v361_v22, %v361_v22  ;;  %v9845_v26 = vcombine.low (!%p289_p2), %v361_v22, %v361_v22  ;;  %v11123_v27 = vld [vmem:[%s16777_s1 + $0x6c] ss:$40 sps:$4 sm:$0xff] (!%p289_p2)  }
   0xc   : > { %9851 = vmatprep.subr.msk.bf16.mxu0 (!%p289_p2), %vm643_vm0, %v12651_v6  ;;  %v12718_v21 = vsel (!%p289_p2), %vm643_vm0, %v9843_v19, 0  ;;  %v12737_v24 = vld [vmem:[%s16777_s1 + $0x18] ss:$40 sps:$4 sm:$0xff] (!%p289_p2)   ;;  %v11125_v29 = vld [vmem:[%s16777_s1 + $0x68] ss:$40 sps:$4 sm:$0xff] (!%p289_p2)   ;;  %s12553_s24 = smov (!%p289_p2), 88  }
   0xd   : > { %s16809_s11 = smov (!%p325_p3, %s9816_s11), 3  ;;  %720 = vmatpush1.bf16.msra.mxu1 %v12688_v14  ;;  %v362_v28 = vld [vmem:[%s16777_s1 + $0xb8] sm:$0xff]  ;;  %v12758_v30 = vld [vmem:[%s16777_s1 + $0x24] ss:$40 sps:$4 sm:$0xff]   ;;  %v12766_v31 = vsel %vm643_vm0, %v9845_v26, 0  ;;  %s12554_s14 = smov 80  }
   0xe   : > { %s9817_s26 = sshll.u32 %s16809_s11, 2  ;;  %9853 = vmatprep.subr.msk.bf16.mxu1 %vm643_vm0, %v12707_v18  ;;  %v12768_v32 = vcombine.high %v362_v28, %v362_v28  ;;  %v9847_v33 = vcombine.low %v362_v28, %v362_v28  ;;  %v11122_v34 = vld [vmem:[%s16777_s1 + $0x20] ss:$40 sps:$4 sm:$0xff]   ;;  %v11126_v35 = vld [vmem:[%s16777_s1 + $0x74] ss:$40 sps:$4 sm:$0xff]   ;;  %vm12559_vm8 = vmmov 0  }
   0xf   : > { %s328_s29 = scalar_lea.vmem %s16776_s0, %s9817_s26  ;;  %679 = vmatpush1.bf16.msra.mxu0 %v12682_v13  ;;  %v363_v36 = vld [vmem:[%s16777_s1 + $0xc0] sm:$0xff]  ;;  %v12790_v38 = vld [vmem:[%s16777_s1 + $0x70] ss:$40 sps:$4 sm:$0xff]   ;;  %v12855_v44 = vld [vmem:[%s16777_s1 + $0x54] ss:$40 sps:$4 sm:$0xff]  }
  0x10   : > { %v12676_v12 = vld [vmem:[%s328_s29] sm:$0xff]   ;;  %760 = vmatprep.subr.bf16.mxu0 %v12668_v10  ;;  %v12785_v37 = vsel %vm643_vm0, %v9847_v33, 0  ;;  %v12796_v39 = vcombine.high %v363_v36, %v363_v36  ;;  %v9849_v40 = vcombine.low %v363_v36, %v363_v36  ;;  %v12864_v45 = vld [vmem:[%s16777_s1 + $0x50] ss:$40 sps:$4 sm:$0xff]   ;;  %v12876_v47 = vld [vmem:[%s16777_s1 + $0xc] ss:$40 sps:$4 sm:$0xff]  }
  0x11   : > { %909 = vrot.lane.b32.xlu0 %v12676_v12, %s12549_s17  ;;  %1429 = vrot.lane.b32.xlu1 %v12676_v12, %s12550_s18  ;;  %v12849_v43 = vld [vmem:[%s16777_s1] ss:$40 sps:$4 sm:$0xff]   ;;  %v12882_v48 = vld [vmem:[%s16777_s1 + $0x14] ss:$40 sps:$4 sm:$0xff]   ;;  %s9819_s17 = sshll.u32 %s16809_s11, 3 }
  0x12   : > { %9852 = vmatmul.mubr.msk.bf16.vlgmr.msra.gmra.mrb[0].mxu0 %vm639_vm1, %v12676_v12  ;;  %722 = vmatpush1.bf16.msra.mxu1 %v12718_v21  ;;  %v12807_v41 = vsel %vm643_vm0, %v9849_v40, 0  ;;  %v12890_v49 = vld [vmem:[%s16777_s1 + $0x8] ss:$40 sps:$4 sm:$0xff]   ;;  %v12902_v51 = vld [vmem:[%s16777_s1 + $0x5c] ss:$40 sps:$4 sm:$0xff]   ;;  %s334_s22 = scalar_lea.vmem %s16785_s9, %s9819_s17 }
  0x13   : > { %761 = vmatpush1.bf16.msra.mxu0 %v12700_v16  ;;  %803 = vmatprep.subr.bf16.mxu1 %v12713_v20  ;;  %v12896_v50 = vld [vmem:[%s16777_s1 + $0x10] ss:$40 sps:$4 sm:$0xff]   ;;  %v12908_v52 = vld [vmem:[%s16777_s1 + $0x64] ss:$40 sps:$4 sm:$0xff]   ;;  %v12922_v54 = vld [vmem:[%s16777_s1 + $0x60] ss:$40 sps:$4 sm:$0xff]  }
  0x14   : > { %762 = vmatprep.subr.bf16.mxu0 %v12705_v17  ;;  %792 = vmatprep.mubr.bf16.mxu0 %v12548_v9  ;;  %v12916_v53 = vld [vmem:[%s16777_s1 + $0x58] ss:$40 sps:$4 sm:$0xff]   ;;  %v12934_v55 = vld [vmem:[%s16777_s1 + $0x1c] ss:$40 sps:$4 sm:$0xff]   ;;  %v12960_v59 = vld [vmem:[%s16777_s1 + $0x6c] ss:$40 sps:$4 sm:$0xff]  }
  0x15   : > { %1169 = vrot.lane.b32.xlu0 %v12676_v12, %s12551_s27  ;;  %1689 = vrot.lane.b32.xlu1 %v12676_v12, %s12552_s28  ;;  %v12940_v56 = vld [vmem:[%s16777_s1 + $0x24] ss:$40 sps:$4 sm:$0xff]   ;;  %v12948_v57 = vld [vmem:[%s16777_s1 + $0x18] ss:$40 sps:$4 sm:$0xff]  }
  0x16   : > { %9854 = vmatmul.mubr.msk.bf16.vlgmr.msra.gmra.mrb[0].mxu1 %vm639_vm1, %v12676_v12  ;;  %v12954_v58 = vld [vmem:[%s16777_s1 + $0x20] ss:$40 sps:$4 sm:$0xff]   ;;  %v12966_v60 = vld [vmem:[%s16777_s1 + $0x74] ss:$40 sps:$4 sm:$0xff]   ;;  %v12987_v62 = vld [vmem:[%s16777_s1 + $0x4] ss:$40 sps:$4 sm:$0xff]  }
  0x17   : > { %763 = vmatpush1.bf16.msra.mxu0 %v12728_v23  ;;  %804 = vmatpush1.bf16.msra.mxu1 %v12737_v24  ;;  %v12974_v61 = vld [vmem:[%s16777_s1 + $0x68] ss:$40 sps:$4 sm:$0xff]  }
  0x18   : > { %9855 = vmatprep.subr.msk.bf16.mxu0 %vm643_vm0, %v12740_v25  ;;  %805 = vmatprep.subr.bf16.mxu1 %v11123_v27 }
  0x19   : > { %1999 = vrot.lane.b32.xlu0 %v12676_v12, %s12553_s24  ;;  %835 = vmatprep.mubr.bf16.mxu1 %v12548_v9 }
  0x1a   : > { %2309 = vrot.lane.b32.xlu1 %v12676_v12, %s12554_s14 }
  0x1b   : > { %765 = vmatpush1.bf16.msra.mxu0 %v12766_v31  ;;  %806 = vmatpush1.bf16.msra.mxu1 %v11125_v29 }
  0x1c   : > { %846 = vmatprep.subr.bf16.mxu0 %v12758_v30  ;;  %9857 = vmatprep.subr.msk.bf16.mxu1 %vm643_vm0, %v12768_v32 }
  0x1e   : > { %9856 = vmatmul.mubr.msk.bf16.vlgmr.msra.gmra.mrb[4].mxu0 %vm639_vm1, %v12676_v12 }
  0x1f   : > { %847 = vmatpush1.bf16.msra.mxu0 %v11122_v34  ;;  %808 = vmatpush1.bf16.msra.mxu1 %v12785_v37 }
  0x20   : > { %848 = vmatprep.subr.bf16.mxu0 %v11126_v35  ;;  %878 = vmatprep.mubr.bf16.mxu0 %v12548_v9 }
  0x21   : > { %914 = vmatprep.subr.bf16.mxu1 %v12621_v0 }
  0x22   : > { %9858 = vmatmul.mubr.msk.bf16.vlgmr.msra.gmra.mrb[4].mxu1 %vm639_vm1, %v12676_v12 }
  0x23   : > { %849 = vmatpush1.bf16.msra.mxu0 %v12790_v38  ;;  %915 = vmatpush1.bf16.msra.mxu1 %v12626_v1 }
  0x24   : > { %9859 = vmatprep.subr.msk.bf16.mxu0 %vm643_vm0, %v12796_v39  ;;  %916 = vmatprep.subr.bf16.mxu1 %v12632_v2  ;;  %v16792_v2 = vlaneseq }
  0x25   : > { %946 = vmatprep.mubr.bf16.mxu1 %v12548_v9 }
  0x26   : > { %v13089_v7 = vshrl.u32 %v16792_v2, 7 }
  0x27   : > { %851 = vmatpush1.bf16.msra.mxu0 %v12807_v41  ;;  %917 = vmatpush1.bf16.msra.mxu1 %v12637_v3 }
  0x28   : > { %957 = vmatprep.subr.bf16.mxu0 %v12648_v5  ;;  %9861 = vmatprep.subr.msk.bf16.mxu1 %vm643_vm0, %v12651_v6 }
  0x2a   : > { %9860 = vmatmul.mubr.msk.bf16.vlgmr.msra.gmra.mrb[8].mxu0 %vm639_vm1, %v12676_v12  ;;  %v16789_v12 = vsub.s32 4, %v13089_v7 }
  0x2b   : > { %958 = vmatpush1.bf16.msra.mxu0 %v12656_v8  ;;  %919 = vmatpush1.bf16.msra.mxu1 %v12682_v13 }
  0x2c   : > { %959 = vmatprep.subr.bf16.mxu0 %v12673_v11  ;;  %989 = vmatprep.mubr.bf16.mxu0 %v12548_v9 }
  0x2d   : > { %1000 = vmatprep.subr.bf16.mxu1 %v12668_v10 }
  0x2f   : > { %960 = vmatpush1.bf16.msra.mxu0 %v12688_v14  ;;  %v13105_v14 = vld [vmem:[%s16778_s2] sm:$0xff] }
  0x30   : > { %9863 = vmatprep.subr.msk.bf16.mxu0 %vm643_vm0, %v12707_v18  ;;  %v13121_v19 = vrot.slane %v13105_v14, %v16789_v12 }
  0x33   : > { %962 = vmatpush1.bf16.msra.mxu0 %v12718_v21 }
  0x34   : > { %1043 = vmatprep.subr.bf16.mxu0 %v12713_v20  ;;  %v16786_v20 = vsub.s32 7, %v13089_v7 }
  0x83   : > { %v910_v42 = vpop.permute.xlu0 %909  ;;  %v1430_v63 = vpop.permute.xlu1 %1429 }
  0x84   : > { %9862 = vmatmul.mubr.msk.bf16.vlgmr.msra.gmra.mrb[8].mxu1 %vm639_vm1, %v910_v42  ;;  %9864 = vmatmul.mubr.msk.bf16.vlgmr.msra.gmra.mrb[12].mxu0 %vm639_vm1, %v910_v42 }
  0x85   : > { %1001 = vmatpush1.bf16.msra.mxu1 %v12700_v16  ;;  %1044 = vmatpush1.bf16.msra.mxu0 %v12737_v24 }
  0x86   : > { %1002 = vmatprep.subr.bf16.mxu1 %v12705_v17  ;;  %1045 = vmatprep.subr.bf16.mxu0 %v11123_v27  ;;  %v16787_v17 = vsub.s32 6, %v13089_v7  ;;  %v13145_v27 = vrot.slane %v13105_v14, %v16786_v20  ;;  %v11181_v20 = vld [vmem:[%s16779_s3 + $0x2d0] ss:$40 sps:$4 sm:$0xff]  }
  0x87   : > { %1032 = vmatprep.mubr.bf16.mxu1 %v12548_v9  ;;  %1075 = vmatprep.mubr.bf16.mxu0 %v12548_v9  ;;  %v1170_v46 = vpop.permute.xlu0 %1169  ;;  %v1690_v1 = vpop.permute.xlu1 %1689 }
  0x89   : > { %1003 = vmatpush1.bf16.msra.mxu1 %v12728_v23  ;;  %1046 = vmatpush1.bf16.msra.mxu0 %v11125_v29  ;;  %v13135_v23 = vrot.slane %v13105_v14, %v16787_v17 }
  0x8a   : > { %9865 = vmatprep.subr.msk.bf16.mxu1 %vm643_vm0, %v12740_v25  ;;  %9867 = vmatprep.subr.msk.bf16.mxu0 %vm643_vm0, %v12768_v32 }
  0x8b   : > { %v2000_v33 = vpop.permute.xlu0 %1999 }
  0x8d   : > { %1005 = vmatpush1.bf16.msra.mxu1 %v12766_v31  ;;  %1048 = vmatpush1.bf16.msra.mxu0 %v12785_v37 }
  0x8e   : > { %1086 = vmatprep.subr.bf16.mxu1 %v12758_v30  ;;  %1174 = vmatprep.subr.bf16.mxu0 %v12621_v0  ;;  %v13038_v0 = vld [vmem:[%s16777_s1 + $0x70] ss:$40 sps:$4 sm:$0xff]  }
  0x90   : > { %9866 = vmatmul.mubr.msk.bf16.vlgmr.msra.gmra.mrb[12].mxu1 %vm639_vm1, %v910_v42  ;;  %9868 = vmatmul.mubr.msk.bf16.vlgmr.msra.gmra.mrb[16].mxu0 %vm639_vm1, %v910_v42 }
  0x91   : > { %1087 = vmatpush1.bf16.msra.mxu1 %v11122_v34  ;;  %1175 = vmatpush1.bf16.msra.mxu0 %v12849_v43 }
  0x92   : > { %1088 = vmatprep.subr.bf16.mxu1 %v11126_v35  ;;  %1176 = vmatprep.subr.bf16.mxu0 %v12855_v44 }
  0x93   : > { %1118 = vmatprep.mubr.bf16.mxu1 %v12548_v9  ;;  %1206 = vmatprep.mubr.bf16.mxu0 %v12548_v9 }
  0x95   : > { %1089 = vmatpush1.bf16.msra.mxu1 %v12790_v38  ;;  %1177 = vmatpush1.bf16.msra.mxu0 %v12864_v45 }
  0x96   : > { %9869 = vmatprep.subr.msk.bf16.mxu1 %vm643_vm0, %v12796_v39  ;;  %9871 = vmatprep.subr.msk.bf16.mxu0 %vm643_vm0, %v12651_v6 }
  0x99   : > { %1091 = vmatpush1.bf16.msra.mxu1 %v12807_v41  ;;  %1179 = vmatpush1.bf16.msra.mxu0 %v12682_v13 }
  0x9a   : > { %1217 = vmatprep.subr.bf16.mxu1 %v12876_v47  ;;  %1260 = vmatprep.subr.bf16.mxu0 %v12882_v48 }
  0x9c   : > { %9870 = vmatmul.mubr.msk.bf16.vlgmr.msra.gmra.mrb[16].mxu1 %vm639_vm1, %v910_v42  ;;  %9872 = vmatmul.mubr.msk.bf16.vlgmr.msra.gmra.mrb[20].mxu0 %vm639_vm1, %v1170_v46 }
  0x9d   : > { %1218 = vmatpush1.bf16.msra.mxu1 %v12890_v49  ;;  %1261 = vmatpush1.bf16.msra.mxu0 %v12896_v50 }
  0x9e   : > { %1219 = vmatprep.subr.bf16.mxu1 %v12902_v51  ;;  %1262 = vmatprep.subr.bf16.mxu0 %v12908_v52 }
  0x9f   : > { %1249 = vmatprep.mubr.bf16.mxu1 %v12548_v9  ;;  %1292 = vmatprep.mubr.bf16.mxu0 %v12548_v9 }
  0xa1   : > { %1220 = vmatpush1.bf16.msra.mxu1 %v12916_v53  ;;  %1263 = vmatpush1.bf16.msra.mxu0 %v12922_v54 }
  0xa2   : > { %9873 = vmatprep.subr.msk.bf16.mxu1 %vm643_vm0, %v12707_v18  ;;  %9875 = vmatprep.subr.msk.bf16.mxu0 %vm643_vm0, %v12740_v25 }
  0xa5   : > { %1222 = vmatpush1.bf16.msra.mxu1 %v12718_v21  ;;  %1265 = vmatpush1.bf16.msra.mxu0 %v12766_v31 }
  0xa6   : > { %1303 = vmatprep.subr.bf16.mxu1 %v12934_v55  ;;  %1346 = vmatprep.subr.bf16.mxu0 %v12940_v56 }
  0xa8   : > { %9874 = vmatmul.mubr.msk.bf16.vlgmr.msra.gmra.mrb[20].mxu1 %vm639_vm1, %v1170_v46  ;;  %9876 = vmatmul.mubr.msk.bf16.vlgmr.msra.gmra.mrb[24].mxu0 %vm639_vm1, %v1170_v46 }
  0xa9   : > { %1304 = vmatpush1.bf16.msra.mxu1 %v12948_v57  ;;  %1347 = vmatpush1.bf16.msra.mxu0 %v12954_v58 }
  0xaa   : > { %1305 = vmatprep.subr.bf16.mxu1 %v12960_v59  ;;  %1348 = vmatprep.subr.bf16.mxu0 %v12966_v60 }
  0xab   : > { %1335 = vmatprep.mubr.bf16.mxu1 %v12548_v9  ;;  %1378 = vmatprep.mubr.bf16.mxu0 %v12548_v9 }
  0xad   : > { %1306 = vmatpush1.bf16.msra.mxu1 %v12974_v61  ;;  %1349 = vmatpush1.bf16.msra.mxu0 %v12790_v38 }
  0xae   : > { %9877 = vmatprep.subr.msk.bf16.mxu1 %vm643_vm0, %v12768_v32  ;;  %9879 = vmatprep.subr.msk.bf16.mxu0 %vm643_vm0, %v12796_v39 }
  0xb1   : > { %1308 = vmatpush1.bf16.msra.mxu1 %v12785_v37  ;;  %1351 = vmatpush1.bf16.msra.mxu0 %v12807_v41 }
  0xb2   : > { %1434 = vmatprep.subr.bf16.mxu1 %v12987_v62  ;;  %1477 = vmatprep.subr.bf16.mxu0 %v12876_v47 }
  0xb4   : > { %9878 = vmatmul.mubr.msk.bf16.vlgmr.msra.gmra.mrb[24].mxu1 %vm639_vm1, %v1170_v46  ;;  %9880 = vmatmul.mubr.msk.bf16.vlgmr.msra.gmra.mrb[28].mxu0 %vm639_vm1, %v1170_v46 }
  0xb5   : > { %1435 = vmatpush1.bf16.msra.mxu1 %v12849_v43  ;;  %1478 = vmatpush1.bf16.msra.mxu0 %v12890_v49 }
  0xb6   : > { %1436 = vmatprep.subr.bf16.mxu1 %v12855_v44  ;;  %1479 = vmatprep.subr.bf16.mxu0 %v12902_v51 }
  0xb7   : > { %1466 = vmatprep.mubr.bf16.mxu1 %v12548_v9  ;;  %1509 = vmatprep.mubr.bf16.mxu0 %v12548_v9 }
  0xb9   : > { %1437 = vmatpush1.bf16.msra.mxu1 %v12864_v45  ;;  %1480 = vmatpush1.bf16.msra.mxu0 %v12916_v53 }
  0xba   : > { %9881 = vmatprep.subr.msk.bf16.mxu1 %vm643_vm0, %v12651_v6  ;;  %9883 = vmatprep.subr.msk.bf16.mxu0 %vm643_vm0, %v12707_v18 }
  0xbd   : > { %1439 = vmatpush1.bf16.msra.mxu1 %v12682_v13  ;;  %1482 = vmatpush1.bf16.msra.mxu0 %v12718_v21 }
  0xbe   : > { %1520 = vmatprep.subr.bf16.mxu1 %v12882_v48  ;;  %1563 = vmatprep.subr.bf16.mxu0 %v12934_v55 }
  0xc0   : > { %9882 = vmatmul.mubr.msk.bf16.vlgmr.msra.gmra.mrb[28].mxu1 %vm639_vm1, %v1430_v63  ;;  %9884 = vmatmul.mubr.msk.bf16.vlgmr.msra.gmra.mrb[32].mxu0 %vm639_vm1, %v1430_v63 }
  0xc1   : > { %1521 = vmatpush1.bf16.msra.mxu1 %v12896_v50  ;;  %1564 = vmatpush1.bf16.msra.mxu0 %v12948_v57 }
  0xc2   : > { %1522 = vmatprep.subr.bf16.mxu1 %v12908_v52  ;;  %1565 = vmatprep.subr.bf16.mxu0 %v12960_v59 }
  0xc3   : > { %1552 = vmatprep.mubr.bf16.mxu1 %v12548_v9  ;;  %1595 = vmatprep.mubr.bf16.mxu0 %v12548_v9 }
  0xc5   : > { %1523 = vmatpush1.bf16.msra.mxu1 %v12922_v54  ;;  %1566 = vmatpush1.bf16.msra.mxu0 %v12974_v61 }
  0xc6   : > { %9885 = vmatprep.subr.msk.bf16.mxu1 %vm643_vm0, %v12740_v25  ;;  %9887 = vmatprep.subr.msk.bf16.mxu0 %vm643_vm0, %v12768_v32 }
  0xc9   : > { %1525 = vmatpush1.bf16.msra.mxu1 %v12766_v31  ;;  %1568 = vmatpush1.bf16.msra.mxu0 %v12785_v37 }
  0xca   : > { %1606 = vmatprep.subr.bf16.mxu1 %v12940_v56  ;;  %1694 = vmatprep.subr.bf16.mxu0 %v12987_v62 }
  0xcc   : > { %9886 = vmatmul.mubr.msk.bf16.vlgmr.msra.gmra.mrb[32].mxu1 %vm639_vm1, %v1430_v63  ;;  %9888 = vmatmul.mubr.msk.bf16.vlgmr.msra.gmra.mrb[36].mxu0 %vm639_vm1, %v1430_v63 }
  0xcd   : > { %1607 = vmatpush1.bf16.msra.mxu1 %v12954_v58  ;;  %1695 = vmatpush1.bf16.msra.mxu0 %v12849_v43 }
  0xce   : > { %1608 = vmatprep.subr.bf16.mxu1 %v12966_v60  ;;  %1696 = vmatprep.subr.bf16.mxu0 %v12855_v44 }
  0xcf   : > { %1638 = vmatprep.mubr.bf16.mxu1 %v12548_v9  ;;  %1726 = vmatprep.mubr.bf16.mxu0 %v12548_v9 }
  0xd1   : > { %1609 = vmatpush1.bf16.msra.mxu1 %v13038_v0  ;;  %1697 = vmatpush1.bf16.msra.mxu0 %v12864_v45 }
  0xd2   : > { %9889 = vmatprep.subr.msk.bf16.mxu1 %vm643_vm0, %v12796_v39  ;;  %9891 = vmatprep.subr.msk.bf16.mxu0 %vm643_vm0, %v12651_v6 }
  0xd5   : > { %1611 = vmatpush1.bf16.msra.mxu1 %v12807_v41  ;;  %1699 = vmatpush1.bf16.msra.mxu0 %v12682_v13 }
  0xd6   : > { %1737 = vmatprep.subr.bf16.mxu1 %v12876_v47  ;;  %1780 = vmatprep.subr.bf16.mxu0 %v12882_v48 }
  0xd8   : > { %9890 = vmatmul.mubr.msk.bf16.vlgmr.msra.gmra.mrb[36].mxu1 %vm639_vm1, %v1430_v63  ;;  %9892 = vmatmul.mubr.msk.bf16.vlgmr.msra.gmra.mrb[40].mxu0 %vm639_vm1, %v1690_v1  ;;  %v16791_v63 = vsub.s32 2, %v13089_v7 }
  0xd9   : > { %1738 = vmatpush1.bf16.msra.mxu1 %v12890_v49  ;;  %1781 = vmatpush1.bf16.msra.mxu0 %v12896_v50 }
  0xda   : > { %1739 = vmatprep.subr.bf16.mxu1 %v12902_v51  ;;  %1782 = vmatprep.subr.bf16.mxu0 %v12908_v52 }
  0xdb   : > { %1769 = vmatprep.mubr.bf16.mxu1 %v12548_v9  ;;  %1812 = vmatprep.mubr.bf16.mxu0 %v12548_v9 }
  0xdd   : > { %1740 = vmatpush1.bf16.msra.mxu1 %v12916_v53  ;;  %1783 = vmatpush1.bf16.msra.mxu0 %v12922_v54 }
  0xde   : > { %9893 = vmatprep.subr.msk.bf16.mxu1 %vm643_vm0, %v12707_v18  ;;  %9895 = vmatprep.subr.msk.bf16.mxu0 %vm643_vm0, %v12740_v25 }
  0xe1   : > { %1742 = vmatpush1.bf16.msra.mxu1 %v12718_v21  ;;  %1785 = vmatpush1.bf16.msra.mxu0 %v12766_v31 }
  0xe2   : > { %1823 = vmatprep.subr.bf16.mxu1 %v12934_v55  ;;  %1866 = vmatprep.subr.bf16.mxu0 %v12940_v56 }
  0xe4   : > { %9894 = vmatmul.mubr.msk.bf16.vlgmr.msra.gmra.mrb[40].mxu1 %vm639_vm1, %v1690_v1  ;;  %9896 = vmatmul.mubr.msk.bf16.vlgmr.msra.gmra.mrb[44].mxu0 %vm639_vm1, %v1690_v1 }
  0xe5   : > { %1824 = vmatpush1.bf16.msra.mxu1 %v12948_v57  ;;  %1867 = vmatpush1.bf16.msra.mxu0 %v12954_v58  ;;  %v13078_v3 = vpop.f32.mrb[0].mxu0 }
  0xe6   : > { %1825 = vmatprep.subr.bf16.mxu1 %v12960_v59  ;;  %1868 = vmatprep.subr.bf16.mxu0 %v12966_v60  ;;  %v13084_v4 = vpop.f32.mrb[1].mxu0 }
  0xe7   : > { %1855 = vmatprep.mubr.bf16.mxu1 %v12548_v9  ;;  %1898 = vmatprep.mubr.bf16.mxu0 %v12548_v9  ;;  %v13086_v5 = vpop.f32.mrb[2].mxu0 }
  0xe8   : > { %v13091_v8 = vpop.f32.mrb[3].mxu0 }
  0xe9   : > { %1826 = vmatpush1.bf16.msra.mxu1 %v12974_v61  ;;  %1869 = vmatpush1.bf16.msra.mxu0 %v13038_v0  ;;  %v13095_v10 = vpop.f32.mrb[0].mxu1 }
  0xea   : > { %9897 = vmatprep.subr.msk.bf16.mxu1 %vm643_vm0, %v12768_v32  ;;  %9899 = vmatprep.subr.msk.bf16.mxu0 %vm643_vm0, %v12796_v39  ;;  %v13099_v11 = vpop.f32.mrb[1].mxu1 }
  0xeb   : > { %v13107_v15 = vpop.f32.mrb[2].mxu1 }
  0xec   : > { %v13111_v16 = vpop.f32.mrb[3].mxu1 }
  0xed   : > { %1828 = vmatpush1.bf16.msra.mxu1 %v12785_v37  ;;  %1871 = vmatpush1.bf16.msra.mxu0 %v12807_v41 }
  0xee   : > { %2004 = vmatprep.subr.bf16.mxu1 %v12987_v62  ;;  %2047 = vmatprep.subr.bf16.mxu0 %v12876_v47 }
  0xf0   : > { %9898 = vmatmul.mubr.msk.bf16.vlgmr.msra.gmra.mrb[44].mxu1 %vm639_vm1, %v1690_v1  ;;  %9900 = vmatmul.mubr.msk.bf16.vlgmr.msra.gmra.mrb[48].mxu0 %vm639_vm1, %v1690_v1  ;;  %v16790_v1 = vsub.s32 3, %v13089_v7 }
  0xf1   : > { %2005 = vmatpush1.bf16.msra.mxu1 %v12849_v43  ;;  %2048 = vmatpush1.bf16.msra.mxu0 %v12890_v49  ;;  %v794_v22 = vpop.f32.mrb[4].mxu0  ;;  %v12521_v49 = vld [vmem:[%s16777_s1] ss:$40 sps:$4 sm:$0xff]  }
  0xf2   : > { %2006 = vmatprep.subr.bf16.mxu1 %v12855_v44  ;;  %2049 = vmatprep.subr.bf16.mxu0 %v12902_v51  ;;  %v13138_v24 = vadd.f32 %v794_v22, %v13121_v19  ;;  %v13140_v26 = vpop.f32.mrb[5].mxu0  ;;  %v12523_v51 = vld [vmem:[%s16777_s1 + $0x50] ss:$40 sps:$4 sm:$0xff]   ;;  %v11139_v22 = vld [vmem:[%s16779_s3 + $0xa0] ss:$40 sps:$4 sm:$0xff]  }
  0xf3   : > { %2036 = vmatprep.mubr.bf16.mxu1 %v12548_v9  ;;  %2079 = vmatprep.mubr.bf16.mxu0 %v12548_v9  ;;  %v798_v28 = vpop.f32.mrb[6].mxu0 }
  0xf4   : > { %v13148_v29 = vadd.f32 %v798_v28, %v13121_v19  ;;  %v13150_v30 = vpop.f32.mrb[7].mxu0 }
  0xf5   : > { %2007 = vmatpush1.bf16.msra.mxu1 %v12864_v45  ;;  %2050 = vmatpush1.bf16.msra.mxu0 %v12916_v53  ;;  %v837_v34 = vpop.f32.mrb[4].mxu1  ;;  %v12524_v53 = vld [vmem:[%s16777_s1 + $0xc] ss:$40 sps:$4 sm:$0xff]  }
  0xf6   : > { %9901 = vmatprep.subr.msk.bf16.mxu1 %vm643_vm0, %v12651_v6  ;;  %9903 = vmatprep.subr.msk.bf16.mxu0 %vm643_vm0, %v12707_v18  ;;  %v13157_v35 = vadd.f32 %v837_v34, %v13135_v23  ;;  %v839_v36 = vpop.f32.mrb[5].mxu1  ;;  %v16788_v34 = vsub.s32 5, %v13089_v7 }
  0xf7   : > { %v13160_v38 = vadd.f32 %v839_v36, %v13145_v27  ;;  %v841_v40 = vpop.f32.mrb[6].mxu1  ;;  %v11144_v36 = vld [vmem:[%s16779_s3 + $0x504] ss:$40 sps:$4 sm:$0xff]  }
  0xf8   : > { %v13165_v42 = vadd.f32 %v841_v40, %v13135_v23  ;;  %v843_v43 = vpop.f32.mrb[7].mxu1  ;;  %v13325_v40 = vrot.slane %v13105_v14, %v16791_v63 }
  0xf9   : > { %2009 = vmatpush1.bf16.msra.mxu1 %v12682_v13  ;;  %2052 = vmatpush1.bf16.msra.mxu0 %v12718_v21  ;;  %v13170_v44 = vadd.f32 %v843_v43, %v13145_v27  ;;  %v11142_v43 = vld [vmem:[%s16779_s3 + $0x500] ss:$40 sps:$4 sm:$0xff]  }
  0xfa   : > { %2090 = vmatprep.subr.bf16.mxu1 %v12882_v48  ;;  %2133 = vmatprep.subr.bf16.mxu0 %v12934_v55  ;;  %v12528_v55 = vld [vmem:[%s16777_s1 + $0x5c] ss:$40 sps:$4 sm:$0xff]  }
  0xfc   : > { %9902 = vmatmul.mubr.msk.bf16.vlgmr.msra.gmra.mrb[48].mxu1 %vm639_vm1, %v2000_v33  ;;  %9904 = vmatmul.mubr.msk.bf16.vlgmr.msra.gmra.mrb[52].mxu0 %vm639_vm1, %v2000_v33 }
  0xfd   : > { %2091 = vmatpush1.bf16.msra.mxu1 %v12896_v50  ;;  %2134 = vmatpush1.bf16.msra.mxu0 %v12948_v57  ;;  %v13178_v45 = vpop.f32.mrb[8].mxu0  ;;  %v12522_v50 = vld [vmem:[%s16777_s1 + $0x54] ss:$40 sps:$4 sm:$0xff]   ;;  %v12530_v57 = vld [vmem:[%s16777_s1 + $0x58] ss:$40 sps:$4 sm:$0xff]  }
  0xfe   : > { %2092 = vmatprep.subr.bf16.mxu1 %v12908_v52  ;;  %2135 = vmatprep.subr.bf16.mxu0 %v12960_v59  ;;  %v13184_v46 = vpop.f32.mrb[9].mxu0  ;;  %v2310_v52 = vpop.permute.xlu1 %2309  ;;  %v12532_v59 = vld [vmem:[%s16777_s1 + $0x1c] ss:$40 sps:$4 sm:$0xff]  }
  0xff   : > { %2122 = vmatprep.mubr.bf16.mxu1 %v12548_v9  ;;  %2165 = vmatprep.mubr.bf16.mxu0 %v12548_v9  ;;  %v13186_v47 = vpop.f32.mrb[10].mxu0 }
 0x100   : > { %v13188_v48 = vpop.f32.mrb[11].mxu0 }
 0x101   : > { %2093 = vmatpush1.bf16.msra.mxu1 %v12922_v54  ;;  %2136 = vmatpush1.bf16.msra.mxu0 %v12974_v61  ;;  %v12525_v54 = vld [vmem:[%s16777_s1 + $0x14] ss:$40 sps:$4 sm:$0xff]   ;;  %v12538_v61 = vld [vmem:[%s16777_s1 + $0x68] ss:$40 sps:$4 sm:$0xff]  }
 0x102   : > { %9905 = vmatprep.subr.msk.bf16.mxu1 %vm643_vm0, %v12740_v25  ;;  %9907 = vmatprep.subr.msk.bf16.mxu0 %vm643_vm0, %v12768_v32 }
 0x105   : > { %2095 = vmatpush1.bf16.msra.mxu1 %v12766_v31  ;;  %2138 = vmatpush1.bf16.msra.mxu0 %v12785_v37 }
 0x106   : > { %2176 = vmatprep.subr.bf16.mxu1 %v12940_v56  ;;  %2314 = vmatprep.subr.bf16.mxu0 %v12987_v62  ;;  %v12529_v56 = vld [vmem:[%s16777_s1 + $0x64] ss:$40 sps:$4 sm:$0xff]   ;;  %v11133_v62 = vld [vmem:[%s16779_s3] ss:$40 sps:$4 sm:$0xff]  }
 0x108   : > { %9906 = vmatmul.mubr.msk.bf16.vlgmr.msra.gmra.mrb[52].mxu1 %vm639_vm1, %v2000_v33  ;;  %9908 = vmatmul.mubr.msk.bf16.vlgmr.msra.gmra.mrb[56].mxu0 %vm639_vm1, %v2000_v33 }
 0x109   : > { %2177 = vmatpush1.bf16.msra.mxu1 %v12954_v58  ;;  %2315 = vmatpush1.bf16.msra.mxu0 %v12521_v49  ;;  %v12531_v58 = vld [vmem:[%s16777_s1 + $0x60] ss:$40 sps:$4 sm:$0xff]   ;;  %v11147_v49 = vld [vmem:[%s16779_s3 + $0xf4] ss:$40 sps:$4 sm:$0xff]  }
 0x10a   : > { %2178 = vmatprep.subr.bf16.mxu1 %v12966_v60  ;;  %2316 = vmatprep.subr.bf16.mxu0 %v12522_v50  ;;  %v12533_v60 = vld [vmem:[%s16777_s1 + $0x24] ss:$40 sps:$4 sm:$0xff]   ;;  %v13336_v50 = vrot.slane %v13105_v14, %v16790_v1 }
 0x10b   : > { %2208 = vmatprep.mubr.bf16.mxu1 %v12548_v9  ;;  %2346 = vmatprep.mubr.bf16.mxu0 %v12548_v9 }
 0x10d   : > { %2179 = vmatpush1.bf16.msra.mxu1 %v13038_v0  ;;  %2317 = vmatpush1.bf16.msra.mxu0 %v12523_v51  ;;  %v11145_v51 = vld [vmem:[%s16779_s3 + $0xf0] ss:$40 sps:$4 sm:$0xff]  }
 0x10e   : > { %9909 = vmatprep.subr.msk.bf16.mxu1 %vm643_vm0, %v12796_v39  ;;  %9911 = vmatprep.subr.msk.bf16.mxu0 %vm643_vm0, %v12651_v6  ;;  %v12526_v6 = vld [vmem:[%s16777_s1 + $0x8] ss:$40 sps:$4 sm:$0xff]  }
 0x111   : > { %2181 = vmatpush1.bf16.msra.mxu1 %v12807_v41  ;;  %2319 = vmatpush1.bf16.msra.mxu0 %v12682_v13  ;;  %v12527_v13 = vld [vmem:[%s16777_s1 + $0x10] ss:$40 sps:$4 sm:$0xff]  }
 0x112   : > { %2357 = vmatprep.subr.bf16.mxu1 %v12524_v53  ;;  %2400 = vmatprep.subr.bf16.mxu0 %v12525_v54  ;;  %v13352_v54 = vrot.slane %v13105_v14, %v16788_v34 }
 0x114   : > { %9910 = vmatmul.mubr.msk.bf16.vlgmr.msra.gmra.mrb[56].mxu1 %vm639_vm1, %v2000_v33  ;;  %9912 = vmatmul.mubr.msk.bf16.vlgmr.msra.gmra.mrb[60].mxu0 %vm639_vm1, %v2310_v52 }
 0x115   : > { %2358 = vmatpush1.bf16.msra.mxu1 %v12526_v6  ;;  %2401 = vmatpush1.bf16.msra.mxu0 %v12527_v13 }
 0x116   : > { %2359 = vmatprep.subr.bf16.mxu1 %v12528_v55  ;;  %2402 = vmatprep.subr.bf16.mxu0 %v12529_v56  ;;  %v13381_v55 = vadd.f32 %v13107_v15, %v13325_v40  ;;  %v13388_v56 = vadd.f32 %v13111_v16, %v13336_v50  ;;  %v11156_v16 = vld [vmem:[%s16779_s3 + $0x5a4] ss:$40 sps:$4 sm:$0xff]  }
 0x117   : > { %2389 = vmatprep.mubr.bf16.mxu1 %v12548_v9  ;;  %2432 = vmatprep.mubr.bf16.mxu0 %v12548_v9 }
 0x119   : > { %2360 = vmatpush1.bf16.msra.mxu1 %v12530_v57  ;;  %2403 = vmatpush1.bf16.msra.mxu0 %v12531_v58 }
 0x11a   : > { %9913 = vmatprep.subr.msk.bf16.mxu1 %vm643_vm0, %v12707_v18  ;;  %9915 = vmatprep.subr.msk.bf16.mxu0 %vm643_vm0, %v12740_v25  ;;  %v12534_v18 = vld [vmem:[%s16777_s1 + $0x18] ss:$40 sps:$4 sm:$0xff]   ;;  %v12536_v25 = vld [vmem:[%s16777_s1 + $0x6c] ss:$40 sps:$4 sm:$0xff]  }
 0x11d   : > { %2362 = vmatpush1.bf16.msra.mxu1 %v12718_v21  ;;  %2405 = vmatpush1.bf16.msra.mxu0 %v12766_v31  ;;  %v12535_v21 = vld [vmem:[%s16777_s1 + $0x20] ss:$40 sps:$4 sm:$0xff]   ;;  %v12537_v31 = vld [vmem:[%s16777_s1 + $0x74] ss:$40 sps:$4 sm:$0xff]  }
 0x11e   : > { %2443 = vmatprep.subr.bf16.mxu1 %v12532_v59  ;;  %2486 = vmatprep.subr.bf16.mxu0 %v12533_v60  ;;  %v13400_v60 = vadd.f32 %v13150_v30, %v13352_v54  ;;  %v901_v30 = vmax.f32 %v13381_v55, 0.0  ;;  %v11195_v55 = vld [vmem:[%s16779_s3 + $0x374] ss:$40 sps:$4 sm:$0xff]  }
 0x120   : > { %9914 = vmatmul.mubr.msk.bf16.vlgmr.msra.gmra.mrb[60].mxu1 %vm639_vm1, %v2310_v52  ;;  %9916 = vmatmul.mubr.msk.bf16.vlgmr.msra.gmra.mrb[64].mxu0 %vm639_vm1, %v2310_v52 }
 0x121   : > { %2444 = vmatpush1.bf16.msra.mxu1 %v12534_v18  ;;  %2487 = vmatpush1.bf16.msra.mxu0 %v12535_v21  ;;  %v11159_v21 = vld [vmem:[%s16779_s3 + $0x194] ss:$40 sps:$4 sm:$0xff]  }
 0x122   : > { %2445 = vmatprep.subr.bf16.mxu1 %v12536_v25  ;;  %2488 = vmatprep.subr.bf16.mxu0 %v12537_v31  ;;  %v11157_v31 = vld [vmem:[%s16779_s3 + $0x190] ss:$40 sps:$4 sm:$0xff]  }
 0x123   : > { %2475 = vmatprep.mubr.bf16.mxu1 %v12548_v9  ;;  %2518 = vmatprep.mubr.bf16.mxu0 %v12548_v9  ;;  %v11135_v9 = vld [vmem:[%s16779_s3 + $0x4] ss:$40 sps:$4 sm:$0xff]  }
 0x125   : > { %2446 = vmatpush1.bf16.msra.mxu1 %v12538_v61  ;;  %2489 = vmatpush1.bf16.msra.mxu0 %v13038_v0  ;;  %v11141_v0 = vld [vmem:[%s16779_s3 + $0xa4] ss:$40 sps:$4 sm:$0xff]   ;;  %v902_v61 = vmax.f32 %v13388_v56, 0.0 }
 0x126   : > { %9917 = vmatprep.subr.msk.bf16.mxu1 %vm643_vm0, %v12768_v32  ;;  %9919 = vmatprep.subr.msk.bf16.mxu0 %vm643_vm0, %v12796_v39  ;;  %v11138_v32 = vld [vmem:[%s16779_s3 + $0x54] ss:$40 sps:$4 sm:$0xff]   ;;  %v13297_v39 = vsub.s32 0, %v13089_v7 }
 0x128   : > { %v13312_v28 = vrot.slane %v13105_v14, %v13297_v39 }
 0x129   : > { %2448 = vmatpush1.bf16.msra.mxu1 %v12785_v37  ;;  %2491 = vmatpush1.bf16.msra.mxu0 %v12807_v41  ;;  %v11136_v37 = vld [vmem:[%s16779_s3 + $0x50] ss:$40 sps:$4 sm:$0xff]   ;;  %v13300_v41 = vsub.s32 1, %v13089_v7 }
 0x12a   : > { %7483 = vmatprep.subr.bf16.mxu0 %v11135_v9  ;;  %7526 = vmatprep.subr.bf16.mxu1 %v11144_v36  ;;  %v13356_v6 = vadd.f32 %v13086_v5, %v13312_v28  ;;  %v11153_v5 = vld [vmem:[%s16779_s3 + $0x144] ss:$40 sps:$4 sm:$0xff]   ;;  %v893_v9 = vmax.f32 %v13138_v24, 0.0  ;;  %v11160_v36 = vld [vmem:[%s16779_s3 + $0x5f0] ss:$40 sps:$4 sm:$0xff]  }
 0x12b   : > { %v13316_v33 = vrot.slane %v13105_v14, %v13300_v41  ;;  %v11148_v14 = vld [vmem:[%s16779_s3 + $0x550] ss:$40 sps:$4 sm:$0xff]  }
 0x12c   : > { %9918 = vmatmul.mubr.msk.bf16.vlgmr.msra.gmra.mrb[64].mxu1 %vm639_vm1, %v2310_v52  ;;  %9920 = vmatmul.mubr.msk.bf16.vlgmr.msra.gmra.mrb[68].mxu0 %vm639_vm1, %v2310_v52  ;;  %v13343_v52 = vadd.f32 %v13078_v3, %v13312_v28  ;;  %v11150_v3 = vld [vmem:[%s16779_s3 + $0x554] ss:$40 sps:$4 sm:$0xff]   ;;  %v899_v15 = vmax.f32 %v13356_v6, 0.0  ;;  %v11190_v6 = vld [vmem:[%s16779_s3 + $0x780] ss:$40 sps:$4 sm:$0xff]  }
 0x12d   : > { %7484 = vmatpush1.bf16.msra.mxu0 %v11133_v62  ;;  %v13347_v53 = vadd.f32 %v13084_v4, %v13316_v33  ;;  %7527 = vmatpush1.bf16.msra.mxu1 %v11142_v43  ;;  %v13360_v13 = vadd.f32 %v13091_v8, %v13316_v33  ;;  %v13367_v4 = vadd.f32 %v13095_v10, %v13325_v40  ;;  %v11151_v10 = vld [vmem:[%s16779_s3 + $0x140] ss:$40 sps:$4 sm:$0xff]   ;;  %v11165_v43 = vld [vmem:[%s16779_s3 + $0x1e4] ss:$40 sps:$4 sm:$0xff]  }
 0x12e   : > { %7485 = vmatprep.subr.bf16.mxu0 %v11138_v32  ;;  %v13377_v8 = vadd.f32 %v13099_v11, %v13336_v50  ;;  %7528 = vmatprep.subr.bf16.mxu1 %v11150_v3  ;;  %v889_v57 = vmax.f32 %v13343_v52, 0.0  ;;  %v13394_v11 = vadd.f32 %v13140_v26, %v13352_v54  ;;  %v11154_v26 = vld [vmem:[%s16779_s3 + $0x5a0] ss:$40 sps:$4 sm:$0xff]   ;;  %v11168_v3 = vld [vmem:[%s16779_s3 + $0x644] ss:$40 sps:$4 sm:$0xff]  }
 0x12f   : > { %v890_v58 = vmax.f32 %v13347_v53, 0.0  ;;  %v900_v59 = vmax.f32 %v13360_v13, 0.0  ;;  %v891_v18 = vmax.f32 %v13367_v4, 0.0  ;;  %v11193_v13 = vld [vmem:[%s16779_s3 + $0x370] ss:$40 sps:$4 sm:$0xff]  }
 0x130   : > { %v892_v25 = vmax.f32 %v13377_v8, 0.0  ;;  %v894_v62 = vmax.f32 %v13394_v11, 0.0  ;;  %v11210_v11 = vld [vmem:[%s16779_s3 + $0x874] ss:$40 sps:$4 sm:$0xff]  }
 0x131   : > { %7486 = vmatpush1.bf16.msra.mxu0 %v11136_v37  ;;  %7529 = vmatpush1.bf16.msra.mxu1 %v11148_v14  ;;  %v365_v14 = vld [vmem:[%s16778_s2 + $0x8] sm:$0x3] }
 0x132   : > { %7487 = vmatprep.subr.bf16.mxu0 %v11141_v0  ;;  %7530 = vmatprep.subr.bf16.mxu1 %v11156_v16  ;;  %v11162_v0 = vld [vmem:[%s16779_s3 + $0x5f4] ss:$40 sps:$4 sm:$0xff]   ;;  %v11169_v16 = vld [vmem:[%s16779_s3 + $0x230] ss:$40 sps:$4 sm:$0xff]  }
 0x135   : > { %7488 = vmatpush1.bf16.msra.mxu0 %v11139_v22  ;;  %7531 = vmatpush1.bf16.msra.mxu1 %v11154_v26  ;;  %v895_v22 = vmax.f32 %v13157_v35, 0.0  ;;  %v11174_v26 = vld [vmem:[%s16779_s3 + $0x694] ss:$40 sps:$4 sm:$0xff]   ;;  %v16796_v35 = vmax.f32 %v13148_v29, 0.0  ;;  %v11213_v29 = vld [vmem:[%s16779_s3 + $0x464] ss:$40 sps:$4 sm:$0xff]  }
 0x136   : > { %7489 = vmatprep.subr.bf16.mxu0 %v11147_v49  ;;  %v896_v49 = vmax.f32 %v13160_v38, 0.0  ;;  %7532 = vmatprep.subr.bf16.mxu1 %v11162_v0  ;;  %v13461_v0 = vrot.slane %v365_v14, %v13297_v39 }
 0x139   : > { %7490 = vmatpush1.bf16.msra.mxu0 %v11145_v51  ;;  %v11163_v51 = vld [vmem:[%s16779_s3 + $0x1e0] ss:$40 sps:$4 sm:$0xff]   ;;  %7533 = vmatpush1.bf16.msra.mxu1 %v11160_v36 }
 0x13a   : > { %7491 = vmatprep.subr.bf16.mxu0 %v11153_v5  ;;  %v11166_v5 = vld [vmem:[%s16779_s3 + $0x640] ss:$40 sps:$4 sm:$0xff]   ;;  %7534 = vmatprep.subr.bf16.mxu1 %v11168_v3 }
 0x13b   : > { %v11175_v36 = vld [vmem:[%s16779_s3 + $0x280] ss:$40 sps:$4 sm:$0xff]  }
 0x13d   : > { %7492 = vmatpush1.bf16.msra.mxu0 %v11151_v10  ;;  %v11171_v10 = vld [vmem:[%s16779_s3 + $0x234] ss:$40 sps:$4 sm:$0xff]   ;;  %7535 = vmatpush1.bf16.msra.mxu1 %v11166_v5 }
 0x13e   : > { %7493 = vmatprep.subr.bf16.mxu0 %v11159_v21  ;;  %v11172_v21 = vld [vmem:[%s16779_s3 + $0x690] ss:$40 sps:$4 sm:$0xff]   ;;  %7536 = vmatprep.subr.bf16.mxu1 %v11174_v26 }
 0x141   : > { %7494 = vmatpush1.bf16.msra.mxu0 %v11157_v31  ;;  %v11177_v31 = vld [vmem:[%s16779_s3 + $0x284] ss:$40 sps:$4 sm:$0xff]   ;;  %7537 = vmatpush1.bf16.msra.mxu1 %v11172_v21 }
 0x142   : > { %7495 = vmatprep.subr.bf16.mxu0 %v11165_v43  ;;  %v13467_v43 = vrot.slane %v365_v14, %v13300_v41  ;;  %v13480_v14 = vadd.f32 %v13178_v45, %v13461_v0 }
 0x144   : > { %v13489_v17 = vadd.f32 %v13184_v46, %v13467_v43  ;;  %v11186_v46 = vld [vmem:[%s16779_s3 + $0x734] ss:$40 sps:$4 sm:$0xff]   ;;  %v13531_v4 = vadd.f32 %v13188_v48, %v13467_v43  ;;  %v897_v56 = vmax.f32 %v13480_v14, 0.0 }
 0x145   : > { %7496 = vmatpush1.bf16.msra.mxu0 %v11163_v51  ;;  %v11180_v51 = vld [vmem:[%s16779_s3 + $0x6e4] ss:$40 sps:$4 sm:$0xff]  }
 0x146   : > { %7497 = vmatprep.subr.bf16.mxu0 %v11171_v10  ;;  %v11178_v10 = vld [vmem:[%s16779_s3 + $0x6e0] ss:$40 sps:$4 sm:$0xff]   ;;  %7538 = vmatprep.subr.bf16.mxu1 %v11180_v51 }
 0x147   : > { %7539 = vmatpush1.bf16.msra.mxu1 %v11178_v10  ;;  %v11184_v10 = vld [vmem:[%s16779_s3 + $0x730] ss:$40 sps:$4 sm:$0xff]  }
 0x148   : > { %7540 = vmatprep.subr.bf16.mxu1 %v11186_v46 }
 0x149   : > { %7498 = vmatpush1.bf16.msra.mxu0 %v11169_v16  ;;  %v11183_v16 = vld [vmem:[%s16779_s3 + $0x2d4] ss:$40 sps:$4 sm:$0xff]  }
 0x14a   : > { %7499 = vmatprep.subr.bf16.mxu0 %v11177_v31 }
 0x14b   : > { %7541 = vmatpush1.bf16.msra.mxu1 %v11184_v10 }
 0x14d   : > { %7500 = vmatpush1.bf16.msra.mxu0 %v11175_v36 }
 0x14e   : > { %7501 = vmatprep.subr.bf16.mxu0 %v11183_v16 }
 0x151   : > { %7502 = vmatpush1.bf16.msra.mxu0 %v11181_v20 }
 0x157   : > { %v948_v3 = vpop.f32.mrb[8].mxu1  ;;  %v991_v5 = vpop.f32.mrb[12].mxu0 }
 0x158   : > { %v949_v26 = vadd.f32 %v948_v3, %v13312_v28  ;;  %v992_v21 = vadd.f32 %v991_v5, %v13325_v40  ;;  %v950_v31 = vpop.f32.mrb[9].mxu1  ;;  %v993_v36 = vpop.f32.mrb[13].mxu0 }
 0x159   : > { %v951_v34 = vadd.f32 %v950_v31, %v13316_v33  ;;  %v994_v45 = vadd.f32 %v993_v36, %v13336_v50  ;;  %v952_v12 = vpop.f32.mrb[10].mxu1  ;;  %v995_v1 = vpop.f32.mrb[14].mxu0 }
 0x15a   : > { %v1129_v3 = vmax.f32 %v949_v26, 0.0  ;;  %v1131_v5 = vmax.f32 %v992_v21, 0.0  ;;  %v953_v51 = vadd.f32 %v952_v12, %v13312_v28  ;;  %v996_v63 = vadd.f32 %v995_v1, %v13325_v40  ;;  %v954_v2 = vpop.f32.mrb[11].mxu1  ;;  %v997_v37 = vpop.f32.mrb[15].mxu0  ;;  %v11189_v12 = vld [vmem:[%s16779_s3 + $0x324] ss:$40 sps:$4 sm:$0xff]  }
 0x15b   : > { %v1130_v31 = vmax.f32 %v951_v34, 0.0  ;;  %v1132_v32 = vmax.f32 %v994_v45, 0.0  ;;  %v955_v36 = vadd.f32 %v954_v2, %v13316_v33  ;;  %v998_v16 = vadd.f32 %v997_v37, %v13336_v50  ;;  %v11187_v37 = vld [vmem:[%s16779_s3 + $0x320] ss:$40 sps:$4 sm:$0xff]   ;;  %7503 = vmatprep.subr.bf16.mxu0 %v11189_v12  ;;  %v11201_v45 = vld [vmem:[%s16779_s3 + $0x3c4] ss:$40 sps:$4 sm:$0xff]  }
 0x15c   : > { %v13508_v20 = vmax.f32 %v889_v57, %v1129_v3  ;;  %v13512_v1 = vmax.f32 %v891_v18, %v1131_v5  ;;  %v1139_v34 = vmax.f32 %v953_v51, 0.0  ;;  %v1141_v2 = vmax.f32 %v996_v63, 0.0  ;;  %7504 = vmatpush1.bf16.msra.mxu0 %v11187_v37 }
 0x15d   : > { %v13519_v26 = vmax.f32 %v890_v58, %v1130_v31  ;;  %v13523_v52 = vmax.f32 %v892_v25, %v1132_v32  ;;  %v1140_v57 = vmax.f32 %v955_v36, 0.0  ;;  %v1142_v21 = vmax.f32 %v998_v16, 0.0  ;;  %v11192_v58 = vld [vmem:[%s16779_s3 + $0x784] ss:$40 sps:$4 sm:$0xff]   ;;  %7505 = vmatprep.subr.bf16.mxu0 %v11195_v55  ;;  %v11196_v32 = vld [vmem:[%s16779_s3 + $0x7d0] ss:$40 sps:$4 sm:$0xff]  }
 0x15e   : > { %v13527_v63 = vadd.f32 %v13186_v47, %v13461_v0  ;;  %v13535_v53 = vmax.f32 %v899_v15, %v1139_v34  ;;  %v13539_v8 = vmax.f32 %v901_v30, %v1141_v2  ;;  %v905_v15 = vmax.f32 %v13165_v42, 0.0  ;;  %7542 = vmatprep.subr.bf16.mxu1 %v11192_v58  ;;  %v11198_v42 = vld [vmem:[%s16779_s3 + $0x7d4] ss:$40 sps:$4 sm:$0xff]   ;;  %v11199_v31 = vld [vmem:[%s16779_s3 + $0x3c0] ss:$40 sps:$4 sm:$0xff]  }
 0x15f   : > { %v13546_v47 = vmax.f32 %v900_v59, %v1140_v57  ;;  %v13550_v48 = vmax.f32 %v902_v61, %v1142_v21  ;;  %v906_v18 = vmax.f32 %v13170_v44, 0.0  ;;  %v898_v59 = vmax.f32 %v13489_v17, 0.0  ;;  %7543 = vmatpush1.bf16.msra.mxu1 %v11190_v6  ;;  %v11204_v6 = vld [vmem:[%s16779_s3 + $0x824] ss:$40 sps:$4 sm:$0xff]  }
 0x160   : > { %v907_v25 = vmax.f32 %v13527_v63, 0.0  ;;  %v908_v30 = vmax.f32 %v13531_v4, 0.0  ;;  %7506 = vmatpush1.bf16.msra.mxu0 %v11193_v13  ;;  %7544 = vmatprep.subr.bf16.mxu1 %v11198_v42  ;;  %v11228_v17 = vld [vmem:[%s16779_s3 + $0x964] ss:$40 sps:$4 sm:$0xff]   ;;  %v11226_v63 = vld [vmem:[%s16779_s3 + $0x960] ss:$40 sps:$4 sm:$0xff]  }
 0x161   : > { %7507 = vmatprep.subr.bf16.mxu0 %v11201_v45  ;;  %v11232_v4 = vld [vmem:[%s16779_s3 + $0x9b0] ss:$40 sps:$4 sm:$0xff]  }
 0x163   : > { %v1034_v44 = vpop.f32.mrb[12].mxu1  ;;  %v1077_v61 = vpop.f32.mrb[16].mxu0  ;;  %7545 = vmatpush1.bf16.msra.mxu1 %v11196_v32  ;;  %v11207_v32 = vld [vmem:[%s16779_s3 + $0x414] ss:$40 sps:$4 sm:$0xff]  }
 0x164   : > { %v1035_v3 = vadd.f32 %v1034_v44, %v13121_v19  ;;  %v1078_v5 = vadd.f32 %v1077_v61, %v13135_v23  ;;  %v1036_v51 = vpop.f32.mrb[13].mxu1  ;;  %v1079_v46 = vpop.f32.mrb[17].mxu0  ;;  %7508 = vmatpush1.bf16.msra.mxu0 %v11199_v31  ;;  %v11202_v61 = vld [vmem:[%s16779_s3 + $0x820] ss:$40 sps:$4 sm:$0xff]   ;;  %7546 = vmatprep.subr.bf16.mxu1 %v11204_v6  ;;  %v11217_v6 = vld [vmem:[%s16779_s3 + $0x4b0] ss:$40 sps:$4 sm:$0xff]  }
 0x165   : > { %v1037_v36 = vadd.f32 %v1036_v51, %v13352_v54  ;;  %v1080_v16 = vadd.f32 %v1079_v46, %v13145_v27  ;;  %v1038_v10 = vpop.f32.mrb[14].mxu1  ;;  %v1081_v12 = vpop.f32.mrb[18].mxu0  ;;  %v11205_v46 = vld [vmem:[%s16779_s3 + $0x410] ss:$40 sps:$4 sm:$0xff]   ;;  %7509 = vmatprep.subr.bf16.mxu0 %v11207_v32  ;;  %v11222_v32 = vld [vmem:[%s16779_s3 + $0x914] ss:$40 sps:$4 sm:$0xff]  }
 0x166   : > { %v1133_v34 = vmax.f32 %v1035_v3, 0.0  ;;  %v1135_v2 = vmax.f32 %v1078_v5, 0.0  ;;  %v1039_v37 = vadd.f32 %v1038_v10, %v13121_v19  ;;  %v1082_v57 = vadd.f32 %v1081_v12, %v13135_v23  ;;  %v1040_v21 = vpop.f32.mrb[15].mxu1  ;;  %v1083_v58 = vpop.f32.mrb[19].mxu0  ;;  %v11208_v10 = vld [vmem:[%s16779_s3 + $0x870] ss:$40 sps:$4 sm:$0xff]  }
 0x167   : > { %v1134_v55 = vmax.f32 %v1037_v36, 0.0  ;;  %v1136_v13 = vmax.f32 %v1080_v16, 0.0  ;;  %v1041_v42 = vadd.f32 %v1040_v21, %v13352_v54  ;;  %v1084_v44 = vadd.f32 %v1083_v58, %v13145_v27  ;;  %7547 = vmatpush1.bf16.msra.mxu1 %v11202_v61  ;;  %v11220_v61 = vld [vmem:[%s16779_s3 + $0x910] ss:$40 sps:$4 sm:$0xff]  }
 0x168   : > { %v13598_v45 = vmax.f32 %v893_v9, %v1133_v34  ;;  %v13602_v3 = vmax.f32 %v895_v22, %v1135_v2  ;;  %v1143_v5 = vmax.f32 %v1039_v37, 0.0  ;;  %v1145_v51 = vmax.f32 %v1082_v57, 0.0  ;;  %7510 = vmatpush1.bf16.msra.mxu0 %v11205_v46  ;;  %7548 = vmatprep.subr.bf16.mxu1 %v11210_v11  ;;  %v11214_v34 = vld [vmem:[%s16779_s3 + $0x8c0] ss:$40 sps:$4 sm:$0xff]   ;;  %v11219_v2 = vld [vmem:[%s16779_s3 + $0x4b4] ss:$40 sps:$4 sm:$0xff]  }
 0x169   : > { %v13609_v31 = vmax.f32 %v894_v62, %v1134_v55  ;;  %v13613_v24 = vmax.f32 %v896_v49, %v1136_v13  ;;  %v1144_v9 = vmax.f32 %v1041_v42, 0.0  ;;  %v1146_v36 = vmax.f32 %v1084_v44, 0.0  ;;  %7511 = vmatprep.subr.bf16.mxu0 %v11213_v29 }
 0x16a   : > { %v13617_v22 = vmax.f32 %v16796_v35, %v1143_v5  ;;  %v13619_v16 = vmax.f32 %v905_v15, %v1145_v51  ;;  %v16797_v62 = vmax.f32 %v13400_v60, 0.0  ;;  %v11211_v15 = vld [vmem:[%s16779_s3 + $0x460] ss:$40 sps:$4 sm:$0xff]   ;;  %v11216_v60 = vld [vmem:[%s16779_s3 + $0x8c4] ss:$40 sps:$4 sm:$0xff]  }
 0x16b   : > { %v13628_v49 = vmax.f32 %v906_v18, %v1146_v36  ;;  %7549 = vmatpush1.bf16.msra.mxu1 %v11208_v10 }
 0x16c   : > { %v13626_v38 = vmax.f32 %v16797_v62, %v1144_v9  ;;  %7512 = vmatpush1.bf16.msra.mxu0 %v11211_v15  ;;  %7550 = vmatprep.subr.bf16.mxu1 %v11216_v60  ;;  %v11225_v15 = vld [vmem:[%s16779_s3 + $0xc] ss:$40 sps:$4 sm:$0xff]  }
 0x16d   : > { %7513 = vmatprep.subr.bf16.mxu0 %v11219_v2 }
 0x16f   : > { %v1120_v18 = vpop.f32.mrb[16].mxu1  ;;  %v1208_v12 = vpop.f32.mrb[20].mxu0  ;;  %7551 = vmatpush1.bf16.msra.mxu1 %v11214_v34 }
 0x170   : > { %v1121_v37 = vadd.f32 %v1120_v18, %v13461_v0  ;;  %v1209_v57 = vadd.f32 %v1208_v12, %v13312_v28  ;;  %v1122_v21 = vpop.f32.mrb[17].mxu1  ;;  %v1210_v58 = vpop.f32.mrb[21].mxu0  ;;  %7514 = vmatpush1.bf16.msra.mxu0 %v11217_v6  ;;  %7552 = vmatprep.subr.bf16.mxu1 %v11222_v32 }
 0x171   : > { %v1123_v55 = vadd.f32 %v1122_v21, %v13467_v43  ;;  %v1211_v13 = vadd.f32 %v1210_v58, %v13316_v33  ;;  %v1124_v42 = vpop.f32.mrb[18].mxu1  ;;  %v1212_v44 = vpop.f32.mrb[22].mxu0  ;;  %7698 = vmatprep.subr.bf16.mxu0 %v11225_v15 }
 0x172   : > { %v1137_v5 = vmax.f32 %v1121_v37, 0.0  ;;  %v1389_v51 = vmax.f32 %v1209_v57, 0.0  ;;  %v1125_v46 = vadd.f32 %v1124_v42, %v13461_v0  ;;  %v1213_v9 = vadd.f32 %v1212_v44, %v13312_v28  ;;  %v1126_v36 = vpop.f32.mrb[19].mxu1  ;;  %v1214_v35 = vpop.f32.mrb[23].mxu0 }
 0x173   : > { %v1138_v11 = vmax.f32 %v1123_v55, 0.0  ;;  %v1390_v62 = vmax.f32 %v1211_v13, 0.0  ;;  %v1127_v10 = vadd.f32 %v1126_v36, %v13467_v43  ;;  %v1215_v29 = vadd.f32 %v1214_v35, %v13316_v33  ;;  %7553 = vmatpush1.bf16.msra.mxu1 %v11220_v61  ;;  %v11240_v61 = vld [vmem:[%s16779_s3 + $0xa04] ss:$40 sps:$4 sm:$0xff]  }
 0x174   : > { %v13670_v60 = vmax.f32 %v897_v56, %v1137_v5  ;;  %v13673_v18 = vmax.f32 %v13508_v20, %v1389_v51  ;;  %v1147_v12 = vmax.f32 %v1125_v46, 0.0  ;;  %v1399_v34 = vmax.f32 %v1213_v9, 0.0  ;;  %7554 = vmatprep.subr.bf16.mxu1 %v11228_v17 }
 0x175   : > { %v13677_v2 = vmax.f32 %v898_v59, %v1138_v11  ;;  %v13680_v37 = vmax.f32 %v13519_v26, %v1390_v62  ;;  %v1148_v57 = vmax.f32 %v1127_v10, 0.0  ;;  %v1400_v21 = vmax.f32 %v1215_v29, 0.0 }
 0x176   : > { %v13684_v14 = vmax.f32 %v907_v25, %v1147_v12  ;;  %v13687_v20 = vmax.f32 %v13535_v53, %v1399_v34  ;;  %v11234_v53 = vld [vmem:[%s16779_s3 + $0x9b4] ss:$40 sps:$4 sm:$0xff]  }
 0x177   : > { %v13694_v56 = vmax.f32 %v908_v30, %v1148_v57  ;;  %v13697_v26 = vmax.f32 %v13546_v47, %v1400_v21  ;;  %7555 = vmatpush1.bf16.msra.mxu1 %v11226_v63 }
 0x178   : > { %7556 = vmatprep.subr.bf16.mxu1 %v11234_v53 }
 0x17b   : > { %v1251_v59 = vpop.f32.mrb[20].mxu1  ;;  %v1294_v25 = vpop.f32.mrb[24].mxu0  ;;  %7557 = vmatpush1.bf16.msra.mxu1 %v11232_v4 }
 0x17c   : > { %v1252_v30 = vadd.f32 %v1251_v59, %v13325_v40  ;;  %v1295_v47 = vadd.f32 %v1294_v25, %v13121_v19  ;;  %v1253_v58 = vpop.f32.mrb[21].mxu1  ;;  %v1296_v6 = vpop.f32.mrb[25].mxu0  ;;  %7569 = vmatprep.subr.bf16.mxu1 %v11240_v61 }
 0x17d   : > { %v1254_v55 = vadd.f32 %v1253_v58, %v13336_v50  ;;  %v1297_v13 = vadd.f32 %v1296_v6, %v13352_v54  ;;  %v1255_v42 = vpop.f32.mrb[22].mxu1  ;;  %v1298_v44 = vpop.f32.mrb[26].mxu0 }
 0x17e   : > { %v1391_v32 = vmax.f32 %v1252_v30, 0.0  ;;  %v1393_v5 = vmax.f32 %v1295_v47, 0.0  ;;  %v1256_v51 = vadd.f32 %v1255_v42, %v13325_v40  ;;  %v1299_v46 = vadd.f32 %v1298_v44, %v13121_v19  ;;  %v1257_v9 = vpop.f32.mrb[23].mxu1  ;;  %v1300_v36 = vpop.f32.mrb[27].mxu0 }
 0x17f   : > { %v1392_v35 = vmax.f32 %v1254_v55, 0.0  ;;  %v1394_v11 = vmax.f32 %v1297_v13, 0.0  ;;  %v1258_v62 = vadd.f32 %v1257_v9, %v13336_v50  ;;  %v1301_v10 = vadd.f32 %v1300_v36, %v13352_v54 }
 0x180   : > { %v13720_v29 = vmax.f32 %v13512_v1, %v1391_v32  ;;  %v13723_v15 = vmax.f32 %v13598_v45, %v1393_v5  ;;  %v1401_v12 = vmax.f32 %v1256_v51, 0.0  ;;  %v1403_v34 = vmax.f32 %v1299_v46, 0.0 }
 0x181   : > { %v13726_v57 = vmax.f32 %v13523_v52, %v1392_v35  ;;  %v13729_v21 = vmax.f32 %v13609_v31, %v1394_v11  ;;  %v1402_v17 = vmax.f32 %v1258_v62, 0.0  ;;  %v1404_v63 = vmax.f32 %v1301_v10, 0.0 }
 0x182   : > { %v13732_v53 = vmax.f32 %v13539_v8, %v1401_v12  ;;  %v13735_v59 = vmax.f32 %v13617_v22, %v1403_v34 }
 0x183   : > { %v13738_v1 = vmax.f32 %v13550_v48, %v1402_v17  ;;  %v13741_v45 = vmax.f32 %v13626_v38, %v1404_v63 }
 0x187   : > { %v1337_v25 = vpop.f32.mrb[24].mxu1  ;;  %v1380_v52 = vpop.f32.mrb[28].mxu0 }
 0x188   : > { %v1338_v4 = vadd.f32 %v1337_v25, %v13135_v23  ;;  %v1381_v31 = vadd.f32 %v1380_v52, %v13461_v0  ;;  %v1339_v30 = vpop.f32.mrb[25].mxu1  ;;  %v1382_v47 = vpop.f32.mrb[29].mxu0 }
 0x189   : > { %v1340_v8 = vadd.f32 %v1339_v30, %v13145_v27  ;;  %v1383_v58 = vadd.f32 %v1382_v47, %v13467_v43  ;;  %v1341_v22 = vpop.f32.mrb[26].mxu1  ;;  %v1384_v6 = vpop.f32.mrb[30].mxu0 }
 0x18a   : > { %v1395_v55 = vmax.f32 %v1338_v4, 0.0  ;;  %v1397_v48 = vmax.f32 %v1381_v31, 0.0  ;;  %v1342_v13 = vadd.f32 %v1341_v22, %v13135_v23  ;;  %v1385_v38 = vadd.f32 %v1384_v6, %v13461_v0  ;;  %v1343_v42 = vpop.f32.mrb[27].mxu1  ;;  %v1386_v44 = vpop.f32.mrb[31].mxu0 }
 0x18b   : > { %v1396_v61 = vmax.f32 %v1340_v8, 0.0  ;;  %v1398_v32 = vmax.f32 %v1383_v58, 0.0  ;;  %v1344_v5 = vadd.f32 %v1343_v42, %v13145_v27  ;;  %v1387_v51 = vadd.f32 %v1386_v44, %v13467_v43 }
 0x18c   : > { %v13752_v46 = vmax.f32 %v13602_v3, %v1395_v55  ;;  %v13755_v9 = vmax.f32 %v13670_v60, %v1397_v48  ;;  %v1405_v36 = vmax.f32 %v1342_v13, 0.0  ;;  %v1407_v35 = vmax.f32 %v1385_v38, 0.0 }
 0x18d   : > { %v13758_v11 = vmax.f32 %v13613_v24, %v1396_v61  ;;  %v13761_v62 = vmax.f32 %v13677_v2, %v1398_v32  ;;  %v1406_v10 = vmax.f32 %v1344_v5, 0.0  ;;  %v1408_v12 = vmax.f32 %v1387_v51, 0.0 }
 0x18e   : > { %v13764_v34 = vmax.f32 %v13619_v16, %v1405_v36  ;;  %v13767_v17 = vmax.f32 %v13684_v14, %v1407_v35 }
 0x18f   : > { %v13770_v3 = vmax.f32 %v13628_v49, %v1406_v10  ;;  %v13773_v60 = vmax.f32 %v13694_v56, %v1408_v12 }
 0x193   : > { %v1468_v63 = vpop.f32.mrb[28].mxu1  ;;  %v1511_v24 = vpop.f32.mrb[32].mxu0 }
 0x194   : > { %v1469_v25 = vadd.f32 %v1468_v63, %v13312_v28  ;;  %v1512_v2 = vadd.f32 %v1511_v24, %v13325_v40  ;;  %v1470_v52 = vpop.f32.mrb[29].mxu1  ;;  %v1513_v4 = vpop.f32.mrb[33].mxu0 }
 0x195   : > { %v1471_v16 = vadd.f32 %v1470_v52, %v13316_v33  ;;  %v1514_v31 = vadd.f32 %v1513_v4, %v13336_v50  ;;  %v1472_v14 = vpop.f32.mrb[30].mxu1  ;;  %v1515_v30 = vpop.f32.mrb[34].mxu0 }
 0x196   : > { %v1649_v47 = vmax.f32 %v1469_v25, 0.0  ;;  %v1651_v49 = vmax.f32 %v1512_v2, 0.0  ;;  %v1473_v8 = vadd.f32 %v1472_v14, %v13312_v28  ;;  %v1516_v56 = vadd.f32 %v1515_v30, %v13325_v40  ;;  %v1474_v58 = vpop.f32.mrb[31].mxu1  ;;  %v1517_v22 = vpop.f32.mrb[35].mxu0 }
 0x197   : > { %v1650_v6 = vmax.f32 %v1471_v16, 0.0  ;;  %v1652_v55 = vmax.f32 %v1514_v31, 0.0  ;;  %v1475_v48 = vadd.f32 %v1474_v58, %v13316_v33  ;;  %v1518_v13 = vadd.f32 %v1517_v22, %v13336_v50 }
 0x198   : > { %v13784_v38 = vmax.f32 %v13673_v18, %v1649_v47  ;;  %v13787_v42 = vmax.f32 %v13720_v29, %v1651_v49  ;;  %v1659_v44 = vmax.f32 %v1473_v8, 0.0  ;;  %v1661_v61 = vmax.f32 %v1516_v56, 0.0 }
 0x199   : > { %v13790_v32 = vmax.f32 %v13680_v37, %v1650_v6  ;;  %v13793_v5 = vmax.f32 %v13726_v57, %v1652_v55  ;;  %v1660_v51 = vmax.f32 %v1475_v48, 0.0  ;;  %v1662_v36 = vmax.f32 %v1518_v13, 0.0 }
 0x19a   : > { %v13796_v35 = vmax.f32 %v13687_v20, %v1659_v44  ;;  %v13799_v10 = vmax.f32 %v13732_v53, %v1661_v61 }
 0x19b   : > { %v13802_v18 = vmax.f32 %v13697_v26, %v1660_v51  ;;  %v13805_v29 = vmax.f32 %v13738_v1, %v1662_v36 }
 0x19f   : > { %v1554_v12 = vpop.f32.mrb[32].mxu1  ;;  %v1597_v37 = vpop.f32.mrb[36].mxu0 }
 0x1a0   : > { %v1555_v63 = vadd.f32 %v1554_v12, %v13121_v19  ;;  %v1598_v57 = vadd.f32 %v1597_v37, %v13135_v23  ;;  %v1556_v24 = vpop.f32.mrb[33].mxu1  ;;  %v1599_v25 = vpop.f32.mrb[37].mxu0 }
 0x1a1   : > { %v1557_v20 = vadd.f32 %v1556_v24, %v13352_v54  ;;  %v1600_v2 = vadd.f32 %v1599_v25, %v13145_v27  ;;  %v1558_v53 = vpop.f32.mrb[34].mxu1  ;;  %v1601_v52 = vpop.f32.mrb[38].mxu0 }
 0x1a2   : > { %v1653_v4 = vmax.f32 %v1555_v63, 0.0  ;;  %v1655_v26 = vmax.f32 %v1598_v57, 0.0  ;;  %v1559_v16 = vadd.f32 %v1558_v53, %v13121_v19  ;;  %v1602_v1 = vadd.f32 %v1601_v52, %v13135_v23  ;;  %v1560_v31 = vpop.f32.mrb[35].mxu1  ;;  %v1603_v14 = vpop.f32.mrb[39].mxu0 }
 0x1a3   : > { %v1654_v30 = vmax.f32 %v1557_v20, 0.0  ;;  %v1656_v47 = vmax.f32 %v1600_v2, 0.0  ;;  %v1561_v49 = vadd.f32 %v1560_v31, %v13352_v54  ;;  %v1604_v8 = vadd.f32 %v1603_v14, %v13145_v27 }
 0x1a4   : > { %v13816_v56 = vmax.f32 %v13723_v15, %v1653_v4  ;;  %v13819_v58 = vmax.f32 %v13752_v46, %v1655_v26  ;;  %v1663_v22 = vmax.f32 %v1559_v16, 0.0  ;;  %v1665_v6 = vmax.f32 %v1602_v1, 0.0 }
 0x1a5   : > { %v13822_v55 = vmax.f32 %v13729_v21, %v1654_v30  ;;  %v13825_v48 = vmax.f32 %v13758_v11, %v1656_v47  ;;  %v1664_v13 = vmax.f32 %v1561_v49, 0.0  ;;  %v1666_v44 = vmax.f32 %v1604_v8, 0.0 }
 0x1a6   : > { %v13828_v61 = vmax.f32 %v13735_v59, %v1663_v22  ;;  %v13831_v51 = vmax.f32 %v13764_v34, %v1665_v6 }
 0x1a7   : > { %v13834_v15 = vmax.f32 %v13741_v45, %v1664_v13  ;;  %v13837_v46 = vmax.f32 %v13770_v3, %v1666_v44  ;;  %v16798_v13 = vlaneseq }
 0x1a9   : > { %v13872_v44 = vand.u32 127, %v16798_v13 }
 0x1ab   : > { %v1640_v36 = vpop.f32.mrb[36].mxu1  ;;  %v1728_v21 = vpop.f32.mrb[40].mxu0 }
 0x1ac   : > { %v1641_v12 = vadd.f32 %v1640_v36, %v13461_v0  ;;  %v1729_v11 = vadd.f32 %v1728_v21, %v13312_v28  ;;  %v1642_v37 = vpop.f32.mrb[37].mxu1  ;;  %v1730_v63 = vpop.f32.mrb[41].mxu0 }
 0x1ad   : > { %v1643_v59 = vadd.f32 %v1642_v37, %v13467_v43  ;;  %v1731_v57 = vadd.f32 %v1730_v63, %v13316_v33  ;;  %v1644_v34 = vpop.f32.mrb[38].mxu1  ;;  %v1732_v24 = vpop.f32.mrb[42].mxu0 }
 0x1ae   : > { %v1657_v25 = vmax.f32 %v1641_v12, 0.0  ;;  %v1909_v45 = vmax.f32 %v1729_v11, 0.0  ;;  %v1645_v20 = vadd.f32 %v1644_v34, %v13461_v0  ;;  %v1733_v3 = vadd.f32 %v1732_v24, %v13312_v28  ;;  %v1646_v2 = vpop.f32.mrb[39].mxu1  ;;  %v1734_v53 = vpop.f32.mrb[43].mxu0 }
 0x1af   : > { %v1658_v52 = vmax.f32 %v1643_v59, 0.0  ;;  %v1910_v4 = vmax.f32 %v1731_v57, 0.0  ;;  %v1647_v26 = vadd.f32 %v1646_v2, %v13467_v43  ;;  %v1735_v16 = vadd.f32 %v1734_v53, %v13316_v33 }
 0x1b0   : > { %v13848_v1 = vmax.f32 %v13755_v9, %v1657_v25  ;;  %v13851_v31 = vmax.f32 %v13784_v38, %v1909_v45  ;;  %v1667_v14 = vmax.f32 %v1645_v20, 0.0  ;;  %v1919_v30 = vmax.f32 %v1733_v3, 0.0 }
 0x1b1   : > { %v13854_v0 = vmax.f32 %v13761_v62, %v1658_v52  ;;  %v13857_v47 = vmax.f32 %v13790_v32, %v1910_v4  ;;  %v1668_v49 = vmax.f32 %v1647_v26, 0.0  ;;  %v1920_v8 = vmax.f32 %v1735_v16, 0.0 }
 0x1b2   : > { %v13860_v43 = vmax.f32 %v13767_v17, %v1667_v14  ;;  %v13863_v22 = vmax.f32 %v13796_v35, %v1919_v30  ;;  %v374_v45 = vadd.s32 896, %v13872_v44 }
 0x1b3   : > { %v13866_v9 = vmax.f32 %v13773_v60, %v1668_v49  ;;  %v13869_v38 = vmax.f32 %v13802_v18, %v1920_v8 }
 0x1b4   : > { %vm424_vm2 = vcmp.ge.s32.totalorder %v374_v45, 900 }
 0x1b7   : > { %v1771_v6 = vpop.f32.mrb[40].mxu1  ;;  %v1814_v62 = vpop.f32.mrb[44].mxu0 }
 0x1b8   : > { %v1772_v32 = vadd.f32 %v1771_v6, %v13325_v40  ;;  %v1815_v36 = vadd.f32 %v1814_v62, %v13121_v19  ;;  %v1773_v17 = vpop.f32.mrb[41].mxu1  ;;  %v1816_v21 = vpop.f32.mrb[45].mxu0 }
 0x1b9   : > { %v1774_v35 = vadd.f32 %v1773_v17, %v13336_v50  ;;  %v1817_v12 = vadd.f32 %v1816_v21, %v13352_v54  ;;  %v1775_v60 = vpop.f32.mrb[42].mxu1  ;;  %v1818_v11 = vpop.f32.mrb[46].mxu0 }
 0x1ba   : > { %v1911_v37 = vmax.f32 %v1772_v32, 0.0  ;;  %v1913_v18 = vmax.f32 %v1815_v36, 0.0  ;;  %v1776_v63 = vadd.f32 %v1775_v60, %v13325_v40  ;;  %v1777_v59 = vpop.f32.mrb[43].mxu1  ;;  %v1820_v57 = vpop.f32.mrb[47].mxu0  ;;  %v1819_v25 = vadd.f32 %v1818_v11, %v13121_v19 }
 0x1bb   : > { %v1912_v34 = vmax.f32 %v1774_v35, 0.0  ;;  %v1914_v24 = vmax.f32 %v1817_v12, 0.0  ;;  %v1778_v53 = vadd.f32 %v1777_v59, %v13336_v50  ;;  %v1821_v16 = vadd.f32 %v1820_v57, %v13352_v54 }
 0x1bc   : > { %v1981_v20 = vmax.f32 %v13787_v42, %v1911_v37  ;;  %v13883_v3 = vmax.f32 %v13816_v56, %v1913_v18  ;;  %v1921_v2 = vmax.f32 %v1776_v63, 0.0  ;;  %v1923_v26 = vmax.f32 %v1819_v25, 0.0 }
 0x1bd   : > { %v1982_v52 = vmax.f32 %v13793_v5, %v1912_v34  ;;  %v13888_v4 = vmax.f32 %v13822_v55, %v1914_v24  ;;  %v1922_v30 = vmax.f32 %v1778_v53, 0.0  ;;  %v1924_v42 = vmax.f32 %v1821_v16, 0.0 }
 0x1be   : > { %v1991_v14 = vmax.f32 %v13799_v10, %v1921_v2  ;;  %v13893_v49 = vmax.f32 %v13828_v61, %v1923_v26  ;;  %v12555_v55 = vmov 4  }
 0x1bf   : > { %v1992_v56 = vmax.f32 %v13805_v29, %v1922_v30  ;;  %v13897_v8 = vmax.f32 %v13834_v15, %v1924_v42  ;;  %v434_v62 = vsel %vm424_vm2, 3, %v12555_v55  ;;  %v371_v55 = vadd.s32 512, %v13872_v44 }
 0x1c0   : > { %vm1936_vm3 = vcmp.ge.s32.totalorder %v434_v62, 4 }
 0x1c1   : > { %vm401_vm4 = vcmp.ge.s32.totalorder %v371_v55, 600 }
 0x1c3   : > { %v1857_v5 = vpop.f32.mrb[44].mxu1  ;;  %v1900_v6 = vpop.f32.mrb[48].mxu0 }
 0x1c4   : > { %v1858_v13 = vadd.f32 %v1857_v5, %v13135_v23  ;;  %v1859_v54 = vpop.f32.mrb[45].mxu1  ;;  %v1902_v32 = vpop.f32.mrb[49].mxu0 }
 0x1c5   : > { %v1860_v10 = vadd.f32 %v1859_v54, %v13145_v27  ;;  %v1861_v36 = vpop.f32.mrb[46].mxu1  ;;  %v1904_v61 = vpop.f32.mrb[50].mxu0 }
 0x1c6   : > { %v1915_v17 = vmax.f32 %v1858_v13, 0.0  ;;  %v1862_v29 = vadd.f32 %v1861_v36, %v13135_v23  ;;  %v1863_v21 = vpop.f32.mrb[47].mxu1  ;;  %v1906_v35 = vpop.f32.mrb[51].mxu0 }
 0x1c7   : > { %v1916_v15 = vmax.f32 %v1860_v10, 0.0  ;;  %v1864_v12 = vadd.f32 %v1863_v21, %v13145_v27 }
 0x1c8   : > { %v13904_v60 = vmax.f32 %v13819_v58, %v1915_v17  ;;  %v1925_v11 = vmax.f32 %v1862_v29, 0.0 }
 0x1c9   : > { %v13906_v37 = vsel %vm1936_vm3, %v1916_v15, 0.0  ;;  %v1926_v18 = vmax.f32 %v1864_v12, 0.0 }
 0x1ca   : > { %v1986_v63 = vmax.f32 %v13825_v48, %v13906_v37  ;;  %v13911_v59 = vmax.f32 %v13831_v51, %v1925_v11  ;;  %v11336_v48 = vld [vmem:[%s16779_s3 + $0xf04] ss:$40 sps:$4 sm:$0xff]  }
 0x1cb   : > { %v13913_v57 = vsel %vm1936_vm3, %v1926_v18, 0.0 }
 0x1cc   : > { %v1996_v23 = vmax.f32 %v13837_v46, %v13913_v57  ;;  %v11331_v57 = vld [vmem:[%s16779_s3 + $0x5a8] ss:$40 sps:$4 sm:$0xff]  }
 0x1cf   : > { %v2038_v34 = vpop.f32.mrb[48].mxu1  ;;  %v2081_v27 = vpop.f32.mrb[52].mxu0 }
 0x1d0   : > { %v2039_v58 = vadd.f32 %v2038_v34, %v13312_v28  ;;  %v2082_v24 = vadd.f32 %v2081_v27, %v13325_v40  ;;  %v2040_v25 = vpop.f32.mrb[49].mxu1  ;;  %v2083_v45 = vpop.f32.mrb[53].mxu0  ;;  %v12556_v27 = vmov 5  }
 0x1d1   : > { %v2041_v2 = vadd.f32 %v2040_v25, %v13316_v33  ;;  %v2084_v53 = vadd.f32 %v2083_v45, %v13336_v50  ;;  %v2042_v26 = vpop.f32.mrb[50].mxu1  ;;  %v2085_v51 = vpop.f32.mrb[54].mxu0 }
 0x1d2   : > { %v2219_v16 = vmax.f32 %v2039_v58, 0.0  ;;  %v2221_v30 = vmax.f32 %v2082_v24, 0.0  ;;  %v2043_v42 = vadd.f32 %v2042_v26, %v13312_v28  ;;  %v2044_v5 = vpop.f32.mrb[51].mxu1  ;;  %v2087_v6 = vpop.f32.mrb[55].mxu0  ;;  %v2086_v54 = vadd.f32 %v2085_v51, %v13325_v40 }
 0x1d3   : > { %v2220_v62 = vmax.f32 %v2041_v2, 0.0  ;;  %v2222_v13 = vmax.f32 %v2084_v53, 0.0  ;;  %v2045_v32 = vadd.f32 %v2044_v5, %v13316_v33  ;;  %v2088_v17 = vadd.f32 %v2087_v6, %v13336_v50 }
 0x1d4   : > { %v2289_v10 = vmax.f32 %v13851_v31, %v2219_v16  ;;  %v13926_v36 = vmax.f32 %v1981_v20, %v2221_v30  ;;  %v2229_v61 = vmax.f32 %v2043_v42, 0.0  ;;  %v2231_v35 = vmax.f32 %v2086_v54, 0.0 }
 0x1d5   : > { %v2290_v29 = vmax.f32 %v13857_v47, %v2220_v62  ;;  %v13930_v21 = vmax.f32 %v1982_v52, %v2222_v13  ;;  %v2230_v15 = vmax.f32 %v2045_v32, 0.0  ;;  %v2232_v11 = vmax.f32 %v2088_v17, 0.0 }
 0x1d6   : > { %v2299_v12 = vmax.f32 %v13863_v22, %v2229_v61  ;;  %v13933_v18 = vmax.f32 %v1991_v14, %v2231_v35  ;;  %v411_v47 = vsel %vm401_vm4, 4, %v12556_v27 }
 0x1d7   : > { %v2300_v34 = vmax.f32 %v13869_v38, %v2230_v15  ;;  %v13936_v31 = vmax.f32 %v1992_v56, %v2232_v11  ;;  %v2602_v20 = vmax.f32 %v13930_v21, 0.0  ;;  %vm2243_vm5 = vcmp.ge.s32.totalorder %v411_v47, 5  ;;  %v12080_v21 = vld [vmem:[%s16779_s3 + $0x3e4] ss:$40 sps:$4 sm:$0xff]  }
 0x1d9   : > { %v2612_v50 = vmax.f32 %v13936_v31, 0.0 }
 0x1db   : > { %v2124_v52 = vpop.f32.mrb[52].mxu1  ;;  %v2167_v58 = vpop.f32.mrb[56].mxu0  ;;  %v13944_v22 = vpack.c.bf16 %v2612_v50, %v2602_v20 }
 0x1dc   : > { %v2125_v14 = vadd.f32 %v2124_v52, %v13121_v19  ;;  %v2126_v38 = vpop.f32.mrb[53].mxu1  ;;  %v2169_v24 = vpop.f32.mrb[57].mxu0  ;;  %v369_v52 = vadd.s32 256, %v13872_v44 }
 0x1dd   : > { %v2128_v56 = vpop.f32.mrb[54].mxu1  ;;  %v2171_v25 = vpop.f32.mrb[58].mxu0  ;;  %7558 = vmatprep.mubr.bf16.mxu1 %v13944_v22 }
 0x1de   : > { %v2223_v45 = vmax.f32 %v2125_v14, 0.0  ;;  %v2129_v2 = vadd.f32 %v2128_v56, %v13121_v19  ;;  %v2130_v53 = vpop.f32.mrb[55].mxu1  ;;  %v2173_v26 = vpop.f32.mrb[59].mxu0  ;;  %vm379_vm6 = vcmp.ge.s32.totalorder %v369_v52, 300 }
 0x1e0   : > { %v13949_v51 = vsel %vm2243_vm5, %v2223_v45, 0.0  ;;  %v2233_v16 = vmax.f32 %v2129_v2, 0.0 }
 0x1e1   : > { %v2293_v30 = vmax.f32 %v13883_v3, %v13949_v51  ;;  %v11342_v3 = vld [vmem:[%s16779_s3 + $0xf54] ss:$40 sps:$4 sm:$0xff]  }
 0x1e2   : > { %v13953_v42 = vsel %vm2243_vm5, %v2233_v16, 0.0 }
 0x1e3   : > { %v2303_v5 = vmax.f32 %v13893_v49, %v13953_v42  ;;  %v14238_v49 = vmax.f32 %v2293_v30, 0.0  ;;  %v11334_v42 = vld [vmem:[%s16779_s3 + $0xf00] ss:$40 sps:$4 sm:$0xff]   ;;  %v11345_v30 = vld [vmem:[%s16779_s3 + $0x64c] ss:$40 sps:$4 sm:$0xff]  }
 0x1e5   : > { %v14223_v46 = vmax.f32 %v2303_v5, 0.0 }
 0x1e7   : > { %v2210_v6 = vpop.f32.mrb[56].mxu1  ;;  %v2348_v55 = vpop.f32.mrb[60].mxu0  ;;  %v14246_v5 = vpack.c.bf16 %v14223_v46, %v14238_v49 }
 0x1e8   : > { %v2349_v62 = vadd.f32 %v2348_v55, %v13312_v28  ;;  %v2212_v19 = vpop.f32.mrb[57].mxu1  ;;  %v2350_v13 = vpop.f32.mrb[61].mxu0  ;;  %v11229_v55 = vld [vmem:[%s16779_s3 + $0x58] ss:$40 sps:$4 sm:$0xff]  }
 0x1e9   : > { %v2351_v54 = vadd.f32 %v2350_v13, %v13316_v33  ;;  %v2214_v32 = vpop.f32.mrb[58].mxu1  ;;  %v2352_v61 = vpop.f32.mrb[62].mxu0 }
 0x1ea   : > { %v2529_v17 = vmax.f32 %v2349_v62, 0.0  ;;  %v2353_v35 = vadd.f32 %v2352_v61, %v13312_v28  ;;  %v2216_v15 = vpop.f32.mrb[59].mxu1  ;;  %v2354_v11 = vpop.f32.mrb[63].mxu0  ;;  %v2304_v62 = vmax.f32 %v13897_v8, 0.0  ;;  %v11237_v61 = vld [vmem:[%s16779_s3 + $0xac] ss:$40 sps:$4 sm:$0xff]  }
 0x1eb   : > { %v2530_v27 = vmax.f32 %v2351_v54, 0.0  ;;  %v2355_v47 = vadd.f32 %v2354_v11, %v13316_v33  ;;  %v11223_v33 = vld [vmem:[%s16779_s3 + $0x8] ss:$40 sps:$4 sm:$0xff]  }
 0x1ec   : > { %v13962_v58 = vmax.f32 %v2289_v10, %v2529_v17  ;;  %v2539_v14 = vmax.f32 %v2353_v35, 0.0  ;;  %v12557_v10 = vmov 6   ;;  %v2294_v17 = vmax.f32 %v13888_v4, 0.0  ;;  %v11243_v4 = vld [vmem:[%s16779_s3 + $0xfc] ss:$40 sps:$4 sm:$0xff]  }
 0x1ed   : > { %v13964_v38 = vmax.f32 %v2290_v29, %v2530_v27  ;;  %v2540_v24 = vmax.f32 %v2355_v47, 0.0  ;;  %v389_v29 = vsel %vm379_vm6, 5, %v12557_v10  ;;  %v14004_v8 = vmax.f32 %v2304_v62, 0.0  ;;  %v11249_v10 = vld [vmem:[%s16779_s3 + $0x14c] ss:$40 sps:$4 sm:$0xff]  }
 0x1ee   : > { %v13966_v56 = vmax.f32 %v2299_v12, %v2539_v14  ;;  %v11231_v12 = vld [vmem:[%s16779_s3 + $0x5c] ss:$40 sps:$4 sm:$0xff]   ;;  %vm2551_vm7 = vcmp.ge.s32.totalorder %v389_v29, 6  ;;  %v14013_v52 = vmax.f32 %v2294_v17, 0.0  ;;  %v11256_v17 = vld [vmem:[%s16779_s3 + $0xaf0] ss:$40 sps:$4 sm:$0xff]  }
 0x1ef   : > { %v13968_v25 = vmax.f32 %v2300_v34, %v2540_v24  ;;  %v11241_v24 = vld [vmem:[%s16779_s3 + $0xf8] ss:$40 sps:$4 sm:$0xff]  }
 0x1f0   : > { %v13979_v44 = vpack.c.bf16 %v13966_v56, %v13962_v58 }
 0x1f1   : > { %v13972_v28 = vpack.c.bf16 %v13968_v25, %v13964_v38 }
 0x1f3   : > { %v2391_v34 = vpop.f32.mrb[60].mxu1  ;;  %v2434_v45 = vpop.f32.mrb[64].mxu0  ;;  %7515 = vmatprep.mubr.bf16.mxu0 %v13972_v28 }
 0x1f4   : > { %v2392_v2 = vadd.f32 %v2391_v34, %v13325_v40  ;;  %v2393_v53 = vpop.f32.mrb[61].mxu1  ;;  %v2436_v26 = vpop.f32.mrb[65].mxu0  ;;  %7516 = vmatmul.mubr.bf16.vlgmr.msra.gmra.mrb[72].mxu0 %v13979_v44 }
 0x1f5   : > { %7699 = vmatpush1.bf16.msra.mxu0 %v11223_v33  ;;  %v2395_v16 = vpop.f32.mrb[62].mxu1  ;;  %v2438_v6 = vpop.f32.mrb[66].mxu0  ;;  %7730 = vmatprep.mubr.bf16.mxu0 %v13972_v28  ;;  %v14030_v33 = vpack.c.bf16 %v14004_v8, %v14013_v52 }
 0x1f6   : > { %v2531_v19 = vmax.f32 %v2392_v2, 0.0  ;;  %v2396_v13 = vadd.f32 %v2395_v16, %v13325_v40  ;;  %v2397_v54 = vpop.f32.mrb[63].mxu1  ;;  %v2440_v32 = vpop.f32.mrb[67].mxu0  ;;  %7700 = vmatprep.subr.bf16.mxu0 %v11231_v12  ;;  %v11235_v40 = vld [vmem:[%s16779_s3 + $0xa8] ss:$40 sps:$4 sm:$0xff]  }
 0x1f7   : > { %v11244_v2 = vld [vmem:[%s16779_s3 + $0xa50] ss:$40 sps:$4 sm:$0xff]   ;;  %v11252_v6 = vld [vmem:[%s16779_s3 + $0xaa4] ss:$40 sps:$4 sm:$0xff]   ;;  %v11258_v32 = vld [vmem:[%s16779_s3 + $0xaf4] ss:$40 sps:$4 sm:$0xff]  }
 0x1f8   : > { %v2581_v35 = vsel %vm2551_vm7, %v2531_v19, 0.0  ;;  %v2541_v15 = vmax.f32 %v2396_v13, 0.0  ;;  %v11247_v16 = vld [vmem:[%s16779_s3 + $0x148] ss:$40 sps:$4 sm:$0xff]   ;;  %v11255_v19 = vld [vmem:[%s16779_s3 + $0x19c] ss:$40 sps:$4 sm:$0xff]  }
 0x1f9   : > { %v13999_v11 = vmax.f32 %v13926_v36, %v2581_v35  ;;  %7701 = vmatpush1.bf16.msra.mxu0 %v11229_v55  ;;  %v11238_v36 = vld [vmem:[%s16779_s3 + $0xa00] ss:$40 sps:$4 sm:$0xff]  }
 0x1fa   : > { %v2591_v27 = vsel %vm2551_vm7, %v2541_v15, 0.0  ;;  %7702 = vmatprep.subr.bf16.mxu0 %v11237_v61  ;;  %v11250_v13 = vld [vmem:[%s16779_s3 + $0xaa0] ss:$40 sps:$4 sm:$0xff]   ;;  %v11261_v61 = vld [vmem:[%s16779_s3 + $0x1ec] ss:$40 sps:$4 sm:$0xff]  }
 0x1fb   : > { %v14011_v47 = vmax.f32 %v13933_v18, %v2591_v27  ;;  %v11246_v18 = vld [vmem:[%s16779_s3 + $0xa54] ss:$40 sps:$4 sm:$0xff]   ;;  %v11253_v54 = vld [vmem:[%s16779_s3 + $0x198] ss:$40 sps:$4 sm:$0xff]   ;;  %v11259_v35 = vld [vmem:[%s16779_s3 + $0x1e8] ss:$40 sps:$4 sm:$0xff]  }
 0x1fc   : > { %v11264_v15 = vld [vmem:[%s16779_s3 + $0xb44] ss:$40 sps:$4 sm:$0xff]   ;;  %v11262_v27 = vld [vmem:[%s16779_s3 + $0xb40] ss:$40 sps:$4 sm:$0xff]  }
 0x1fd   : > { %v14020_v14 = vpack.c.bf16 %v14011_v47, %v13999_v11  ;;  %7703 = vmatpush1.bf16.msra.mxu0 %v11235_v40  ;;  %v11267_v40 = vld [vmem:[%s16779_s3 + $0x23c] ss:$40 sps:$4 sm:$0xff]  }
 0x1fe   : > { %7704 = vmatprep.subr.bf16.mxu0 %v11243_v4  ;;  %v11265_v4 = vld [vmem:[%s16779_s3 + $0x238] ss:$40 sps:$4 sm:$0xff]  }
 0x1ff   : > { %v2477_v29 = vpop.f32.mrb[64].mxu1  ;;  %v2520_v12 = vpop.f32.mrb[68].mxu0  ;;  %7559 = vmatmul.mubr.bf16.vlgmr.msra.gmra.mrb[68].mxu1 %v14020_v14 }
 0x200   : > { %7570 = vmatpush1.bf16.msra.mxu1 %v11238_v36  ;;  %v2479_v34 = vpop.f32.mrb[65].mxu1  ;;  %v2522_v45 = vpop.f32.mrb[69].mxu0  ;;  %7601 = vmatprep.mubr.bf16.mxu1 %v14030_v33  ;;  %v11270_v36 = vld [vmem:[%s16779_s3 + $0xb94] ss:$40 sps:$4 sm:$0xff]   ;;  %v11276_v29 = vld [vmem:[%s16779_s3 + $0xbe4] ss:$40 sps:$4 sm:$0xff]  }
 0x201   : > { %7705 = vmatpush1.bf16.msra.mxu0 %v11241_v24  ;;  %v2481_v53 = vpop.f32.mrb[66].mxu1  ;;  %v2524_v26 = vpop.f32.mrb[70].mxu0  ;;  %7571 = vmatprep.subr.bf16.mxu1 %v11246_v18  ;;  %v11273_v24 = vld [vmem:[%s16779_s3 + $0x28c] ss:$40 sps:$4 sm:$0xff]   ;;  %v11268_v18 = vld [vmem:[%s16779_s3 + $0xb90] ss:$40 sps:$4 sm:$0xff]  }
 0x202   : > { %v2483_v55 = vpop.f32.mrb[67].mxu1  ;;  %v2526_v62 = vpop.f32.mrb[71].mxu0  ;;  %7706 = vmatprep.subr.bf16.mxu0 %v11249_v10  ;;  %v11271_v10 = vld [vmem:[%s16779_s3 + $0x288] ss:$40 sps:$4 sm:$0xff]   ;;  %v11279_v12 = vld [vmem:[%s16779_s3 + $0x2dc] ss:$40 sps:$4 sm:$0xff]  }
 0x203   : > { %v11274_v34 = vld [vmem:[%s16779_s3 + $0xbe0] ss:$40 sps:$4 sm:$0xff]   ;;  %v11285_v53 = vld [vmem:[%s16779_s3 + $0x32c] ss:$40 sps:$4 sm:$0xff]   ;;  %v11280_v26 = vld [vmem:[%s16779_s3 + $0xc30] ss:$40 sps:$4 sm:$0xff]  }
 0x204   : > { %7572 = vmatpush1.bf16.msra.mxu1 %v11244_v2  ;;  %v11277_v45 = vld [vmem:[%s16779_s3 + $0x2d8] ss:$40 sps:$4 sm:$0xff]   ;;  %v11282_v2 = vld [vmem:[%s16779_s3 + $0xc34] ss:$40 sps:$4 sm:$0xff]  }
 0x205   : > { %7707 = vmatpush1.bf16.msra.mxu0 %v11247_v16  ;;  %7573 = vmatprep.subr.bf16.mxu1 %v11252_v6  ;;  %v11283_v16 = vld [vmem:[%s16779_s3 + $0x328] ss:$40 sps:$4 sm:$0xff]   ;;  %v11288_v6 = vld [vmem:[%s16779_s3 + $0xc84] ss:$40 sps:$4 sm:$0xff]  }
 0x206   : > { %7708 = vmatprep.subr.bf16.mxu0 %v11255_v19  ;;  %v11291_v55 = vld [vmem:[%s16779_s3 + $0x37c] ss:$40 sps:$4 sm:$0xff]   ;;  %v11286_v62 = vld [vmem:[%s16779_s3 + $0xc80] ss:$40 sps:$4 sm:$0xff]  }
 0x207   : > { %v11289_v19 = vld [vmem:[%s16779_s3 + $0x378] ss:$40 sps:$4 sm:$0xff]  }
 0x208   : > { %7574 = vmatpush1.bf16.msra.mxu1 %v11250_v13  ;;  %v11294_v13 = vld [vmem:[%s16779_s3 + $0xcd4] ss:$40 sps:$4 sm:$0xff]  }
 0x209   : > { %7709 = vmatpush1.bf16.msra.mxu0 %v11253_v54  ;;  %7575 = vmatprep.subr.bf16.mxu1 %v11258_v32  ;;  %v11297_v54 = vld [vmem:[%s16779_s3 + $0x3cc] ss:$40 sps:$4 sm:$0xff]   ;;  %v11292_v32 = vld [vmem:[%s16779_s3 + $0xcd0] ss:$40 sps:$4 sm:$0xff]  }
 0x20a   : > { %7710 = vmatprep.subr.bf16.mxu0 %v11261_v61  ;;  %v11295_v61 = vld [vmem:[%s16779_s3 + $0x3c8] ss:$40 sps:$4 sm:$0xff]  }
 0x20c   : > { %7576 = vmatpush1.bf16.msra.mxu1 %v11256_v17  ;;  %v11300_v17 = vld [vmem:[%s16779_s3 + $0xd24] ss:$40 sps:$4 sm:$0xff]  }
 0x20d   : > { %7711 = vmatpush1.bf16.msra.mxu0 %v11259_v35  ;;  %7577 = vmatprep.subr.bf16.mxu1 %v11264_v15  ;;  %v11303_v35 = vld [vmem:[%s16779_s3 + $0x41c] ss:$40 sps:$4 sm:$0xff]   ;;  %v11298_v15 = vld [vmem:[%s16779_s3 + $0xd20] ss:$40 sps:$4 sm:$0xff]  }
 0x20e   : > { %7712 = vmatprep.subr.bf16.mxu0 %v11267_v40  ;;  %v11301_v40 = vld [vmem:[%s16779_s3 + $0x418] ss:$40 sps:$4 sm:$0xff]  }
 0x210   : > { %7578 = vmatpush1.bf16.msra.mxu1 %v11262_v27  ;;  %v11306_v27 = vld [vmem:[%s16779_s3 + $0xd74] ss:$40 sps:$4 sm:$0xff]  }
 0x211   : > { %7713 = vmatpush1.bf16.msra.mxu0 %v11265_v4  ;;  %7579 = vmatprep.subr.bf16.mxu1 %v11270_v36  ;;  %v11309_v4 = vld [vmem:[%s16779_s3 + $0x46c] ss:$40 sps:$4 sm:$0xff]   ;;  %v11304_v36 = vld [vmem:[%s16779_s3 + $0xd70] ss:$40 sps:$4 sm:$0xff]  }
 0x212   : > { %7714 = vmatprep.subr.bf16.mxu0 %v11273_v24  ;;  %v11307_v24 = vld [vmem:[%s16779_s3 + $0x468] ss:$40 sps:$4 sm:$0xff]  }
 0x214   : > { %7580 = vmatpush1.bf16.msra.mxu1 %v11268_v18  ;;  %v11312_v18 = vld [vmem:[%s16779_s3 + $0xdc4] ss:$40 sps:$4 sm:$0xff]  }
 0x215   : > { %7715 = vmatpush1.bf16.msra.mxu0 %v11271_v10  ;;  %7581 = vmatprep.subr.bf16.mxu1 %v11276_v29  ;;  %v11315_v10 = vld [vmem:[%s16779_s3 + $0x4bc] ss:$40 sps:$4 sm:$0xff]   ;;  %v11310_v29 = vld [vmem:[%s16779_s3 + $0xdc0] ss:$40 sps:$4 sm:$0xff]  }
 0x216   : > { %7716 = vmatprep.subr.bf16.mxu0 %v11279_v12  ;;  %v11313_v12 = vld [vmem:[%s16779_s3 + $0x4b8] ss:$40 sps:$4 sm:$0xff]  }
 0x218   : > { %7582 = vmatpush1.bf16.msra.mxu1 %v11274_v34  ;;  %v11318_v34 = vld [vmem:[%s16779_s3 + $0xe14] ss:$40 sps:$4 sm:$0xff]  }
 0x219   : > { %7717 = vmatpush1.bf16.msra.mxu0 %v11277_v45  ;;  %7583 = vmatprep.subr.bf16.mxu1 %v11282_v2  ;;  %v11321_v45 = vld [vmem:[%s16779_s3 + $0x50c] ss:$40 sps:$4 sm:$0xff]   ;;  %v11316_v2 = vld [vmem:[%s16779_s3 + $0xe10] ss:$40 sps:$4 sm:$0xff]  }
 0x21a   : > { %7718 = vmatprep.subr.bf16.mxu0 %v11285_v53  ;;  %v11319_v53 = vld [vmem:[%s16779_s3 + $0x508] ss:$40 sps:$4 sm:$0xff]  }
 0x21c   : > { %7584 = vmatpush1.bf16.msra.mxu1 %v11280_v26  ;;  %v11324_v26 = vld [vmem:[%s16779_s3 + $0xe64] ss:$40 sps:$4 sm:$0xff]  }
 0x21d   : > { %7719 = vmatpush1.bf16.msra.mxu0 %v11283_v16  ;;  %7585 = vmatprep.subr.bf16.mxu1 %v11288_v6  ;;  %v11327_v16 = vld [vmem:[%s16779_s3 + $0x55c] ss:$40 sps:$4 sm:$0xff]   ;;  %v11322_v6 = vld [vmem:[%s16779_s3 + $0xe60] ss:$40 sps:$4 sm:$0xff]  }
 0x21e   : > { %7720 = vmatprep.subr.bf16.mxu0 %v11291_v55  ;;  %v11325_v55 = vld [vmem:[%s16779_s3 + $0x558] ss:$40 sps:$4 sm:$0xff]  }
 0x220   : > { %7586 = vmatpush1.bf16.msra.mxu1 %v11286_v62  ;;  %v11330_v62 = vld [vmem:[%s16779_s3 + $0xeb4] ss:$40 sps:$4 sm:$0xff]  }
 0x221   : > { %7721 = vmatpush1.bf16.msra.mxu0 %v11289_v19  ;;  %7587 = vmatprep.subr.bf16.mxu1 %v11294_v13  ;;  %v14207_v19 = vmax.f32 %v1996_v23, 0.0  ;;  %v11333_v13 = vld [vmem:[%s16779_s3 + $0x5ac] ss:$40 sps:$4 sm:$0xff]  }
 0x222   : > { %7722 = vmatprep.subr.bf16.mxu0 %v11297_v54  ;;  %v14215_v54 = vmax.f32 %v1986_v63, 0.0  ;;  %v11339_v63 = vld [vmem:[%s16779_s3 + $0x5fc] ss:$40 sps:$4 sm:$0xff]  }
 0x223   : > { %v2616_v37 = vmax.f32 %v14207_v19, 0.0 }
 0x224   : > { %7588 = vmatpush1.bf16.msra.mxu1 %v11292_v32  ;;  %v11328_v32 = vld [vmem:[%s16779_s3 + $0xeb0] ss:$40 sps:$4 sm:$0xff]   ;;  %v2606_v23 = vmax.f32 %v14215_v54, 0.0 }
 0x225   : > { %7723 = vmatpush1.bf16.msra.mxu0 %v11295_v61  ;;  %7589 = vmatprep.subr.bf16.mxu1 %v11300_v17  ;;  %v11337_v61 = vld [vmem:[%s16779_s3 + $0x5f8] ss:$40 sps:$4 sm:$0xff]  }
 0x226   : > { %7724 = vmatprep.subr.bf16.mxu0 %v11303_v35  ;;  %v14258_v51 = vpack.c.bf16 %v2616_v37, %v2606_v23  ;;  %v11340_v17 = vld [vmem:[%s16779_s3 + $0xf50] ss:$40 sps:$4 sm:$0xff]  }
 0x227   : > { %v11343_v35 = vld [vmem:[%s16779_s3 + $0x648] ss:$40 sps:$4 sm:$0xff]  }
 0x228   : > { %7590 = vmatpush1.bf16.msra.mxu1 %v11298_v15  ;;  %v11348_v15 = vld [vmem:[%s16779_s3 + $0xfa4] ss:$40 sps:$4 sm:$0xff]  }
 0x229   : > { %7725 = vmatpush1.bf16.msra.mxu0 %v11301_v40  ;;  %7591 = vmatprep.subr.bf16.mxu1 %v11306_v27  ;;  %v11351_v40 = vld [vmem:[%s16779_s3 + $0x69c] ss:$40 sps:$4 sm:$0xff]   ;;  %v11346_v27 = vld [vmem:[%s16779_s3 + $0xfa0] ss:$40 sps:$4 sm:$0xff]  }
 0x22a   : > { %7726 = vmatprep.subr.bf16.mxu0 %v11309_v4  ;;  %v11349_v4 = vld [vmem:[%s16779_s3 + $0x698] ss:$40 sps:$4 sm:$0xff]  }
 0x22c   : > { %7592 = vmatpush1.bf16.msra.mxu1 %v11304_v36  ;;  %v11354_v36 = vld [vmem:[%s16779_s3 + $0xff4] ss:$40 sps:$4 sm:$0xff]  }
 0x22d   : > { %7727 = vmatpush1.bf16.msra.mxu0 %v11307_v24  ;;  %7593 = vmatprep.subr.bf16.mxu1 %v11312_v18  ;;  %v11357_v24 = vld [vmem:[%s16779_s3 + $0x6ec] ss:$40 sps:$4 sm:$0xff]   ;;  %v11352_v18 = vld [vmem:[%s16779_s3 + $0xff0] ss:$40 sps:$4 sm:$0xff]  }
 0x22e   : > { %7728 = vmatprep.subr.bf16.mxu0 %v11315_v10  ;;  %v11355_v10 = vld [vmem:[%s16779_s3 + $0x6e8] ss:$40 sps:$4 sm:$0xff]  }
 0x230   : > { %7594 = vmatpush1.bf16.msra.mxu1 %v11310_v29  ;;  %v11360_v29 = vld [vmem:[%s16779_s3 + $0x1044] ss:$40 sps:$4 sm:$0xff]  }
 0x231   : > { %7729 = vmatpush1.bf16.msra.mxu0 %v11313_v12  ;;  %7595 = vmatprep.subr.bf16.mxu1 %v11318_v34  ;;  %v11363_v12 = vld [vmem:[%s16779_s3 + $0x73c] ss:$40 sps:$4 sm:$0xff]   ;;  %v11358_v34 = vld [vmem:[%s16779_s3 + $0x1040] ss:$40 sps:$4 sm:$0xff]  }
 0x232   : > { %7741 = vmatprep.subr.bf16.mxu0 %v11321_v45  ;;  %v11361_v45 = vld [vmem:[%s16779_s3 + $0x738] ss:$40 sps:$4 sm:$0xff]  }
 0x234   : > { %7596 = vmatpush1.bf16.msra.mxu1 %v11316_v2  ;;  %7731 = vmatmul.mubr.bf16.vlgmr.msra.gmra.mrb[76].mxu0 %v13979_v44  ;;  %v11366_v2 = vld [vmem:[%s16779_s3 + $0x1094] ss:$40 sps:$4 sm:$0xff]  }
 0x235   : > { %7742 = vmatpush1.bf16.msra.mxu0 %v11319_v53  ;;  %7773 = vmatprep.mubr.bf16.mxu0 %v13944_v22  ;;  %v11369_v53 = vld [vmem:[%s16779_s3 + $0x78c] ss:$40 sps:$4 sm:$0xff]  }
 0x236   : > { %7597 = vmatprep.subr.bf16.mxu1 %v11324_v26  ;;  %7743 = vmatprep.subr.bf16.mxu0 %v11327_v16  ;;  %v11364_v26 = vld [vmem:[%s16779_s3 + $0x1090] ss:$40 sps:$4 sm:$0xff]  }
 0x237   : > { %v11367_v16 = vld [vmem:[%s16779_s3 + $0x788] ss:$40 sps:$4 sm:$0xff]  }
 0x238   : > { %7598 = vmatpush1.bf16.msra.mxu1 %v11322_v6  ;;  %v11372_v6 = vld [vmem:[%s16779_s3 + $0x10e4] ss:$40 sps:$4 sm:$0xff]  }
 0x239   : > { %7744 = vmatpush1.bf16.msra.mxu0 %v11325_v55  ;;  %7599 = vmatprep.subr.bf16.mxu1 %v11330_v62  ;;  %v11375_v55 = vld [vmem:[%s16779_s3 + $0x7dc] ss:$40 sps:$4 sm:$0xff]   ;;  %v11370_v62 = vld [vmem:[%s16779_s3 + $0x10e0] ss:$40 sps:$4 sm:$0xff]  }
 0x23a   : > { %7745 = vmatprep.subr.bf16.mxu0 %v11333_v13  ;;  %v11373_v13 = vld [vmem:[%s16779_s3 + $0x7d8] ss:$40 sps:$4 sm:$0xff]  }
 0x23c   : > { %7600 = vmatpush1.bf16.msra.mxu1 %v11328_v32  ;;  %v11378_v32 = vld [vmem:[%s16779_s3 + $0x1134] ss:$40 sps:$4 sm:$0xff]  }
 0x23d   : > { %7746 = vmatpush1.bf16.msra.mxu0 %v11331_v57  ;;  %7612 = vmatprep.subr.bf16.mxu1 %v11336_v48  ;;  %v11381_v57 = vld [vmem:[%s16779_s3 + $0x82c] ss:$40 sps:$4 sm:$0xff]   ;;  %v11376_v48 = vld [vmem:[%s16779_s3 + $0x1130] ss:$40 sps:$4 sm:$0xff]  }
 0x23e   : > { %7747 = vmatprep.subr.bf16.mxu0 %v11339_v63  ;;  %v11379_v63 = vld [vmem:[%s16779_s3 + $0x828] ss:$40 sps:$4 sm:$0xff]  }
 0x23f   : > { %7602 = vmatmul.mubr.bf16.vlgmr.msra.gmra.mrb[68].mxu1 %v14246_v5 }
 0x240   : > { %7613 = vmatpush1.bf16.msra.mxu1 %v11334_v42  ;;  %7644 = vmatprep.mubr.bf16.mxu1 %v14258_v51  ;;  %v11384_v42 = vld [vmem:[%s16779_s3 + $0x1184] ss:$40 sps:$4 sm:$0xff]  }
 0x241   : > { %7748 = vmatpush1.bf16.msra.mxu0 %v11337_v61  ;;  %7614 = vmatprep.subr.bf16.mxu1 %v11342_v3  ;;  %v11387_v61 = vld [vmem:[%s16779_s3 + $0x87c] ss:$40 sps:$4 sm:$0xff]   ;;  %v11382_v3 = vld [vmem:[%s16779_s3 + $0x1180] ss:$40 sps:$4 sm:$0xff]  }
 0x242   : > { %7749 = vmatprep.subr.bf16.mxu0 %v11345_v30  ;;  %v11385_v30 = vld [vmem:[%s16779_s3 + $0x878] ss:$40 sps:$4 sm:$0xff]  }
 0x244   : > { %7615 = vmatpush1.bf16.msra.mxu1 %v11340_v17  ;;  %v11390_v17 = vld [vmem:[%s16779_s3 + $0x11d4] ss:$40 sps:$4 sm:$0xff]  }
 0x245   : > { %7750 = vmatpush1.bf16.msra.mxu0 %v11343_v35  ;;  %7616 = vmatprep.subr.bf16.mxu1 %v11348_v15  ;;  %v11393_v35 = vld [vmem:[%s16779_s3 + $0x8cc] ss:$40 sps:$4 sm:$0xff]   ;;  %v11388_v15 = vld [vmem:[%s16779_s3 + $0x11d0] ss:$40 sps:$4 sm:$0xff]  }
 0x246   : > { %7751 = vmatprep.subr.bf16.mxu0 %v11351_v40  ;;  %v11391_v40 = vld [vmem:[%s16779_s3 + $0x8c8] ss:$40 sps:$4 sm:$0xff]  }
 0x248   : > { %7617 = vmatpush1.bf16.msra.mxu1 %v11346_v27  ;;  %v11396_v27 = vld [vmem:[%s16779_s3 + $0x1224] ss:$40 sps:$4 sm:$0xff]  }
 0x249   : > { %7752 = vmatpush1.bf16.msra.mxu0 %v11349_v4  ;;  %7618 = vmatprep.subr.bf16.mxu1 %v11354_v36  ;;  %v11399_v4 = vld [vmem:[%s16779_s3 + $0x91c] ss:$40 sps:$4 sm:$0xff]   ;;  %v11394_v36 = vld [vmem:[%s16779_s3 + $0x1220] ss:$40 sps:$4 sm:$0xff]  }
 0x24a   : > { %7753 = vmatprep.subr.bf16.mxu0 %v11357_v24  ;;  %v11397_v24 = vld [vmem:[%s16779_s3 + $0x918] ss:$40 sps:$4 sm:$0xff]  }
 0x24c   : > { %7619 = vmatpush1.bf16.msra.mxu1 %v11352_v18  ;;  %v11402_v18 = vld [vmem:[%s16779_s3 + $0x1274] ss:$40 sps:$4 sm:$0xff]  }
 0x24d   : > { %7754 = vmatpush1.bf16.msra.mxu0 %v11355_v10  ;;  %7620 = vmatprep.subr.bf16.mxu1 %v11360_v29  ;;  %v11405_v10 = vld [vmem:[%s16779_s3 + $0x96c] ss:$40 sps:$4 sm:$0xff]   ;;  %v11400_v29 = vld [vmem:[%s16779_s3 + $0x1270] ss:$40 sps:$4 sm:$0xff]  }
 0x24e   : > { %7755 = vmatprep.subr.bf16.mxu0 %v11363_v12  ;;  %v11403_v12 = vld [vmem:[%s16779_s3 + $0x968] ss:$40 sps:$4 sm:$0xff]  }
 0x250   : > { %7621 = vmatpush1.bf16.msra.mxu1 %v11358_v34  ;;  %v11408_v34 = vld [vmem:[%s16779_s3 + $0x12c4] ss:$40 sps:$4 sm:$0xff]  }
 0x251   : > { %7756 = vmatpush1.bf16.msra.mxu0 %v11361_v45  ;;  %7622 = vmatprep.subr.bf16.mxu1 %v11366_v2  ;;  %v11411_v45 = vld [vmem:[%s16779_s3 + $0x9bc] ss:$40 sps:$4 sm:$0xff]   ;;  %v11406_v2 = vld [vmem:[%s16779_s3 + $0x12c0] ss:$40 sps:$4 sm:$0xff]  }
 0x252   : > { %7757 = vmatprep.subr.bf16.mxu0 %v11369_v53  ;;  %v11409_v53 = vld [vmem:[%s16779_s3 + $0x9b8] ss:$40 sps:$4 sm:$0xff]  }
 0x254   : > { %7623 = vmatpush1.bf16.msra.mxu1 %v11364_v26  ;;  %v11414_v26 = vld [vmem:[%s16779_s3 + $0x1314] ss:$40 sps:$4 sm:$0xff]  }
 0x255   : > { %7758 = vmatpush1.bf16.msra.mxu0 %v11367_v16  ;;  %7624 = vmatprep.subr.bf16.mxu1 %v11372_v6  ;;  %v11417_v16 = vld [vmem:[%s16779_s3 + $0xa0c] ss:$40 sps:$4 sm:$0xff]   ;;  %v11412_v6 = vld [vmem:[%s16779_s3 + $0x1310] ss:$40 sps:$4 sm:$0xff]  }
 0x256   : > { %7759 = vmatprep.subr.bf16.mxu0 %v11375_v55  ;;  %v11415_v55 = vld [vmem:[%s16779_s3 + $0xa08] ss:$40 sps:$4 sm:$0xff]  }
 0x258   : > { %7625 = vmatpush1.bf16.msra.mxu1 %v11370_v62  ;;  %v1998_v62 = vmax.f32 %v13866_v9, 0.0  ;;  %v2305_v9 = vmax.f32 %v13911_v59, 0.0  ;;  %v2295_v59 = vmax.f32 %v13904_v60, 0.0 }
 0x259   : > { %7760 = vmatpush1.bf16.msra.mxu0 %v11373_v13  ;;  %7626 = vmatprep.subr.bf16.mxu1 %v11378_v32  ;;  %v11420_v13 = vld [vmem:[%s16779_s3 + $0x1364] ss:$40 sps:$4 sm:$0xff]  }
 0x25a   : > { %7761 = vmatprep.subr.bf16.mxu0 %v11381_v57  ;;  %v11423_v32 = vld [vmem:[%s16779_s3 + $0xa5c] ss:$40 sps:$4 sm:$0xff]   ;;  %v1988_v57 = vmax.f32 %v13854_v0, 0.0 }
 0x25b   : > { %v11426_v0 = vld [vmem:[%s16779_s3 + $0x13b4] ss:$40 sps:$4 sm:$0xff]  }
 0x25c   : > { %7627 = vmatpush1.bf16.msra.mxu1 %v11376_v48  ;;  %v11418_v48 = vld [vmem:[%s16779_s3 + $0x1360] ss:$40 sps:$4 sm:$0xff]  }
 0x25d   : > { %7762 = vmatpush1.bf16.msra.mxu0 %v11379_v63  ;;  %7628 = vmatprep.subr.bf16.mxu1 %v11384_v42  ;;  %v11421_v63 = vld [vmem:[%s16779_s3 + $0xa58] ss:$40 sps:$4 sm:$0xff]   ;;  %v14435_v42 = vmax.f32 %v1998_v62, 0.0 }
 0x25e   : > { %7763 = vmatprep.subr.bf16.mxu0 %v11387_v61  ;;  %v11429_v61 = vld [vmem:[%s16779_s3 + $0xaac] ss:$40 sps:$4 sm:$0xff]   ;;  %v11448_v62 = vld [vmem:[%s16779_s3 + $0x14f0] ss:$40 sps:$4 sm:$0xff]  }
 0x25f   : > { %v16793_v60 = vmax.f32 %v14435_v42, 0.0 }
 0x260   : > { %7629 = vmatpush1.bf16.msra.mxu1 %v11382_v3  ;;  %v14441_v3 = vmax.f32 %v1988_v57, 0.0  ;;  %v11459_v57 = vld [vmem:[%s16779_s3 + $0xc3c] ss:$40 sps:$4 sm:$0xff]  }
 0x261   : > { %7764 = vmatpush1.bf16.msra.mxu0 %v11385_v30  ;;  %7630 = vmatprep.subr.bf16.mxu1 %v11390_v17  ;;  %v11424_v30 = vld [vmem:[%s16779_s3 + $0x13b0] ss:$40 sps:$4 sm:$0xff]   ;;  %v14446_v17 = vmax.f32 %v2305_v9, 0.0 }
 0x262   : > { %7765 = vmatprep.subr.bf16.mxu0 %v11393_v35  ;;  %v11427_v35 = vld [vmem:[%s16779_s3 + $0xaa8] ss:$40 sps:$4 sm:$0xff]   ;;  %v11457_v9 = vld [vmem:[%s16779_s3 + $0xc38] ss:$40 sps:$4 sm:$0xff]  }
 0x264   : > { %7631 = vmatpush1.bf16.msra.mxu1 %v11388_v15  ;;  %v11432_v15 = vld [vmem:[%s16779_s3 + $0x1404] ss:$40 sps:$4 sm:$0xff]  }
 0x265   : > { %7766 = vmatpush1.bf16.msra.mxu0 %v11391_v40  ;;  %7632 = vmatprep.subr.bf16.mxu1 %v11396_v27  ;;  %v11435_v40 = vld [vmem:[%s16779_s3 + $0xafc] ss:$40 sps:$4 sm:$0xff]   ;;  %v14458_v27 = vmax.f32 %v2295_v59, 0.0  ;;  %v11463_v59 = vld [vmem:[%s16779_s3 + $0xc88] ss:$40 sps:$4 sm:$0xff]  }
 0x266   : > { %7767 = vmatprep.subr.bf16.mxu0 %v11399_v4  ;;  %v16795_v4 = vmax.f32 %v14441_v3, 0.0 }
 0x268   : > { %7633 = vmatpush1.bf16.msra.mxu1 %v11394_v36  ;;  %v11430_v36 = vld [vmem:[%s16779_s3 + $0x1400] ss:$40 sps:$4 sm:$0xff]  }
 0x269   : > { %7768 = vmatpush1.bf16.msra.mxu0 %v11397_v24  ;;  %7634 = vmatprep.subr.bf16.mxu1 %v11402_v18  ;;  %v14466_v24 = vpack.c.bf16 %v14446_v17, %v14458_v27  ;;  %v11433_v18 = vld [vmem:[%s16779_s3 + $0xaf8] ss:$40 sps:$4 sm:$0xff]  }
 0x26a   : > { %7769 = vmatprep.subr.bf16.mxu0 %v11405_v10  ;;  %v11438_v10 = vld [vmem:[%s16779_s3 + $0x1454] ss:$40 sps:$4 sm:$0xff]  }
 0x26c   : > { %7635 = vmatpush1.bf16.msra.mxu1 %v11400_v29  ;;  %v14478_v29 = vpack.c.bf16 %v16793_v60, %v16795_v4 }
 0x26d   : > { %7770 = vmatpush1.bf16.msra.mxu0 %v11403_v12  ;;  %7636 = vmatprep.subr.bf16.mxu1 %v11408_v34  ;;  %v11441_v12 = vld [vmem:[%s16779_s3 + $0xb4c] ss:$40 sps:$4 sm:$0xff]   ;;  %v11436_v34 = vld [vmem:[%s16779_s3 + $0x1450] ss:$40 sps:$4 sm:$0xff]  }
 0x26e   : > { %7771 = vmatprep.subr.bf16.mxu0 %v11411_v45  ;;  %v11439_v45 = vld [vmem:[%s16779_s3 + $0xb48] ss:$40 sps:$4 sm:$0xff]  }
 0x270   : > { %7637 = vmatpush1.bf16.msra.mxu1 %v11406_v2  ;;  %v11444_v2 = vld [vmem:[%s16779_s3 + $0x14a4] ss:$40 sps:$4 sm:$0xff]  }
 0x271   : > { %7772 = vmatpush1.bf16.msra.mxu0 %v11409_v53  ;;  %7638 = vmatprep.subr.bf16.mxu1 %v11414_v26  ;;  %v11447_v53 = vld [vmem:[%s16779_s3 + $0xb9c] ss:$40 sps:$4 sm:$0xff]   ;;  %v11442_v26 = vld [vmem:[%s16779_s3 + $0x14a0] ss:$40 sps:$4 sm:$0xff]  }
 0x272   : > { %7784 = vmatprep.subr.bf16.mxu0 %v11417_v16  ;;  %v11445_v16 = vld [vmem:[%s16779_s3 + $0xb98] ss:$40 sps:$4 sm:$0xff]  }
 0x274   : > { %7639 = vmatpush1.bf16.msra.mxu1 %v11412_v6  ;;  %7774 = vmatmul.mubr.bf16.vlgmr.msra.gmra.mrb[76].mxu0 %v14020_v14  ;;  %v11450_v6 = vld [vmem:[%s16779_s3 + $0x14f4] ss:$40 sps:$4 sm:$0xff]  }
 0x275   : > { %7785 = vmatpush1.bf16.msra.mxu0 %v11415_v55  ;;  %7816 = vmatprep.mubr.bf16.mxu0 %v14030_v33  ;;  %v11453_v55 = vld [vmem:[%s16779_s3 + $0xbec] ss:$40 sps:$4 sm:$0xff]  }
 0x276   : > { %7640 = vmatprep.subr.bf16.mxu1 %v11420_v13  ;;  %7786 = vmatprep.subr.bf16.mxu0 %v11423_v32  ;;  %v11451_v13 = vld [vmem:[%s16779_s3 + $0xbe8] ss:$40 sps:$4 sm:$0xff]   ;;  %v11456_v32 = vld [vmem:[%s16779_s3 + $0x1544] ss:$40 sps:$4 sm:$0xff]  }
 0x278   : > { %7641 = vmatpush1.bf16.msra.mxu1 %v11418_v48  ;;  %v11454_v48 = vld [vmem:[%s16779_s3 + $0x1540] ss:$40 sps:$4 sm:$0xff]  }
 0x279   : > { %7787 = vmatpush1.bf16.msra.mxu0 %v11421_v63  ;;  %7642 = vmatprep.subr.bf16.mxu1 %v11426_v0  ;;  %v11462_v63 = vld [vmem:[%s16779_s3 + $0x1594] ss:$40 sps:$4 sm:$0xff]  }
 0x27a   : > { %7788 = vmatprep.subr.bf16.mxu0 %v11429_v61  ;;  %v11465_v0 = vld [vmem:[%s16779_s3 + $0xc8c] ss:$40 sps:$4 sm:$0xff]   ;;  %v11460_v61 = vld [vmem:[%s16779_s3 + $0x1590] ss:$40 sps:$4 sm:$0xff]  }
 0x27c   : > { %7643 = vmatpush1.bf16.msra.mxu1 %v11424_v30  ;;  %v11468_v30 = vld [vmem:[%s16779_s3 + $0x15e4] ss:$40 sps:$4 sm:$0xff]  }
 0x27d   : > { %7789 = vmatpush1.bf16.msra.mxu0 %v11427_v35  ;;  %7655 = vmatprep.subr.bf16.mxu1 %v11432_v15  ;;  %v11471_v35 = vld [vmem:[%s16779_s3 + $0xcdc] ss:$40 sps:$4 sm:$0xff]   ;;  %v11466_v15 = vld [vmem:[%s16779_s3 + $0x15e0] ss:$40 sps:$4 sm:$0xff]  }
 0x27e   : > { %7790 = vmatprep.subr.bf16.mxu0 %v11435_v40  ;;  %v11469_v40 = vld [vmem:[%s16779_s3 + $0xcd8] ss:$40 sps:$4 sm:$0xff]  }
 0x27f   : > { %7645 = vmatmul.mubr.bf16.vlgmr.msra.gmra.mrb[68].mxu1 %v14466_v24 }
 0x280   : > { %7656 = vmatpush1.bf16.msra.mxu1 %v11430_v36  ;;  %7687 = vmatprep.mubr.bf16.mxu1 %v14478_v29  ;;  %v11474_v36 = vld [vmem:[%s16779_s3 + $0x1634] ss:$40 sps:$4 sm:$0xff]  }
 0x281   : > { %7791 = vmatpush1.bf16.msra.mxu0 %v11433_v18  ;;  %7657 = vmatprep.subr.bf16.mxu1 %v11438_v10  ;;  %v11477_v18 = vld [vmem:[%s16779_s3 + $0xd2c] ss:$40 sps:$4 sm:$0xff]   ;;  %v11472_v10 = vld [vmem:[%s16779_s3 + $0x1630] ss:$40 sps:$4 sm:$0xff]  }
 0x282   : > { %7792 = vmatprep.subr.bf16.mxu0 %v11441_v12  ;;  %v11475_v12 = vld [vmem:[%s16779_s3 + $0xd28] ss:$40 sps:$4 sm:$0xff]  }
 0x284   : > { %7658 = vmatpush1.bf16.msra.mxu1 %v11436_v34  ;;  %v11480_v34 = vld [vmem:[%s16779_s3 + $0x1684] ss:$40 sps:$4 sm:$0xff]  }
 0x285   : > { %7793 = vmatpush1.bf16.msra.mxu0 %v11439_v45  ;;  %7659 = vmatprep.subr.bf16.mxu1 %v11444_v2  ;;  %v11483_v45 = vld [vmem:[%s16779_s3 + $0xd7c] ss:$40 sps:$4 sm:$0xff]   ;;  %v11478_v2 = vld [vmem:[%s16779_s3 + $0x1680] ss:$40 sps:$4 sm:$0xff]  }
 0x286   : > { %7794 = vmatprep.subr.bf16.mxu0 %v11447_v53  ;;  %v11481_v53 = vld [vmem:[%s16779_s3 + $0xd78] ss:$40 sps:$4 sm:$0xff]  }
 0x288   : > { %7660 = vmatpush1.bf16.msra.mxu1 %v11442_v26  ;;  %v11486_v26 = vld [vmem:[%s16779_s3 + $0x16d4] ss:$40 sps:$4 sm:$0xff]  }
 0x289   : > { %7795 = vmatpush1.bf16.msra.mxu0 %v11445_v16  ;;  %7661 = vmatprep.subr.bf16.mxu1 %v11450_v6  ;;  %v11489_v16 = vld [vmem:[%s16779_s3 + $0xdcc] ss:$40 sps:$4 sm:$0xff]   ;;  %v11484_v6 = vld [vmem:[%s16779_s3 + $0x16d0] ss:$40 sps:$4 sm:$0xff]  }
 0x28a   : > { %7796 = vmatprep.subr.bf16.mxu0 %v11453_v55  ;;  %v11487_v55 = vld [vmem:[%s16779_s3 + $0xdc8] ss:$40 sps:$4 sm:$0xff]  }
 0x28c   : > { %7662 = vmatpush1.bf16.msra.mxu1 %v11448_v62  ;;  %v11492_v62 = vld [vmem:[%s16779_s3 + $0x1724] ss:$40 sps:$4 sm:$0xff]  }
 0x28d   : > { %7797 = vmatpush1.bf16.msra.mxu0 %v11451_v13  ;;  %7663 = vmatprep.subr.bf16.mxu1 %v11456_v32  ;;  %v11495_v13 = vld [vmem:[%s16779_s3 + $0xe1c] ss:$40 sps:$4 sm:$0xff]   ;;  %v11490_v32 = vld [vmem:[%s16779_s3 + $0x1720] ss:$40 sps:$4 sm:$0xff]  }
 0x28e   : > { %7798 = vmatprep.subr.bf16.mxu0 %v11459_v57  ;;  %v11493_v57 = vld [vmem:[%s16779_s3 + $0xe18] ss:$40 sps:$4 sm:$0xff]  }
 0x290   : > { %7664 = vmatpush1.bf16.msra.mxu1 %v11454_v48  ;;  %v11498_v48 = vld [vmem:[%s16779_s3 + $0x1774] ss:$40 sps:$4 sm:$0xff]  }
 0x291   : > { %7799 = vmatpush1.bf16.msra.mxu0 %v11457_v9  ;;  %7665 = vmatprep.subr.bf16.mxu1 %v11462_v63  ;;  %v11501_v9 = vld [vmem:[%s16779_s3 + $0xe6c] ss:$40 sps:$4 sm:$0xff]   ;;  %v11496_v63 = vld [vmem:[%s16779_s3 + $0x1770] ss:$40 sps:$4 sm:$0xff]  }
 0x292   : > { %7800 = vmatprep.subr.bf16.mxu0 %v11465_v0  ;;  %v11499_v0 = vld [vmem:[%s16779_s3 + $0xe68] ss:$40 sps:$4 sm:$0xff]  }
 0x294   : > { %7666 = vmatpush1.bf16.msra.mxu1 %v11460_v61  ;;  %v11504_v61 = vld [vmem:[%s16779_s3 + $0x17c4] ss:$40 sps:$4 sm:$0xff]  }
 0x295   : > { %7801 = vmatpush1.bf16.msra.mxu0 %v11463_v59  ;;  %7667 = vmatprep.subr.bf16.mxu1 %v11468_v30  ;;  %v11507_v59 = vld [vmem:[%s16779_s3 + $0xebc] ss:$40 sps:$4 sm:$0xff]   ;;  %v11502_v30 = vld [vmem:[%s16779_s3 + $0x17c0] ss:$40 sps:$4 sm:$0xff]  }
 0x296   : > { %7802 = vmatprep.subr.bf16.mxu0 %v11471_v35  ;;  %v11505_v35 = vld [vmem:[%s16779_s3 + $0xeb8] ss:$40 sps:$4 sm:$0xff]  }
 0x298   : > { %7668 = vmatpush1.bf16.msra.mxu1 %v11466_v15  ;;  %v11510_v15 = vld [vmem:[%s16779_s3 + $0x1814] ss:$40 sps:$4 sm:$0xff]  }
 0x299   : > { %7803 = vmatpush1.bf16.msra.mxu0 %v11469_v40  ;;  %7669 = vmatprep.subr.bf16.mxu1 %v11474_v36  ;;  %v11513_v40 = vld [vmem:[%s16779_s3 + $0xf0c] ss:$40 sps:$4 sm:$0xff]   ;;  %v11508_v36 = vld [vmem:[%s16779_s3 + $0x1810] ss:$40 sps:$4 sm:$0xff]  }
 0x29a   : > { %7804 = vmatprep.subr.bf16.mxu0 %v11477_v18  ;;  %v1997_v18 = vmax.f32 %v13860_v43, 0.0  ;;  %v11514_v43 = vld [vmem:[%s16779_s3 + $0x1860] ss:$40 sps:$4 sm:$0xff]  }
 0x29c   : > { %7670 = vmatpush1.bf16.msra.mxu1 %v11472_v10  ;;  %v11511_v10 = vld [vmem:[%s16779_s3 + $0xf08] ss:$40 sps:$4 sm:$0xff]  }
 0x29d   : > { %7805 = vmatpush1.bf16.msra.mxu0 %v11475_v12  ;;  %7671 = vmatprep.subr.bf16.mxu1 %v11480_v34  ;;  %v11516_v12 = vld [vmem:[%s16779_s3 + $0x1864] ss:$40 sps:$4 sm:$0xff]  }
 0x29e   : > { %7806 = vmatprep.subr.bf16.mxu0 %v11483_v45  ;;  %v11519_v34 = vld [vmem:[%s16779_s3 + $0xf5c] ss:$40 sps:$4 sm:$0xff]   ;;  %v1987_v45 = vmax.f32 %v13848_v1, 0.0 }
 0x29f   : > { %v11522_v1 = vld [vmem:[%s16779_s3 + $0x18b4] ss:$40 sps:$4 sm:$0xff]  }
 0x2a0   : > { %7672 = vmatpush1.bf16.msra.mxu1 %v11478_v2  ;;  %v14647_v2 = vmax.f32 %v1997_v18, 0.0  ;;  %v11546_v18 = vld [vmem:[%s16779_s3 + $0x104] ss:$40 sps:$4 sm:$0xff]  }
 0x2a1   : > { %7807 = vmatpush1.bf16.msra.mxu0 %v11481_v53  ;;  %7673 = vmatprep.subr.bf16.mxu1 %v11486_v26  ;;  %v11517_v53 = vld [vmem:[%s16779_s3 + $0xf58] ss:$40 sps:$4 sm:$0xff]   ;;  %v11525_v26 = vld [vmem:[%s16779_s3 + $0xfac] ss:$40 sps:$4 sm:$0xff]  }
 0x2a2   : > { %7808 = vmatprep.subr.bf16.mxu0 %v11489_v16  ;;  %v14659_v16 = vmax.f32 %v1987_v45, 0.0  ;;  %v11544_v45 = vld [vmem:[%s16779_s3 + $0x100] ss:$40 sps:$4 sm:$0xff]  }
 0x2a4   : > { %7674 = vmatpush1.bf16.msra.mxu1 %v11484_v6  ;;  %v11520_v6 = vld [vmem:[%s16779_s3 + $0x18b0] ss:$40 sps:$4 sm:$0xff]  }
 0x2a5   : > { %7809 = vmatpush1.bf16.msra.mxu0 %v11487_v55  ;;  %7675 = vmatprep.subr.bf16.mxu1 %v11492_v62  ;;  %v16794_v55 = vmax.f32 %v14647_v2, 0.0  ;;  %v11523_v62 = vld [vmem:[%s16779_s3 + $0xfa8] ss:$40 sps:$4 sm:$0xff]  }
 0x2a6   : > { %7810 = vmatprep.subr.bf16.mxu0 %v11495_v13  ;;  %v11528_v13 = vld [vmem:[%s16779_s3 + $0x14] ss:$40 sps:$4 sm:$0xff]  }
 0x2a8   : > { %7676 = vmatpush1.bf16.msra.mxu1 %v11490_v32  ;;  %v11531_v32 = vld [vmem:[%s16779_s3 + $0xffc] ss:$40 sps:$4 sm:$0xff]  }
 0x2a9   : > { %7811 = vmatpush1.bf16.msra.mxu0 %v11493_v57  ;;  %7677 = vmatprep.subr.bf16.mxu1 %v11498_v48  ;;  %v2607_v57 = vmax.f32 %v14659_v16, 0.0  ;;  %v11526_v48 = vld [vmem:[%s16779_s3 + $0x10] ss:$40 sps:$4 sm:$0xff]  }
 0x2aa   : > { %7812 = vmatprep.subr.bf16.mxu0 %v11501_v9 }
 0x2ab   : > { %v14682_v9 = vpack.c.bf16 %v16794_v55, %v2607_v57 }
 0x2ac   : > { %7678 = vmatpush1.bf16.msra.mxu1 %v11496_v63  ;;  %v11529_v63 = vld [vmem:[%s16779_s3 + $0xff8] ss:$40 sps:$4 sm:$0xff]  }
 0x2ad   : > { %7813 = vmatpush1.bf16.msra.mxu0 %v11499_v0  ;;  %7679 = vmatprep.subr.bf16.mxu1 %v11504_v61  ;;  %v11534_v0 = vld [vmem:[%s16779_s3 + $0x64] ss:$40 sps:$4 sm:$0xff]  }
 0x2ae   : > { %7814 = vmatprep.subr.bf16.mxu0 %v11507_v59  ;;  %v11537_v61 = vld [vmem:[%s16779_s3 + $0x104c] ss:$40 sps:$4 sm:$0xff]   ;;  %v11532_v59 = vld [vmem:[%s16779_s3 + $0x60] ss:$40 sps:$4 sm:$0xff]  }
 0x2b0   : > { %7680 = vmatpush1.bf16.msra.mxu1 %v11502_v30  ;;  %v11535_v30 = vld [vmem:[%s16779_s3 + $0x1048] ss:$40 sps:$4 sm:$0xff]  }
 0x2b1   : > { %7815 = vmatpush1.bf16.msra.mxu0 %v11505_v35  ;;  %7681 = vmatprep.subr.bf16.mxu1 %v11510_v15  ;;  %v11540_v35 = vld [vmem:[%s16779_s3 + $0xb4] ss:$40 sps:$4 sm:$0xff]  }
 0x2b2   : > { %7827 = vmatprep.subr.bf16.mxu0 %v11513_v40  ;;  %v11543_v15 = vld [vmem:[%s16779_s3 + $0x109c] ss:$40 sps:$4 sm:$0xff]   ;;  %v11538_v40 = vld [vmem:[%s16779_s3 + $0xb0] ss:$40 sps:$4 sm:$0xff]  }
 0x2b4   : > { %7682 = vmatpush1.bf16.msra.mxu1 %v11508_v36  ;;  %7817 = vmatmul.mubr.bf16.vlgmr.msra.gmra.mrb[76].mxu0 %v14246_v5  ;;  %v11541_v36 = vld [vmem:[%s16779_s3 + $0x1098] ss:$40 sps:$4 sm:$0xff]  }
 0x2b5   : > { %7828 = vmatpush1.bf16.msra.mxu0 %v11511_v10  ;;  %7859 = vmatprep.mubr.bf16.mxu0 %v14258_v51  ;;  %v11549_v10 = vld [vmem:[%s16779_s3 + $0x10ec] ss:$40 sps:$4 sm:$0xff]  }
 0x2b6   : > { %7683 = vmatprep.subr.bf16.mxu1 %v11516_v12  ;;  %7829 = vmatprep.subr.bf16.mxu0 %v11519_v34 }
 0x2b8   : > { %7684 = vmatpush1.bf16.msra.mxu1 %v11514_v43 }
 0x2b9   : > { %7830 = vmatpush1.bf16.msra.mxu0 %v11517_v53  ;;  %7685 = vmatprep.subr.bf16.mxu1 %v11522_v1  ;;  %v11547_v53 = vld [vmem:[%s16779_s3 + $0x10e8] ss:$40 sps:$4 sm:$0xff]   ;;  %v11552_v1 = vld [vmem:[%s16779_s3 + $0x154] ss:$40 sps:$4 sm:$0xff]  }
 0x2ba   : > { %7831 = vmatprep.subr.bf16.mxu0 %v11525_v26 }
 0x2bc   : > { %7686 = vmatpush1.bf16.msra.mxu1 %v11520_v6  ;;  %v11555_v6 = vld [vmem:[%s16779_s3 + $0x113c] ss:$40 sps:$4 sm:$0xff]  }
 0x2bd   : > { %7832 = vmatpush1.bf16.msra.mxu0 %v11523_v62  ;;  %7913 = vmatprep.subr.bf16.mxu1 %v11528_v13  ;;  %v11550_v62 = vld [vmem:[%s16779_s3 + $0x150] ss:$40 sps:$4 sm:$0xff]  }
 0x2be   : > { %7833 = vmatprep.subr.bf16.mxu0 %v11531_v32  ;;  %v11553_v13 = vld [vmem:[%s16779_s3 + $0x1138] ss:$40 sps:$4 sm:$0xff]   ;;  %v11558_v32 = vld [vmem:[%s16779_s3 + $0x1a4] ss:$40 sps:$4 sm:$0xff]  }
 0x2bf   : > { %7688 = vmatmul.mubr.bf16.vlgmr.msra.gmra.mrb[68].mxu1 %v14682_v9 }
 0x2c0   : > { %7914 = vmatpush1.bf16.msra.mxu1 %v11526_v48  ;;  %7945 = vmatprep.mubr.bf16.mxu1 %v13972_v28  ;;  %v11561_v48 = vld [vmem:[%s16779_s3 + $0x118c] ss:$40 sps:$4 sm:$0xff]  }
 0x2c1   : > { %7834 = vmatpush1.bf16.msra.mxu0 %v11529_v63  ;;  %7915 = vmatprep.subr.bf16.mxu1 %v11534_v0  ;;  %v11556_v63 = vld [vmem:[%s16779_s3 + $0x1a0] ss:$40 sps:$4 sm:$0xff]  }
 0x2c2   : > { %7835 = vmatprep.subr.bf16.mxu0 %v11537_v61  ;;  %v11559_v0 = vld [vmem:[%s16779_s3 + $0x1188] ss:$40 sps:$4 sm:$0xff]   ;;  %v11564_v61 = vld [vmem:[%s16779_s3 + $0x1f4] ss:$40 sps:$4 sm:$0xff]  }
 0x2c4   : > { %7916 = vmatpush1.bf16.msra.mxu1 %v11532_v59  ;;  %v11567_v59 = vld [vmem:[%s16779_s3 + $0x11dc] ss:$40 sps:$4 sm:$0xff]  }
 0x2c5   : > { %7836 = vmatpush1.bf16.msra.mxu0 %v11535_v30  ;;  %7917 = vmatprep.subr.bf16.mxu1 %v11540_v35  ;;  %v11562_v30 = vld [vmem:[%s16779_s3 + $0x1f0] ss:$40 sps:$4 sm:$0xff]  }
 0x2c6   : > { %7837 = vmatprep.subr.bf16.mxu0 %v11543_v15  ;;  %v11565_v35 = vld [vmem:[%s16779_s3 + $0x11d8] ss:$40 sps:$4 sm:$0xff]   ;;  %v11570_v15 = vld [vmem:[%s16779_s3 + $0x244] ss:$40 sps:$4 sm:$0xff]  }
 0x2c7   : > { %v14719_v12 = vpop.f32.mrb[72].mxu0 }
 0x2c8   : > { %7918 = vmatpush1.bf16.msra.mxu1 %v11538_v40  ;;  %v14721_v34 = vpop.f32.mrb[73].mxu0  ;;  %v11573_v40 = vld [vmem:[%s16779_s3 + $0x122c] ss:$40 sps:$4 sm:$0xff]  }
 0x2c9   : > { %7838 = vmatpush1.bf16.msra.mxu0 %v11541_v36  ;;  %v14726_v43 = vpop.f32.mrb[74].mxu0  ;;  %7919 = vmatprep.subr.bf16.mxu1 %v11546_v18  ;;  %v11568_v36 = vld [vmem:[%s16779_s3 + $0x240] ss:$40 sps:$4 sm:$0xff]  }
 0x2ca   : > { %v14734_v26 = vpop.f32.mrb[75].mxu0  ;;  %7839 = vmatprep.subr.bf16.mxu0 %v11549_v10  ;;  %v11571_v18 = vld [vmem:[%s16779_s3 + $0x1228] ss:$40 sps:$4 sm:$0xff]   ;;  %v11576_v10 = vld [vmem:[%s16779_s3 + $0x294] ss:$40 sps:$4 sm:$0xff]  }
 0x2cc   : > { %7920 = vmatpush1.bf16.msra.mxu1 %v11544_v45  ;;  %v11579_v45 = vld [vmem:[%s16779_s3 + $0x127c] ss:$40 sps:$4 sm:$0xff]  }
 0x2cd   : > { %7840 = vmatpush1.bf16.msra.mxu0 %v11547_v53  ;;  %7921 = vmatprep.subr.bf16.mxu1 %v11552_v1  ;;  %v11574_v53 = vld [vmem:[%s16779_s3 + $0x290] ss:$40 sps:$4 sm:$0xff]  }
 0x2ce   : > { %7841 = vmatprep.subr.bf16.mxu0 %v11555_v6  ;;  %v11577_v1 = vld [vmem:[%s16779_s3 + $0x1278] ss:$40 sps:$4 sm:$0xff]   ;;  %v11582_v6 = vld [vmem:[%s16779_s3 + $0x2e4] ss:$40 sps:$4 sm:$0xff]  }
 0x2d0   : > { %7922 = vmatpush1.bf16.msra.mxu1 %v11550_v62  ;;  %v11585_v62 = vld [vmem:[%s16779_s3 + $0x12cc] ss:$40 sps:$4 sm:$0xff]  }
 0x2d1   : > { %7842 = vmatpush1.bf16.msra.mxu0 %v11553_v13  ;;  %7923 = vmatprep.subr.bf16.mxu1 %v11558_v32  ;;  %v11580_v13 = vld [vmem:[%s16779_s3 + $0x2e0] ss:$40 sps:$4 sm:$0xff]  }
 0x2d2   : > { %7843 = vmatprep.subr.bf16.mxu0 %v11561_v48  ;;  %v11583_v32 = vld [vmem:[%s16779_s3 + $0x12c8] ss:$40 sps:$4 sm:$0xff]   ;;  %v11588_v48 = vld [vmem:[%s16779_s3 + $0x334] ss:$40 sps:$4 sm:$0xff]  }
 0x2d4   : > { %7924 = vmatpush1.bf16.msra.mxu1 %v11556_v63  ;;  %v11591_v63 = vld [vmem:[%s16779_s3 + $0x131c] ss:$40 sps:$4 sm:$0xff]  }
 0x2d5   : > { %7844 = vmatpush1.bf16.msra.mxu0 %v11559_v0  ;;  %7925 = vmatprep.subr.bf16.mxu1 %v11564_v61  ;;  %v11586_v0 = vld [vmem:[%s16779_s3 + $0x330] ss:$40 sps:$4 sm:$0xff]  }
 0x2d6   : > { %7845 = vmatprep.subr.bf16.mxu0 %v11567_v59  ;;  %v11589_v61 = vld [vmem:[%s16779_s3 + $0x1318] ss:$40 sps:$4 sm:$0xff]   ;;  %v11594_v59 = vld [vmem:[%s16779_s3 + $0x384] ss:$40 sps:$4 sm:$0xff]  }
 0x2d8   : > { %7926 = vmatpush1.bf16.msra.mxu1 %v11562_v30  ;;  %v11597_v30 = vld [vmem:[%s16779_s3 + $0x136c] ss:$40 sps:$4 sm:$0xff]  }
 0x2d9   : > { %7846 = vmatpush1.bf16.msra.mxu0 %v11565_v35  ;;  %7927 = vmatprep.subr.bf16.mxu1 %v11570_v15  ;;  %v11592_v35 = vld [vmem:[%s16779_s3 + $0x380] ss:$40 sps:$4 sm:$0xff]  }
 0x2da   : > { %7847 = vmatprep.subr.bf16.mxu0 %v11573_v40  ;;  %v11595_v15 = vld [vmem:[%s16779_s3 + $0x1368] ss:$40 sps:$4 sm:$0xff]   ;;  %v11600_v40 = vld [vmem:[%s16779_s3 + $0x3d4] ss:$40 sps:$4 sm:$0xff]  }
 0x2dc   : > { %7928 = vmatpush1.bf16.msra.mxu1 %v11568_v36  ;;  %v11603_v36 = vld [vmem:[%s16779_s3 + $0x13bc] ss:$40 sps:$4 sm:$0xff]  }
 0x2dd   : > { %7848 = vmatpush1.bf16.msra.mxu0 %v11571_v18  ;;  %7929 = vmatprep.subr.bf16.mxu1 %v11576_v10  ;;  %v11598_v18 = vld [vmem:[%s16779_s3 + $0x3d0] ss:$40 sps:$4 sm:$0xff]  }
 0x2de   : > { %7849 = vmatprep.subr.bf16.mxu0 %v11579_v45  ;;  %v11601_v10 = vld [vmem:[%s16779_s3 + $0x13b8] ss:$40 sps:$4 sm:$0xff]   ;;  %v11606_v45 = vld [vmem:[%s16779_s3 + $0x424] ss:$40 sps:$4 sm:$0xff]  }
 0x2e0   : > { %7930 = vmatpush1.bf16.msra.mxu1 %v11574_v53  ;;  %v11609_v53 = vld [vmem:[%s16779_s3 + $0x140c] ss:$40 sps:$4 sm:$0xff]  }
 0x2e1   : > { %7850 = vmatpush1.bf16.msra.mxu0 %v11577_v1  ;;  %7931 = vmatprep.subr.bf16.mxu1 %v11582_v6  ;;  %v11604_v1 = vld [vmem:[%s16779_s3 + $0x420] ss:$40 sps:$4 sm:$0xff]  }
 0x2e2   : > { %7851 = vmatprep.subr.bf16.mxu0 %v11585_v62  ;;  %v11607_v6 = vld [vmem:[%s16779_s3 + $0x1408] ss:$40 sps:$4 sm:$0xff]   ;;  %v11612_v62 = vld [vmem:[%s16779_s3 + $0x474] ss:$40 sps:$4 sm:$0xff]  }
 0x2e4   : > { %7932 = vmatpush1.bf16.msra.mxu1 %v11580_v13  ;;  %v11615_v13 = vld [vmem:[%s16779_s3 + $0x145c] ss:$40 sps:$4 sm:$0xff]  }
 0x2e5   : > { %7852 = vmatpush1.bf16.msra.mxu0 %v11583_v32  ;;  %7933 = vmatprep.subr.bf16.mxu1 %v11588_v48  ;;  %v11610_v32 = vld [vmem:[%s16779_s3 + $0x470] ss:$40 sps:$4 sm:$0xff]  }
 0x2e6   : > { %7853 = vmatprep.subr.bf16.mxu0 %v11591_v63  ;;  %v11613_v48 = vld [vmem:[%s16779_s3 + $0x1458] ss:$40 sps:$4 sm:$0xff]   ;;  %v11618_v63 = vld [vmem:[%s16779_s3 + $0x4c4] ss:$40 sps:$4 sm:$0xff]  }
 0x2e8   : > { %7934 = vmatpush1.bf16.msra.mxu1 %v11586_v0  ;;  %v11621_v0 = vld [vmem:[%s16779_s3 + $0x14ac] ss:$40 sps:$4 sm:$0xff]  }
 0x2e9   : > { %7854 = vmatpush1.bf16.msra.mxu0 %v11589_v61  ;;  %7935 = vmatprep.subr.bf16.mxu1 %v11594_v59  ;;  %v11616_v61 = vld [vmem:[%s16779_s3 + $0x4c0] ss:$40 sps:$4 sm:$0xff]  }
 0x2ea   : > { %7855 = vmatprep.subr.bf16.mxu0 %v11597_v30  ;;  %v11619_v59 = vld [vmem:[%s16779_s3 + $0x14a8] ss:$40 sps:$4 sm:$0xff]   ;;  %v11624_v30 = vld [vmem:[%s16779_s3 + $0x514] ss:$40 sps:$4 sm:$0xff]  }
 0x2ec   : > { %7936 = vmatpush1.bf16.msra.mxu1 %v11592_v35  ;;  %v11627_v35 = vld [vmem:[%s16779_s3 + $0x14fc] ss:$40 sps:$4 sm:$0xff]  }
 0x2ed   : > { %7856 = vmatpush1.bf16.msra.mxu0 %v11595_v15  ;;  %7937 = vmatprep.subr.bf16.mxu1 %v11600_v40  ;;  %v11622_v15 = vld [vmem:[%s16779_s3 + $0x510] ss:$40 sps:$4 sm:$0xff]  }
 0x2ee   : > { %7857 = vmatprep.subr.bf16.mxu0 %v11603_v36  ;;  %v11625_v40 = vld [vmem:[%s16779_s3 + $0x14f8] ss:$40 sps:$4 sm:$0xff]   ;;  %v11630_v36 = vld [vmem:[%s16779_s3 + $0x564] ss:$40 sps:$4 sm:$0xff]  }
 0x2f0   : > { %7938 = vmatpush1.bf16.msra.mxu1 %v11598_v18  ;;  %v11633_v18 = vld [vmem:[%s16779_s3 + $0x154c] ss:$40 sps:$4 sm:$0xff]  }
 0x2f1   : > { %7858 = vmatpush1.bf16.msra.mxu0 %v11601_v10  ;;  %7939 = vmatprep.subr.bf16.mxu1 %v11606_v45  ;;  %v11628_v10 = vld [vmem:[%s16779_s3 + $0x560] ss:$40 sps:$4 sm:$0xff]  }
 0x2f2   : > { %7870 = vmatprep.subr.bf16.mxu0 %v11609_v53  ;;  %v11631_v45 = vld [vmem:[%s16779_s3 + $0x1548] ss:$40 sps:$4 sm:$0xff]   ;;  %v11636_v53 = vld [vmem:[%s16779_s3 + $0x5b4] ss:$40 sps:$4 sm:$0xff]  }
 0x2f4   : > { %7860 = vmatmul.mubr.bf16.vlgmr.msra.gmra.mrb[76].mxu0 %v14466_v24  ;;  %7940 = vmatpush1.bf16.msra.mxu1 %v11604_v1  ;;  %v11639_v1 = vld [vmem:[%s16779_s3 + $0x159c] ss:$40 sps:$4 sm:$0xff]  }
 0x2f5   : > { %7871 = vmatpush1.bf16.msra.mxu0 %v11607_v6  ;;  %7902 = vmatprep.mubr.bf16.mxu0 %v14478_v29  ;;  %v11634_v6 = vld [vmem:[%s16779_s3 + $0x5b0] ss:$40 sps:$4 sm:$0xff]  }
 0x2f6   : > { %7941 = vmatprep.subr.bf16.mxu1 %v11612_v62  ;;  %7872 = vmatprep.subr.bf16.mxu0 %v11615_v13  ;;  %v11637_v62 = vld [vmem:[%s16779_s3 + $0x1598] ss:$40 sps:$4 sm:$0xff]   ;;  %v11642_v13 = vld [vmem:[%s16779_s3 + $0x604] ss:$40 sps:$4 sm:$0xff]  }
 0x2f8   : > { %7942 = vmatpush1.bf16.msra.mxu1 %v11610_v32  ;;  %v11645_v32 = vld [vmem:[%s16779_s3 + $0x15ec] ss:$40 sps:$4 sm:$0xff]  }
 0x2f9   : > { %7873 = vmatpush1.bf16.msra.mxu0 %v11613_v48  ;;  %7943 = vmatprep.subr.bf16.mxu1 %v11618_v63  ;;  %v11640_v48 = vld [vmem:[%s16779_s3 + $0x600] ss:$40 sps:$4 sm:$0xff]  }
 0x2fa   : > { %7874 = vmatprep.subr.bf16.mxu0 %v11621_v0  ;;  %v11643_v63 = vld [vmem:[%s16779_s3 + $0x15e8] ss:$40 sps:$4 sm:$0xff]   ;;  %v11648_v0 = vld [vmem:[%s16779_s3 + $0x654] ss:$40 sps:$4 sm:$0xff]  }
 0x2fc   : > { %7944 = vmatpush1.bf16.msra.mxu1 %v11616_v61  ;;  %v11651_v61 = vld [vmem:[%s16779_s3 + $0x163c] ss:$40 sps:$4 sm:$0xff]  }
 0x2fd   : > { %7875 = vmatpush1.bf16.msra.mxu0 %v11619_v59  ;;  %7956 = vmatprep.subr.bf16.mxu1 %v11624_v30  ;;  %v11646_v59 = vld [vmem:[%s16779_s3 + $0x650] ss:$40 sps:$4 sm:$0xff]  }
 0x2fe   : > { %7876 = vmatprep.subr.bf16.mxu0 %v11627_v35  ;;  %v11649_v30 = vld [vmem:[%s16779_s3 + $0x1638] ss:$40 sps:$4 sm:$0xff]   ;;  %v11654_v35 = vld [vmem:[%s16779_s3 + $0x6a4] ss:$40 sps:$4 sm:$0xff]  }
 0x2ff   : > { %7946 = vmatmul.mubr.bf16.vlgmr.msra.gmra.mrb[72].mxu1 %v13979_v44 }
 0x300   : > { %7957 = vmatpush1.bf16.msra.mxu1 %v11622_v15  ;;  %7988 = vmatprep.mubr.bf16.mxu1 %v13944_v22  ;;  %v11657_v15 = vld [vmem:[%s16779_s3 + $0x168c] ss:$40 sps:$4 sm:$0xff]  }
 0x301   : > { %7877 = vmatpush1.bf16.msra.mxu0 %v11625_v40  ;;  %7958 = vmatprep.subr.bf16.mxu1 %v11630_v36  ;;  %v11652_v40 = vld [vmem:[%s16779_s3 + $0x6a0] ss:$40 sps:$4 sm:$0xff]  }
 0x302   : > { %7878 = vmatprep.subr.bf16.mxu0 %v11633_v18  ;;  %v11655_v36 = vld [vmem:[%s16779_s3 + $0x1688] ss:$40 sps:$4 sm:$0xff]   ;;  %v11660_v18 = vld [vmem:[%s16779_s3 + $0x6f4] ss:$40 sps:$4 sm:$0xff]  }
 0x304   : > { %7959 = vmatpush1.bf16.msra.mxu1 %v11628_v10  ;;  %v11663_v10 = vld [vmem:[%s16779_s3 + $0x16dc] ss:$40 sps:$4 sm:$0xff]  }
 0x305   : > { %7879 = vmatpush1.bf16.msra.mxu0 %v11631_v45  ;;  %7960 = vmatprep.subr.bf16.mxu1 %v11636_v53  ;;  %v11658_v45 = vld [vmem:[%s16779_s3 + $0x6f0] ss:$40 sps:$4 sm:$0xff]  }
 0x306   : > { %7880 = vmatprep.subr.bf16.mxu0 %v11639_v1  ;;  %v11661_v53 = vld [vmem:[%s16779_s3 + $0x16d8] ss:$40 sps:$4 sm:$0xff]   ;;  %v11666_v1 = vld [vmem:[%s16779_s3 + $0x744] ss:$40 sps:$4 sm:$0xff]  }
 0x308   : > { %7961 = vmatpush1.bf16.msra.mxu1 %v11634_v6  ;;  %v11669_v6 = vld [vmem:[%s16779_s3 + $0x172c] ss:$40 sps:$4 sm:$0xff]  }
 0x309   : > { %7881 = vmatpush1.bf16.msra.mxu0 %v11637_v62  ;;  %7962 = vmatprep.subr.bf16.mxu1 %v11642_v13  ;;  %v11664_v62 = vld [vmem:[%s16779_s3 + $0x740] ss:$40 sps:$4 sm:$0xff]  }
 0x30a   : > { %7882 = vmatprep.subr.bf16.mxu0 %v11645_v32  ;;  %v11667_v13 = vld [vmem:[%s16779_s3 + $0x1728] ss:$40 sps:$4 sm:$0xff]   ;;  %v11672_v32 = vld [vmem:[%s16779_s3 + $0x794] ss:$40 sps:$4 sm:$0xff]  }
 0x30c   : > { %7963 = vmatpush1.bf16.msra.mxu1 %v11640_v48  ;;  %v11675_v48 = vld [vmem:[%s16779_s3 + $0x177c] ss:$40 sps:$4 sm:$0xff]  }
 0x30d   : > { %7883 = vmatpush1.bf16.msra.mxu0 %v11643_v63  ;;  %7964 = vmatprep.subr.bf16.mxu1 %v11648_v0  ;;  %v11670_v63 = vld [vmem:[%s16779_s3 + $0x790] ss:$40 sps:$4 sm:$0xff]  }
 0x30e   : > { %7884 = vmatprep.subr.bf16.mxu0 %v11651_v61  ;;  %v11673_v0 = vld [vmem:[%s16779_s3 + $0x1778] ss:$40 sps:$4 sm:$0xff]   ;;  %v11678_v61 = vld [vmem:[%s16779_s3 + $0x7e4] ss:$40 sps:$4 sm:$0xff]  }
 0x310   : > { %7965 = vmatpush1.bf16.msra.mxu1 %v11646_v59  ;;  %v11681_v59 = vld [vmem:[%s16779_s3 + $0x17cc] ss:$40 sps:$4 sm:$0xff]  }
 0x311   : > { %7885 = vmatpush1.bf16.msra.mxu0 %v11649_v30  ;;  %7966 = vmatprep.subr.bf16.mxu1 %v11654_v35  ;;  %v11676_v30 = vld [vmem:[%s16779_s3 + $0x7e0] ss:$40 sps:$4 sm:$0xff]  }
 0x312   : > { %7886 = vmatprep.subr.bf16.mxu0 %v11657_v15  ;;  %v11679_v35 = vld [vmem:[%s16779_s3 + $0x17c8] ss:$40 sps:$4 sm:$0xff]   ;;  %v11684_v15 = vld [vmem:[%s16779_s3 + $0x834] ss:$40 sps:$4 sm:$0xff]  }
 0x314   : > { %7967 = vmatpush1.bf16.msra.mxu1 %v11652_v40  ;;  %v11687_v40 = vld [vmem:[%s16779_s3 + $0x181c] ss:$40 sps:$4 sm:$0xff]  }
 0x315   : > { %7887 = vmatpush1.bf16.msra.mxu0 %v11655_v36  ;;  %7968 = vmatprep.subr.bf16.mxu1 %v11660_v18  ;;  %v11682_v36 = vld [vmem:[%s16779_s3 + $0x830] ss:$40 sps:$4 sm:$0xff]  }
 0x316   : > { %7888 = vmatprep.subr.bf16.mxu0 %v11663_v10  ;;  %v11685_v18 = vld [vmem:[%s16779_s3 + $0x1818] ss:$40 sps:$4 sm:$0xff]   ;;  %v11690_v10 = vld [vmem:[%s16779_s3 + $0x884] ss:$40 sps:$4 sm:$0xff]  }
 0x318   : > { %7969 = vmatpush1.bf16.msra.mxu1 %v11658_v45  ;;  %v11693_v45 = vld [vmem:[%s16779_s3 + $0x186c] ss:$40 sps:$4 sm:$0xff]  }
 0x319   : > { %7889 = vmatpush1.bf16.msra.mxu0 %v11661_v53  ;;  %7970 = vmatprep.subr.bf16.mxu1 %v11666_v1  ;;  %v11688_v53 = vld [vmem:[%s16779_s3 + $0x880] ss:$40 sps:$4 sm:$0xff]  }
 0x31a   : > { %7890 = vmatprep.subr.bf16.mxu0 %v11669_v6  ;;  %v11691_v1 = vld [vmem:[%s16779_s3 + $0x1868] ss:$40 sps:$4 sm:$0xff]   ;;  %v11696_v6 = vld [vmem:[%s16779_s3 + $0x8d4] ss:$40 sps:$4 sm:$0xff]  }
 0x31c   : > { %7971 = vmatpush1.bf16.msra.mxu1 %v11664_v62  ;;  %v11699_v62 = vld [vmem:[%s16779_s3 + $0x18bc] ss:$40 sps:$4 sm:$0xff]  }
 0x31d   : > { %7891 = vmatpush1.bf16.msra.mxu0 %v11667_v13  ;;  %7972 = vmatprep.subr.bf16.mxu1 %v11672_v32  ;;  %v11694_v13 = vld [vmem:[%s16779_s3 + $0x8d0] ss:$40 sps:$4 sm:$0xff]  }
 0x31e   : > { %7892 = vmatprep.subr.bf16.mxu0 %v11675_v48  ;;  %v11697_v32 = vld [vmem:[%s16779_s3 + $0x18b8] ss:$40 sps:$4 sm:$0xff]   ;;  %v11702_v48 = vld [vmem:[%s16779_s3 + $0x924] ss:$40 sps:$4 sm:$0xff]  }
 0x320   : > { %7973 = vmatpush1.bf16.msra.mxu1 %v11670_v63  ;;  %v11705_v63 = vld [vmem:[%s16779_s3 + $0x1c] ss:$40 sps:$4 sm:$0xff]  }
 0x321   : > { %7893 = vmatpush1.bf16.msra.mxu0 %v11673_v0  ;;  %7974 = vmatprep.subr.bf16.mxu1 %v11678_v61  ;;  %v11700_v0 = vld [vmem:[%s16779_s3 + $0x920] ss:$40 sps:$4 sm:$0xff]  }
 0x322   : > { %7894 = vmatprep.subr.bf16.mxu0 %v11681_v59  ;;  %v11703_v61 = vld [vmem:[%s16779_s3 + $0x18] ss:$40 sps:$4 sm:$0xff]   ;;  %v11708_v59 = vld [vmem:[%s16779_s3 + $0x974] ss:$40 sps:$4 sm:$0xff]  }
 0x324   : > { %7975 = vmatpush1.bf16.msra.mxu1 %v11676_v30  ;;  %v11711_v30 = vld [vmem:[%s16779_s3 + $0x6c] ss:$40 sps:$4 sm:$0xff]  }
 0x325   : > { %7895 = vmatpush1.bf16.msra.mxu0 %v11679_v35  ;;  %7976 = vmatprep.subr.bf16.mxu1 %v11684_v15  ;;  %v11706_v35 = vld [vmem:[%s16779_s3 + $0x970] ss:$40 sps:$4 sm:$0xff]  }
 0x326   : > { %7896 = vmatprep.subr.bf16.mxu0 %v11687_v40  ;;  %v11709_v15 = vld [vmem:[%s16779_s3 + $0x68] ss:$40 sps:$4 sm:$0xff]   ;;  %v11714_v40 = vld [vmem:[%s16779_s3 + $0x9c4] ss:$40 sps:$4 sm:$0xff]  }
 0x328   : > { %7977 = vmatpush1.bf16.msra.mxu1 %v11682_v36  ;;  %v11717_v36 = vld [vmem:[%s16779_s3 + $0xbc] ss:$40 sps:$4 sm:$0xff]  }
 0x329   : > { %7897 = vmatpush1.bf16.msra.mxu0 %v11685_v18  ;;  %7978 = vmatprep.subr.bf16.mxu1 %v11690_v10  ;;  %v11712_v18 = vld [vmem:[%s16779_s3 + $0x9c0] ss:$40 sps:$4 sm:$0xff]  }
 0x32a   : > { %7898 = vmatprep.subr.bf16.mxu0 %v11693_v45  ;;  %v11715_v10 = vld [vmem:[%s16779_s3 + $0xb8] ss:$40 sps:$4 sm:$0xff]   ;;  %v11720_v45 = vld [vmem:[%s16779_s3 + $0xa14] ss:$40 sps:$4 sm:$0xff]  }
 0x32c   : > { %7979 = vmatpush1.bf16.msra.mxu1 %v11688_v53  ;;  %v11723_v53 = vld [vmem:[%s16779_s3 + $0x10c] ss:$40 sps:$4 sm:$0xff]  }
 0x32d   : > { %7899 = vmatpush1.bf16.msra.mxu0 %v11691_v1  ;;  %7980 = vmatprep.subr.bf16.mxu1 %v11696_v6  ;;  %v11718_v1 = vld [vmem:[%s16779_s3 + $0xa10] ss:$40 sps:$4 sm:$0xff]  }
 0x32e   : > { %7900 = vmatprep.subr.bf16.mxu0 %v11699_v62  ;;  %v11721_v6 = vld [vmem:[%s16779_s3 + $0x108] ss:$40 sps:$4 sm:$0xff]   ;;  %v11726_v62 = vld [vmem:[%s16779_s3 + $0xa64] ss:$40 sps:$4 sm:$0xff]  }
 0x330   : > { %7981 = vmatpush1.bf16.msra.mxu1 %v11694_v13  ;;  %v11729_v13 = vld [vmem:[%s16779_s3 + $0x15c] ss:$40 sps:$4 sm:$0xff]  }
 0x331   : > { %7901 = vmatpush1.bf16.msra.mxu0 %v11697_v32  ;;  %7982 = vmatprep.subr.bf16.mxu1 %v11702_v48  ;;  %v11724_v32 = vld [vmem:[%s16779_s3 + $0xa60] ss:$40 sps:$4 sm:$0xff]  }
 0x332   : > { %8128 = vmatprep.subr.bf16.mxu0 %v11705_v63  ;;  %v11727_v48 = vld [vmem:[%s16779_s3 + $0x158] ss:$40 sps:$4 sm:$0xff]   ;;  %v11732_v63 = vld [vmem:[%s16779_s3 + $0xab4] ss:$40 sps:$4 sm:$0xff]  }
 0x334   : > { %7903 = vmatmul.mubr.bf16.vlgmr.msra.gmra.mrb[76].mxu0 %v14682_v9  ;;  %7983 = vmatpush1.bf16.msra.mxu1 %v11700_v0  ;;  %v11735_v0 = vld [vmem:[%s16779_s3 + $0x1ac] ss:$40 sps:$4 sm:$0xff]  }
 0x335   : > { %8129 = vmatpush1.bf16.msra.mxu0 %v11703_v61  ;;  %8160 = vmatprep.mubr.bf16.mxu0 %v13972_v28  ;;  %v11730_v61 = vld [vmem:[%s16779_s3 + $0xab0] ss:$40 sps:$4 sm:$0xff]  }
 0x336   : > { %7984 = vmatprep.subr.bf16.mxu1 %v11708_v59  ;;  %8130 = vmatprep.subr.bf16.mxu0 %v11711_v30  ;;  %v11733_v59 = vld [vmem:[%s16779_s3 + $0x1a8] ss:$40 sps:$4 sm:$0xff]   ;;  %v11738_v30 = vld [vmem:[%s16779_s3 + $0xb04] ss:$40 sps:$4 sm:$0xff]  }
 0x338   : > { %7985 = vmatpush1.bf16.msra.mxu1 %v11706_v35  ;;  %v11741_v35 = vld [vmem:[%s16779_s3 + $0x1fc] ss:$40 sps:$4 sm:$0xff]  }
 0x339   : > { %8131 = vmatpush1.bf16.msra.mxu0 %v11709_v15  ;;  %7986 = vmatprep.subr.bf16.mxu1 %v11714_v40  ;;  %v11736_v15 = vld [vmem:[%s16779_s3 + $0xb00] ss:$40 sps:$4 sm:$0xff]  }
 0x33a   : > { %8132 = vmatprep.subr.bf16.mxu0 %v11717_v36  ;;  %v11739_v40 = vld [vmem:[%s16779_s3 + $0x1f8] ss:$40 sps:$4 sm:$0xff]   ;;  %v11744_v36 = vld [vmem:[%s16779_s3 + $0xb54] ss:$40 sps:$4 sm:$0xff]  }
 0x33c   : > { %7987 = vmatpush1.bf16.msra.mxu1 %v11712_v18  ;;  %v11747_v18 = vld [vmem:[%s16779_s3 + $0x24c] ss:$40 sps:$4 sm:$0xff]  }
 0x33d   : > { %8133 = vmatpush1.bf16.msra.mxu0 %v11715_v10  ;;  %7999 = vmatprep.subr.bf16.mxu1 %v11720_v45  ;;  %v11742_v10 = vld [vmem:[%s16779_s3 + $0xb50] ss:$40 sps:$4 sm:$0xff]  }
 0x33e   : > { %8134 = vmatprep.subr.bf16.mxu0 %v11723_v53  ;;  %v11745_v45 = vld [vmem:[%s16779_s3 + $0x248] ss:$40 sps:$4 sm:$0xff]   ;;  %v11750_v53 = vld [vmem:[%s16779_s3 + $0xba4] ss:$40 sps:$4 sm:$0xff]  }
 0x33f   : > { %7989 = vmatmul.mubr.bf16.vlgmr.msra.gmra.mrb[72].mxu1 %v14020_v14 }
 0x340   : > { %8000 = vmatpush1.bf16.msra.mxu1 %v11718_v1  ;;  %8031 = vmatprep.mubr.bf16.mxu1 %v14030_v33  ;;  %v11753_v1 = vld [vmem:[%s16779_s3 + $0x29c] ss:$40 sps:$4 sm:$0xff]  }
 0x341   : > { %8135 = vmatpush1.bf16.msra.mxu0 %v11721_v6  ;;  %8001 = vmatprep.subr.bf16.mxu1 %v11726_v62  ;;  %v11748_v6 = vld [vmem:[%s16779_s3 + $0xba0] ss:$40 sps:$4 sm:$0xff]  }
 0x342   : > { %8136 = vmatprep.subr.bf16.mxu0 %v11729_v13  ;;  %v11751_v62 = vld [vmem:[%s16779_s3 + $0x298] ss:$40 sps:$4 sm:$0xff]   ;;  %v11756_v13 = vld [vmem:[%s16779_s3 + $0xbf4] ss:$40 sps:$4 sm:$0xff]  }
 0x344   : > { %8002 = vmatpush1.bf16.msra.mxu1 %v11724_v32  ;;  %v11759_v32 = vld [vmem:[%s16779_s3 + $0x2ec] ss:$40 sps:$4 sm:$0xff]  }
 0x345   : > { %8137 = vmatpush1.bf16.msra.mxu0 %v11727_v48  ;;  %8003 = vmatprep.subr.bf16.mxu1 %v11732_v63  ;;  %v11754_v48 = vld [vmem:[%s16779_s3 + $0xbf0] ss:$40 sps:$4 sm:$0xff]  }
 0x346   : > { %8138 = vmatprep.subr.bf16.mxu0 %v11735_v0  ;;  %v11757_v63 = vld [vmem:[%s16779_s3 + $0x2e8] ss:$40 sps:$4 sm:$0xff]   ;;  %v11762_v0 = vld [vmem:[%s16779_s3 + $0xc44] ss:$40 sps:$4 sm:$0xff]  }
 0x348   : > { %8004 = vmatpush1.bf16.msra.mxu1 %v11730_v61  ;;  %v11765_v61 = vld [vmem:[%s16779_s3 + $0x33c] ss:$40 sps:$4 sm:$0xff]  }
 0x349   : > { %8139 = vmatpush1.bf16.msra.mxu0 %v11733_v59  ;;  %8005 = vmatprep.subr.bf16.mxu1 %v11738_v30  ;;  %v11760_v59 = vld [vmem:[%s16779_s3 + $0xc40] ss:$40 sps:$4 sm:$0xff]  }
 0x34a   : > { %8140 = vmatprep.subr.bf16.mxu0 %v11741_v35  ;;  %v11763_v30 = vld [vmem:[%s16779_s3 + $0x338] ss:$40 sps:$4 sm:$0xff]   ;;  %v11768_v35 = vld [vmem:[%s16779_s3 + $0xc94] ss:$40 sps:$4 sm:$0xff]  }
 0x34c   : > { %8006 = vmatpush1.bf16.msra.mxu1 %v11736_v15  ;;  %v11771_v15 = vld [vmem:[%s16779_s3 + $0x38c] ss:$40 sps:$4 sm:$0xff]  }
 0x34d   : > { %8141 = vmatpush1.bf16.msra.mxu0 %v11739_v40  ;;  %8007 = vmatprep.subr.bf16.mxu1 %v11744_v36  ;;  %v11766_v40 = vld [vmem:[%s16779_s3 + $0xc90] ss:$40 sps:$4 sm:$0xff]  }
 0x34e   : > { %8142 = vmatprep.subr.bf16.mxu0 %v11747_v18  ;;  %v11769_v36 = vld [vmem:[%s16779_s3 + $0x388] ss:$40 sps:$4 sm:$0xff]   ;;  %v11774_v18 = vld [vmem:[%s16779_s3 + $0xce4] ss:$40 sps:$4 sm:$0xff]  }
 0x350   : > { %8008 = vmatpush1.bf16.msra.mxu1 %v11742_v10  ;;  %v11777_v10 = vld [vmem:[%s16779_s3 + $0x3dc] ss:$40 sps:$4 sm:$0xff]  }
 0x351   : > { %8143 = vmatpush1.bf16.msra.mxu0 %v11745_v45  ;;  %8009 = vmatprep.subr.bf16.mxu1 %v11750_v53  ;;  %v11772_v45 = vld [vmem:[%s16779_s3 + $0xce0] ss:$40 sps:$4 sm:$0xff]  }
 0x352   : > { %8144 = vmatprep.subr.bf16.mxu0 %v11753_v1  ;;  %v11775_v53 = vld [vmem:[%s16779_s3 + $0x3d8] ss:$40 sps:$4 sm:$0xff]   ;;  %v11780_v1 = vld [vmem:[%s16779_s3 + $0xd34] ss:$40 sps:$4 sm:$0xff]  }
 0x354   : > { %8010 = vmatpush1.bf16.msra.mxu1 %v11748_v6  ;;  %v11783_v6 = vld [vmem:[%s16779_s3 + $0x42c] ss:$40 sps:$4 sm:$0xff]  }
 0x355   : > { %8145 = vmatpush1.bf16.msra.mxu0 %v11751_v62  ;;  %8011 = vmatprep.subr.bf16.mxu1 %v11756_v13  ;;  %v11778_v62 = vld [vmem:[%s16779_s3 + $0xd30] ss:$40 sps:$4 sm:$0xff]  }
 0x356   : > { %8146 = vmatprep.subr.bf16.mxu0 %v11759_v32  ;;  %v11781_v13 = vld [vmem:[%s16779_s3 + $0x428] ss:$40 sps:$4 sm:$0xff]   ;;  %v11786_v32 = vld [vmem:[%s16779_s3 + $0xd84] ss:$40 sps:$4 sm:$0xff]  }
 0x358   : > { %8012 = vmatpush1.bf16.msra.mxu1 %v11754_v48  ;;  %v11789_v48 = vld [vmem:[%s16779_s3 + $0x47c] ss:$40 sps:$4 sm:$0xff]  }
 0x359   : > { %8147 = vmatpush1.bf16.msra.mxu0 %v11757_v63  ;;  %8013 = vmatprep.subr.bf16.mxu1 %v11762_v0  ;;  %v11784_v63 = vld [vmem:[%s16779_s3 + $0xd80] ss:$40 sps:$4 sm:$0xff]  }
 0x35a   : > { %8148 = vmatprep.subr.bf16.mxu0 %v11765_v61  ;;  %v11787_v0 = vld [vmem:[%s16779_s3 + $0x478] ss:$40 sps:$4 sm:$0xff]   ;;  %v11792_v61 = vld [vmem:[%s16779_s3 + $0xdd4] ss:$40 sps:$4 sm:$0xff]  }
 0x35c   : > { %8014 = vmatpush1.bf16.msra.mxu1 %v11760_v59  ;;  %v11795_v59 = vld [vmem:[%s16779_s3 + $0x4cc] ss:$40 sps:$4 sm:$0xff]  }
 0x35d   : > { %8149 = vmatpush1.bf16.msra.mxu0 %v11763_v30  ;;  %8015 = vmatprep.subr.bf16.mxu1 %v11768_v35  ;;  %v11790_v30 = vld [vmem:[%s16779_s3 + $0xdd0] ss:$40 sps:$4 sm:$0xff]  }
 0x35e   : > { %8150 = vmatprep.subr.bf16.mxu0 %v11771_v15  ;;  %v11793_v35 = vld [vmem:[%s16779_s3 + $0x4c8] ss:$40 sps:$4 sm:$0xff]   ;;  %v11798_v15 = vld [vmem:[%s16779_s3 + $0xe24] ss:$40 sps:$4 sm:$0xff]  }
 0x360   : > { %8016 = vmatpush1.bf16.msra.mxu1 %v11766_v40  ;;  %v11801_v40 = vld [vmem:[%s16779_s3 + $0x51c] ss:$40 sps:$4 sm:$0xff]  }
 0x361   : > { %8151 = vmatpush1.bf16.msra.mxu0 %v11769_v36  ;;  %8017 = vmatprep.subr.bf16.mxu1 %v11774_v18  ;;  %v11796_v36 = vld [vmem:[%s16779_s3 + $0xe20] ss:$40 sps:$4 sm:$0xff]  }
 0x362   : > { %8152 = vmatprep.subr.bf16.mxu0 %v11777_v10  ;;  %v11799_v18 = vld [vmem:[%s16779_s3 + $0x518] ss:$40 sps:$4 sm:$0xff]   ;;  %v11804_v10 = vld [vmem:[%s16779_s3 + $0xe74] ss:$40 sps:$4 sm:$0xff]  }
 0x364   : > { %8018 = vmatpush1.bf16.msra.mxu1 %v11772_v45  ;;  %v11807_v45 = vld [vmem:[%s16779_s3 + $0x56c] ss:$40 sps:$4 sm:$0xff]  }
 0x365   : > { %8153 = vmatpush1.bf16.msra.mxu0 %v11775_v53  ;;  %8019 = vmatprep.subr.bf16.mxu1 %v11780_v1  ;;  %v11802_v53 = vld [vmem:[%s16779_s3 + $0xe70] ss:$40 sps:$4 sm:$0xff]  }
 0x366   : > { %8154 = vmatprep.subr.bf16.mxu0 %v11783_v6  ;;  %v11805_v1 = vld [vmem:[%s16779_s3 + $0x568] ss:$40 sps:$4 sm:$0xff]   ;;  %v11810_v6 = vld [vmem:[%s16779_s3 + $0xec4] ss:$40 sps:$4 sm:$0xff]  }
 0x368   : > { %8020 = vmatpush1.bf16.msra.mxu1 %v11778_v62  ;;  %v11813_v62 = vld [vmem:[%s16779_s3 + $0x5bc] ss:$40 sps:$4 sm:$0xff]  }
 0x369   : > { %8155 = vmatpush1.bf16.msra.mxu0 %v11781_v13  ;;  %8021 = vmatprep.subr.bf16.mxu1 %v11786_v32  ;;  %v11808_v13 = vld [vmem:[%s16779_s3 + $0xec0] ss:$40 sps:$4 sm:$0xff]  }
 0x36a   : > { %8156 = vmatprep.subr.bf16.mxu0 %v11789_v48  ;;  %v11811_v32 = vld [vmem:[%s16779_s3 + $0x5b8] ss:$40 sps:$4 sm:$0xff]   ;;  %v11816_v48 = vld [vmem:[%s16779_s3 + $0xf14] ss:$40 sps:$4 sm:$0xff]  }
 0x36c   : > { %8022 = vmatpush1.bf16.msra.mxu1 %v11784_v63  ;;  %v11819_v63 = vld [vmem:[%s16779_s3 + $0x60c] ss:$40 sps:$4 sm:$0xff]  }
 0x36d   : > { %8157 = vmatpush1.bf16.msra.mxu0 %v11787_v0  ;;  %8023 = vmatprep.subr.bf16.mxu1 %v11792_v61  ;;  %v11814_v0 = vld [vmem:[%s16779_s3 + $0xf10] ss:$40 sps:$4 sm:$0xff]  }
 0x36e   : > { %8158 = vmatprep.subr.bf16.mxu0 %v11795_v59  ;;  %v11817_v61 = vld [vmem:[%s16779_s3 + $0x608] ss:$40 sps:$4 sm:$0xff]   ;;  %v11822_v59 = vld [vmem:[%s16779_s3 + $0xf64] ss:$40 sps:$4 sm:$0xff]  }
 0x370   : > { %8024 = vmatpush1.bf16.msra.mxu1 %v11790_v30  ;;  %v11825_v30 = vld [vmem:[%s16779_s3 + $0x65c] ss:$40 sps:$4 sm:$0xff]  }
 0x371   : > { %8159 = vmatpush1.bf16.msra.mxu0 %v11793_v35  ;;  %8025 = vmatprep.subr.bf16.mxu1 %v11798_v15  ;;  %v11820_v35 = vld [vmem:[%s16779_s3 + $0xf60] ss:$40 sps:$4 sm:$0xff]  }
 0x372   : > { %8171 = vmatprep.subr.bf16.mxu0 %v11801_v40  ;;  %v11823_v15 = vld [vmem:[%s16779_s3 + $0x658] ss:$40 sps:$4 sm:$0xff]   ;;  %v11828_v40 = vld [vmem:[%s16779_s3 + $0xfb4] ss:$40 sps:$4 sm:$0xff]  }
 0x374   : > { %8026 = vmatpush1.bf16.msra.mxu1 %v11796_v36  ;;  %8161 = vmatmul.mubr.bf16.vlgmr.msra.gmra.mrb[80].mxu0 %v13979_v44  ;;  %v11831_v36 = vld [vmem:[%s16779_s3 + $0x6ac] ss:$40 sps:$4 sm:$0xff]  }
 0x375   : > { %8172 = vmatpush1.bf16.msra.mxu0 %v11799_v18  ;;  %8203 = vmatprep.mubr.bf16.mxu0 %v13944_v22  ;;  %v11826_v18 = vld [vmem:[%s16779_s3 + $0xfb0] ss:$40 sps:$4 sm:$0xff]  }
 0x376   : > { %8027 = vmatprep.subr.bf16.mxu1 %v11804_v10  ;;  %8173 = vmatprep.subr.bf16.mxu0 %v11807_v45  ;;  %v11829_v10 = vld [vmem:[%s16779_s3 + $0x6a8] ss:$40 sps:$4 sm:$0xff]   ;;  %v11834_v45 = vld [vmem:[%s16779_s3 + $0x1004] ss:$40 sps:$4 sm:$0xff]  }
 0x378   : > { %8028 = vmatpush1.bf16.msra.mxu1 %v11802_v53  ;;  %v11837_v53 = vld [vmem:[%s16779_s3 + $0x6fc] ss:$40 sps:$4 sm:$0xff]  }
 0x379   : > { %8174 = vmatpush1.bf16.msra.mxu0 %v11805_v1  ;;  %8029 = vmatprep.subr.bf16.mxu1 %v11810_v6  ;;  %v11832_v1 = vld [vmem:[%s16779_s3 + $0x1000] ss:$40 sps:$4 sm:$0xff]  }
 0x37a   : > { %8175 = vmatprep.subr.bf16.mxu0 %v11813_v62  ;;  %v11835_v6 = vld [vmem:[%s16779_s3 + $0x6f8] ss:$40 sps:$4 sm:$0xff]   ;;  %v11840_v62 = vld [vmem:[%s16779_s3 + $0x1054] ss:$40 sps:$4 sm:$0xff]  }
 0x37c   : > { %8030 = vmatpush1.bf16.msra.mxu1 %v11808_v13  ;;  %v15327_v13 = vld [vmem:[%s16780_s4] sm:$0xff] }
 0x37d   : > { %8176 = vmatpush1.bf16.msra.mxu0 %v11811_v32  ;;  %8042 = vmatprep.subr.bf16.mxu1 %v11816_v48  ;;  %v11843_v32 = vld [vmem:[%s16779_s3 + $0x74c] ss:$40 sps:$4 sm:$0xff]   ;;  %v11838_v48 = vld [vmem:[%s16779_s3 + $0x1050] ss:$40 sps:$4 sm:$0xff]  }
 0x37e   : > { %8177 = vmatprep.subr.bf16.mxu0 %v11819_v63  ;;  %v3436_v63 = vrot.slane %v15327_v13, %v13297_v39 }
 0x37f   : > { %8032 = vmatmul.mubr.bf16.vlgmr.msra.gmra.mrb[72].mxu1 %v14246_v5 }
 0x380   : > { %8043 = vmatpush1.bf16.msra.mxu1 %v11814_v0  ;;  %8074 = vmatprep.mubr.bf16.mxu1 %v14258_v51  ;;  %v11841_v0 = vld [vmem:[%s16779_s3 + $0x748] ss:$40 sps:$4 sm:$0xff]  }
 0x381   : > { %8178 = vmatpush1.bf16.msra.mxu0 %v11817_v61  ;;  %8044 = vmatprep.subr.bf16.mxu1 %v11822_v59  ;;  %v11846_v61 = vld [vmem:[%s16779_s3 + $0x10a4] ss:$40 sps:$4 sm:$0xff]   ;;  %v3440_v59 = vrot.slane %v15327_v13, %v13300_v41 }
 0x382   : > { %8179 = vmatprep.subr.bf16.mxu0 %v11825_v30  ;;  %v11849_v30 = vld [vmem:[%s16779_s3 + $0x79c] ss:$40 sps:$4 sm:$0xff]  }
 0x384   : > { %8045 = vmatpush1.bf16.msra.mxu1 %v11820_v35  ;;  %v11844_v35 = vld [vmem:[%s16779_s3 + $0x10a0] ss:$40 sps:$4 sm:$0xff]  }
 0x385   : > { %8180 = vmatpush1.bf16.msra.mxu0 %v11823_v15  ;;  %8046 = vmatprep.subr.bf16.mxu1 %v11828_v40  ;;  %v7518_v15 = vadd.f32 %v14719_v12, %v3436_v63  ;;  %v11847_v40 = vld [vmem:[%s16779_s3 + $0x798] ss:$40 sps:$4 sm:$0xff]   ;;  %v7522_v12 = vadd.f32 %v14726_v43, %v3436_v63 }
 0x386   : > { %8181 = vmatprep.subr.bf16.mxu0 %v11831_v36  ;;  %v11852_v36 = vld [vmem:[%s16779_s3 + $0x10f4] ss:$40 sps:$4 sm:$0xff]  }
 0x388   : > { %8047 = vmatpush1.bf16.msra.mxu1 %v11826_v18  ;;  %v7520_v18 = vadd.f32 %v14721_v34, %v3440_v59  ;;  %v11850_v34 = vld [vmem:[%s16779_s3 + $0x10f0] ss:$40 sps:$4 sm:$0xff]  }
 0x389   : > { %8182 = vmatpush1.bf16.msra.mxu0 %v11829_v10  ;;  %8048 = vmatprep.subr.bf16.mxu1 %v11834_v45  ;;  %v11855_v45 = vld [vmem:[%s16779_s3 + $0x7ec] ss:$40 sps:$4 sm:$0xff]  }
 0x38a   : > { %8183 = vmatprep.subr.bf16.mxu0 %v11837_v53 }
 0x38c   : > { %8049 = vmatpush1.bf16.msra.mxu1 %v11832_v1 }
 0x38d   : > { %8184 = vmatpush1.bf16.msra.mxu0 %v11835_v6  ;;  %8050 = vmatprep.subr.bf16.mxu1 %v11840_v62  ;;  %v7524_v6 = vadd.f32 %v14734_v26, %v3440_v59  ;;  %v11858_v26 = vld [vmem:[%s16779_s3 + $0x1144] ss:$40 sps:$4 sm:$0xff]  }
 0x38e   : > { %8185 = vmatprep.subr.bf16.mxu0 %v11843_v32 }
 0x390   : > { %8051 = vmatpush1.bf16.msra.mxu1 %v11838_v48  ;;  %v11853_v48 = vld [vmem:[%s16779_s3 + $0x7e8] ss:$40 sps:$4 sm:$0xff]  }
 0x391   : > { %8186 = vmatpush1.bf16.msra.mxu0 %v11841_v0  ;;  %8052 = vmatprep.subr.bf16.mxu1 %v11846_v61 }
 0x392   : > { %v7689_v10 = vpop.f32.mrb[68].mxu1  ;;  %8187 = vmatprep.subr.bf16.mxu0 %v11849_v30  ;;  %v11861_v30 = vld [vmem:[%s16779_s3 + $0x83c] ss:$40 sps:$4 sm:$0xff]  }
 0x393   : > { %v15363_v53 = vadd.f32 %v7689_v10, %v7518_v15  ;;  %v7691_v1 = vpop.f32.mrb[69].mxu1  ;;  %v11867_v10 = vld [vmem:[%s16779_s3 + $0x88c] ss:$40 sps:$4 sm:$0xff]  }
 0x394   : > { %v15366_v62 = vadd.f32 %v7691_v1, %v7520_v18  ;;  %v7693_v32 = vpop.f32.mrb[70].mxu1  ;;  %8053 = vmatpush1.bf16.msra.mxu1 %v11844_v35  ;;  %v11864_v18 = vld [vmem:[%s16779_s3 + $0x1194] ss:$40 sps:$4 sm:$0xff]   ;;  %v11870_v1 = vld [vmem:[%s16779_s3 + $0x11e4] ss:$40 sps:$4 sm:$0xff]  }
 0x395   : > { %v10721_v0 = vmul.f32 -1.442695, %v15363_v53  ;;  %v15375_v43 = vadd.f32 %v7693_v32, %v7522_v12  ;;  %v7695_v63 = vpop.f32.mrb[71].mxu1  ;;  %8188 = vmatpush1.bf16.msra.mxu0 %v11847_v40  ;;  %8054 = vmatprep.subr.bf16.mxu1 %v11852_v36  ;;  %v11856_v40 = vld [vmem:[%s16779_s3 + $0x1140] ss:$40 sps:$4 sm:$0xff]  }
 0x396   : > { %v10722_v61 = vmul.f32 -1.442695, %v15366_v62  ;;  %v15381_v59 = vadd.f32 %v7695_v63, %v7524_v6  ;;  %8189 = vmatprep.subr.bf16.mxu0 %v11855_v45  ;;  %v11859_v36 = vld [vmem:[%s16779_s3 + $0x838] ss:$40 sps:$4 sm:$0xff]   ;;  %v11865_v12 = vld [vmem:[%s16779_s3 + $0x888] ss:$40 sps:$4 sm:$0xff]  }
 0x397   : > { %12421 = vpow2.f32 %v10721_v0  ;;  %v10731_v35 = vmul.f32 -1.442695, %v15375_v43  ;;  %v11862_v45 = vld [vmem:[%s16779_s3 + $0x1190] ss:$40 sps:$4 sm:$0xff]   ;;  %v11873_v6 = vld [vmem:[%s16779_s3 + $0x8dc] ss:$40 sps:$4 sm:$0xff]  }
 0x398   : > { %12423 = vpow2.f32 %v10722_v61  ;;  %v10732_v15 = vmul.f32 -1.442695, %v15381_v59  ;;  %8055 = vmatpush1.bf16.msra.mxu1 %v11850_v34  ;;  %v11868_v32 = vld [vmem:[%s16779_s3 + $0x11e0] ss:$40 sps:$4 sm:$0xff]   ;;  %v11876_v0 = vld [vmem:[%s16779_s3 + $0x1234] ss:$40 sps:$4 sm:$0xff]  }
 0x399   : > { %12425 = vpow2.f32 %v10731_v35  ;;  %8190 = vmatpush1.bf16.msra.mxu0 %v11853_v48  ;;  %8056 = vmatprep.subr.bf16.mxu1 %v11858_v26  ;;  %v11871_v48 = vld [vmem:[%s16779_s3 + $0x8d8] ss:$40 sps:$4 sm:$0xff]   ;;  %v11879_v61 = vld [vmem:[%s16779_s3 + $0x92c] ss:$40 sps:$4 sm:$0xff]  }
 0x39a   : > { %12427 = vpow2.f32 %v10732_v15  ;;  %8191 = vmatprep.subr.bf16.mxu0 %v11861_v30 }
 0x39c   : > { %8057 = vmatpush1.bf16.msra.mxu1 %v11856_v40 }
 0x39d   : > { %8192 = vmatpush1.bf16.msra.mxu0 %v11859_v36  ;;  %8058 = vmatprep.subr.bf16.mxu1 %v11864_v18  ;;  %v11874_v36 = vld [vmem:[%s16779_s3 + $0x1230] ss:$40 sps:$4 sm:$0xff]  }
 0x39e   : > { %8193 = vmatprep.subr.bf16.mxu0 %v11867_v10  ;;  %v11877_v10 = vld [vmem:[%s16779_s3 + $0x928] ss:$40 sps:$4 sm:$0xff]  }
 0x3a0   : > { %8059 = vmatpush1.bf16.msra.mxu1 %v11862_v45  ;;  %v11882_v45 = vld [vmem:[%s16779_s3 + $0x1284] ss:$40 sps:$4 sm:$0xff]  }
 0x3a1   : > { %v12422_v34 = vpop.eup %12421  ;;  %8194 = vmatpush1.bf16.msra.mxu0 %v11865_v12  ;;  %8060 = vmatprep.subr.bf16.mxu1 %v11870_v1  ;;  %v11885_v12 = vld [vmem:[%s16779_s3 + $0x97c] ss:$40 sps:$4 sm:$0xff]   ;;  %v11880_v1 = vld [vmem:[%s16779_s3 + $0x1280] ss:$40 sps:$4 sm:$0xff]  }
 0x3a2   : > { %v12424_v63 = vpop.eup %12423  ;;  %v8618_v26 = vadd.f32 1.0, %v12422_v34  ;;  %8195 = vmatprep.subr.bf16.mxu0 %v11873_v6  ;;  %v11883_v6 = vld [vmem:[%s16779_s3 + $0x978] ss:$40 sps:$4 sm:$0xff]   ;;  %v11891_v34 = vld [vmem:[%s16779_s3 + $0x9cc] ss:$40 sps:$4 sm:$0xff]  }
 0x3a3   : > { %v12426_v30 = vpop.eup %12425  ;;  %v8619_v35 = vadd.f32 1.0, %v12424_v63  ;;  %v11894_v63 = vld [vmem:[%s16779_s3 + $0x1324] ss:$40 sps:$4 sm:$0xff]  }
 0x3a4   : > { %v12428_v15 = vpop.eup %12427  ;;  %12429 = vrcp.f32 %v8618_v26  ;;  %v8628_v40 = vadd.f32 1.0, %v12426_v30  ;;  %8061 = vmatpush1.bf16.msra.mxu1 %v11868_v32  ;;  %v11888_v32 = vld [vmem:[%s16779_s3 + $0x12d4] ss:$40 sps:$4 sm:$0xff]  }
 0x3a5   : > { %12431 = vrcp.f32 %v8619_v35  ;;  %v8629_v18 = vadd.f32 1.0, %v12428_v15  ;;  %8196 = vmatpush1.bf16.msra.mxu0 %v11871_v48  ;;  %8062 = vmatprep.subr.bf16.mxu1 %v11876_v0  ;;  %v11886_v48 = vld [vmem:[%s16779_s3 + $0x12d0] ss:$40 sps:$4 sm:$0xff]  }
 0x3a6   : > { %12433 = vrcp.f32 %v8628_v40  ;;  %8197 = vmatprep.subr.bf16.mxu0 %v11879_v61  ;;  %v11889_v0 = vld [vmem:[%s16779_s3 + $0x9c8] ss:$40 sps:$4 sm:$0xff]   ;;  %v11897_v61 = vld [vmem:[%s16779_s3 + $0xa1c] ss:$40 sps:$4 sm:$0xff]  }
 0x3a7   : > { %12435 = vrcp.f32 %v8629_v18  ;;  %v11892_v40 = vld [vmem:[%s16779_s3 + $0x1320] ss:$40 sps:$4 sm:$0xff]  }
 0x3a8   : > { %8063 = vmatpush1.bf16.msra.mxu1 %v11874_v36  ;;  %v11895_v36 = vld [vmem:[%s16779_s3 + $0xa18] ss:$40 sps:$4 sm:$0xff]  }
 0x3a9   : > { %8198 = vmatpush1.bf16.msra.mxu0 %v11877_v10  ;;  %8064 = vmatprep.subr.bf16.mxu1 %v11882_v45  ;;  %v8678_v45 = vmax.f32 %v15363_v53, 0.0  ;;  %v11903_v53 = vld [vmem:[%s16779_s3 + $0xa6c] ss:$40 sps:$4 sm:$0xff]  }
 0x3aa   : > { %8199 = vmatprep.subr.bf16.mxu0 %v11885_v12 }
 0x3ac   : > { %8065 = vmatpush1.bf16.msra.mxu1 %v11880_v1  ;;  %v8688_v1 = vmax.f32 %v15375_v43, 0.0 }
 0x3ad   : > { %8200 = vmatpush1.bf16.msra.mxu0 %v11883_v6  ;;  %8066 = vmatprep.subr.bf16.mxu1 %v11888_v32  ;;  %v11900_v32 = vld [vmem:[%s16779_s3 + $0x1374] ss:$40 sps:$4 sm:$0xff]  }
 0x3ae   : > { %v12430_v26 = vpop.eup %12429  ;;  %8201 = vmatprep.subr.bf16.mxu0 %v11891_v34  ;;  %v8679_v34 = vmax.f32 %v15366_v62, 0.0  ;;  %v11898_v62 = vld [vmem:[%s16779_s3 + $0x1370] ss:$40 sps:$4 sm:$0xff]  }
 0x3af   : > { %v12432_v30 = vpop.eup %12431  ;;  %v8718_v35 = vsub.f32 1.0, %v12430_v26  ;;  %v8698_v43 = vmul.f32 %v12430_v26, %v8678_v45  ;;  %v11913_v45 = vld [vmem:[%s16779_s3 + $0xb08] ss:$40 sps:$4 sm:$0xff]  }
 0x3b0   : > { %v12434_v15 = vpop.eup %12433  ;;  %8067 = vmatpush1.bf16.msra.mxu1 %v11886_v48  ;;  %v8719_v18 = vsub.f32 1.0, %v12432_v30  ;;  %v8689_v48 = vmax.f32 %v15381_v59, 0.0 }
 0x3b1   : > { %v12436_v10 = vpop.eup %12435  ;;  %v8738_v12 = vmul.f32 %v8718_v35, %v13962_v58  ;;  %v8728_v6 = vsub.f32 1.0, %v12434_v15  ;;  %8202 = vmatpush1.bf16.msra.mxu0 %v11889_v0  ;;  %8068 = vmatprep.subr.bf16.mxu1 %v11894_v63  ;;  %v8708_v35 = vmul.f32 %v12434_v15, %v8688_v1  ;;  %v8699_v63 = vmul.f32 %v12432_v30, %v8679_v34  ;;  %v11904_v15 = vld [vmem:[%s16779_s3 + $0x13c0] ss:$40 sps:$4 sm:$0xff]   ;;  %v11921_v1 = vld [vmem:[%s16779_s3 + $0xb5c] ss:$40 sps:$4 sm:$0xff]  }
 0x3b2   : > { %8214 = vmatprep.subr.bf16.mxu0 %v11897_v61  ;;  %v8729_v60 = vsub.f32 1.0, %v12436_v10  ;;  %v8739_v58 = vmul.f32 %v8719_v18, %v13964_v38  ;;  %v8709_v55 = vmul.f32 %v12436_v10, %v8689_v48  ;;  %v11901_v38 = vld [vmem:[%s16779_s3 + $0xa68] ss:$40 sps:$4 sm:$0xff]   ;;  %v11915_v18 = vld [vmem:[%s16779_s3 + $0xb0c] ss:$40 sps:$4 sm:$0xff]  }
 0x3b3   : > { %v8748_v0 = vmul.f32 %v8728_v6, %v13966_v56  ;;  %v15484_v61 = vadd.f32 %v8738_v12, %v8698_v43  ;;  %v11906_v56 = vld [vmem:[%s16779_s3 + $0x13c4] ss:$40 sps:$4 sm:$0xff]   ;;  %v11910_v10 = vld [vmem:[%s16779_s3 + $0x1410] ss:$40 sps:$4 sm:$0xff]   ;;  %v11916_v6 = vld [vmem:[%s16779_s3 + $0x1460] ss:$40 sps:$4 sm:$0xff]  }
 0x3b4   : > { %8069 = vmatpush1.bf16.msra.mxu1 %v11892_v40  ;;  %8204 = vmatmul.mubr.bf16.vlgmr.msra.gmra.mrb[80].mxu0 %v14020_v14  ;;  %v8749_v59 = vmul.f32 %v8729_v60, %v13968_v25  ;;  %v11909_v25 = vld [vmem:[%s16779_s3 + $0xabc] ss:$40 sps:$4 sm:$0xff]   ;;  %v15498_v60 = vadd.f32 %v8739_v58, %v8699_v63  ;;  %v11927_v48 = vld [vmem:[%s16779_s3 + $0xbac] ss:$40 sps:$4 sm:$0xff]   ;;  %v11925_v58 = vld [vmem:[%s16779_s3 + $0xba8] ss:$40 sps:$4 sm:$0xff]  }
 0x3b5   : > { %v15486_v4 = vadd.f32 %v8748_v0, %v8708_v35  ;;  %8215 = vmatpush1.bf16.msra.mxu0 %v11895_v36  ;;  %8246 = vmatprep.mubr.bf16.mxu0 %v14030_v33  ;;  %v11907_v36 = vld [vmem:[%s16779_s3 + $0xab8] ss:$40 sps:$4 sm:$0xff]   ;;  %v11918_v12 = vld [vmem:[%s16779_s3 + $0x1464] ss:$40 sps:$4 sm:$0xff]   ;;  %v11924_v34 = vld [vmem:[%s16779_s3 + $0x14b4] ss:$40 sps:$4 sm:$0xff]  }
 0x3b6   : > { %8070 = vmatprep.subr.bf16.mxu1 %v11900_v32  ;;  %8216 = vmatprep.subr.bf16.mxu0 %v11903_v53  ;;  %v15500_v26 = vadd.f32 %v8749_v59, %v8709_v55  ;;  %v11912_v55 = vld [vmem:[%s16779_s3 + $0x1414] ss:$40 sps:$4 sm:$0xff]   ;;  %v11919_v32 = vld [vmem:[%s16779_s3 + $0xb58] ss:$40 sps:$4 sm:$0xff]   ;;  %v11930_v43 = vld [vmem:[%s16779_s3 + $0x1504] ss:$40 sps:$4 sm:$0xff]  }
 0x3b7   : > { %v8778_v30 = vpack.c.bf16 %v15486_v4, %v15484_v61  ;;  %v11922_v53 = vld [vmem:[%s16779_s3 + $0x14b0] ss:$40 sps:$4 sm:$0xff]   ;;  %v11933_v35 = vld [vmem:[%s16779_s3 + $0xbfc] ss:$40 sps:$4 sm:$0xff]   ;;  %v11928_v0 = vld [vmem:[%s16779_s3 + $0x1500] ss:$40 sps:$4 sm:$0xff]  }
 0x3b8   : > { %8071 = vmatpush1.bf16.msra.mxu1 %v11898_v62  ;;  %v8779_v40 = vpack.c.bf16 %v15500_v26, %v15498_v60  ;;  %v11931_v63 = vld [vmem:[%s16779_s3 + $0xbf8] ss:$40 sps:$4 sm:$0xff]   ;;  %v11936_v62 = vld [vmem:[%s16779_s3 + $0x1554] ss:$40 sps:$4 sm:$0xff]  }
 0x3b9   : > { %8217 = vmatpush1.bf16.msra.mxu0 %v11901_v38  ;;  %8072 = vmatprep.subr.bf16.mxu1 %v11906_v56  ;;  %v11939_v59 = vld [vmem:[%s16779_s3 + $0xc4c] ss:$40 sps:$4 sm:$0xff]   ;;  %v11934_v38 = vld [vmem:[%s16779_s3 + $0x1550] ss:$40 sps:$4 sm:$0xff]  }
 0x3ba   : > { %8218 = vmatprep.subr.bf16.mxu0 %v11909_v25  ;;  %v11937_v56 = vld [vmem:[%s16779_s3 + $0xc48] ss:$40 sps:$4 sm:$0xff]   ;;  %v11942_v25 = vld [vmem:[%s16779_s3 + $0x15a4] ss:$40 sps:$4 sm:$0xff]  }
 0x3bb   : > { %v12190_v60 = vld [vmem:[%s16779_s3 + $0x9d0] ss:$40 sps:$4 sm:$0xff]  }
 0x3bc   : > { %8073 = vmatpush1.bf16.msra.mxu1 %v11904_v15  ;;  %v11945_v15 = vld [vmem:[%s16779_s3 + $0xc9c] ss:$40 sps:$4 sm:$0xff]   ;;  %v12194_v26 = vld [vmem:[%s16781_s5 + $0x10] sm:$0xff]  }
 0x3bd   : > { %8219 = vmatpush1.bf16.msra.mxu0 %v11907_v36  ;;  %8085 = vmatprep.subr.bf16.mxu1 %v11912_v55  ;;  %v11940_v36 = vld [vmem:[%s16779_s3 + $0x15a0] ss:$40 sps:$4 sm:$0xff]   ;;  %v12233_v4 = vld [vmem:[%s16781_s5 + $0xd0] sm:$0xff]  }
 0x3be   : > { %8220 = vmatprep.subr.bf16.mxu0 %v11915_v18  ;;  %v11943_v55 = vld [vmem:[%s16779_s3 + $0xc98] ss:$40 sps:$4 sm:$0xff]   ;;  %v11948_v18 = vld [vmem:[%s16779_s3 + $0x15f4] ss:$40 sps:$4 sm:$0xff]  }
 0x3bf   : > { %8075 = vmatmul.mubr.bf16.vlgmr.msra.gmra.mrb[72].mxu1 %v14466_v24  ;;  %v12230_v61 = vld [vmem:[%s16779_s3 + $0xc50] ss:$40 sps:$4 sm:$0xff]  }
 0x3c0   : > { %8086 = vmatpush1.bf16.msra.mxu1 %v11910_v10  ;;  %8117 = vmatprep.mubr.bf16.mxu1 %v14478_v29  ;;  %v11951_v10 = vld [vmem:[%s16779_s3 + $0xcec] ss:$40 sps:$4 sm:$0xff]  }
 0x3c1   : > { %8221 = vmatpush1.bf16.msra.mxu0 %v11913_v45  ;;  %8087 = vmatprep.subr.bf16.mxu1 %v11918_v12  ;;  %v11946_v45 = vld [vmem:[%s16779_s3 + $0x15f0] ss:$40 sps:$4 sm:$0xff]  }
 0x3c2   : > { %8222 = vmatprep.subr.bf16.mxu0 %v11921_v1  ;;  %v11949_v12 = vld [vmem:[%s16779_s3 + $0xce8] ss:$40 sps:$4 sm:$0xff]   ;;  %v11954_v1 = vld [vmem:[%s16779_s3 + $0x1644] ss:$40 sps:$4 sm:$0xff]  }
 0x3c4   : > { %8088 = vmatpush1.bf16.msra.mxu1 %v11916_v6  ;;  %v11957_v6 = vld [vmem:[%s16779_s3 + $0xd3c] ss:$40 sps:$4 sm:$0xff]  }
 0x3c5   : > { %8223 = vmatpush1.bf16.msra.mxu0 %v11919_v32  ;;  %8089 = vmatprep.subr.bf16.mxu1 %v11924_v34  ;;  %v11952_v32 = vld [vmem:[%s16779_s3 + $0x1640] ss:$40 sps:$4 sm:$0xff]  }
 0x3c6   : > { %8224 = vmatprep.subr.bf16.mxu0 %v11927_v48  ;;  %v11955_v34 = vld [vmem:[%s16779_s3 + $0xd38] ss:$40 sps:$4 sm:$0xff]   ;;  %v11960_v48 = vld [vmem:[%s16779_s3 + $0x1694] ss:$40 sps:$4 sm:$0xff]  }
 0x3c8   : > { %8090 = vmatpush1.bf16.msra.mxu1 %v11922_v53  ;;  %v11963_v53 = vld [vmem:[%s16779_s3 + $0xd8c] ss:$40 sps:$4 sm:$0xff]  }
 0x3c9   : > { %8225 = vmatpush1.bf16.msra.mxu0 %v11925_v58  ;;  %8091 = vmatprep.subr.bf16.mxu1 %v11930_v43  ;;  %v11958_v58 = vld [vmem:[%s16779_s3 + $0x1690] ss:$40 sps:$4 sm:$0xff]  }
 0x3ca   : > { %8226 = vmatprep.subr.bf16.mxu0 %v11933_v35  ;;  %v11961_v43 = vld [vmem:[%s16779_s3 + $0xd88] ss:$40 sps:$4 sm:$0xff]   ;;  %v11966_v35 = vld [vmem:[%s16779_s3 + $0x16e4] ss:$40 sps:$4 sm:$0xff]  }
 0x3cc   : > { %8092 = vmatpush1.bf16.msra.mxu1 %v11928_v0  ;;  %v11969_v0 = vld [vmem:[%s16779_s3 + $0xddc] ss:$40 sps:$4 sm:$0xff]  }
 0x3cd   : > { %8227 = vmatpush1.bf16.msra.mxu0 %v11931_v63  ;;  %8093 = vmatprep.subr.bf16.mxu1 %v11936_v62  ;;  %v11964_v63 = vld [vmem:[%s16779_s3 + $0x16e0] ss:$40 sps:$4 sm:$0xff]  }
 0x3ce   : > { %8228 = vmatprep.subr.bf16.mxu0 %v11939_v59  ;;  %v11967_v62 = vld [vmem:[%s16779_s3 + $0xdd8] ss:$40 sps:$4 sm:$0xff]   ;;  %v11972_v59 = vld [vmem:[%s16779_s3 + $0x1734] ss:$40 sps:$4 sm:$0xff]  }
 0x3d0   : > { %8094 = vmatpush1.bf16.msra.mxu1 %v11934_v38  ;;  %v11975_v38 = vld [vmem:[%s16779_s3 + $0xe2c] ss:$40 sps:$4 sm:$0xff]  }
 0x3d1   : > { %8229 = vmatpush1.bf16.msra.mxu0 %v11937_v56  ;;  %8095 = vmatprep.subr.bf16.mxu1 %v11942_v25  ;;  %v11970_v56 = vld [vmem:[%s16779_s3 + $0x1730] ss:$40 sps:$4 sm:$0xff]  }
 0x3d2   : > { %8230 = vmatprep.subr.bf16.mxu0 %v11945_v15  ;;  %v11973_v25 = vld [vmem:[%s16779_s3 + $0xe28] ss:$40 sps:$4 sm:$0xff]   ;;  %v11978_v15 = vld [vmem:[%s16779_s3 + $0x1784] ss:$40 sps:$4 sm:$0xff]  }
 0x3d4   : > { %8096 = vmatpush1.bf16.msra.mxu1 %v11940_v36  ;;  %v11981_v36 = vld [vmem:[%s16779_s3 + $0xe7c] ss:$40 sps:$4 sm:$0xff]  }
 0x3d5   : > { %8231 = vmatpush1.bf16.msra.mxu0 %v11943_v55  ;;  %8097 = vmatprep.subr.bf16.mxu1 %v11948_v18  ;;  %v11976_v55 = vld [vmem:[%s16779_s3 + $0x1780] ss:$40 sps:$4 sm:$0xff]  }
 0x3d6   : > { %8232 = vmatprep.subr.bf16.mxu0 %v11951_v10  ;;  %v11979_v18 = vld [vmem:[%s16779_s3 + $0xe78] ss:$40 sps:$4 sm:$0xff]   ;;  %v11984_v10 = vld [vmem:[%s16779_s3 + $0x17d4] ss:$40 sps:$4 sm:$0xff]  }
 0x3d8   : > { %8098 = vmatpush1.bf16.msra.mxu1 %v11946_v45  ;;  %v11987_v45 = vld [vmem:[%s16779_s3 + $0xecc] ss:$40 sps:$4 sm:$0xff]  }
 0x3d9   : > { %8233 = vmatpush1.bf16.msra.mxu0 %v11949_v12  ;;  %8099 = vmatprep.subr.bf16.mxu1 %v11954_v1  ;;  %v11982_v12 = vld [vmem:[%s16779_s3 + $0x17d0] ss:$40 sps:$4 sm:$0xff]  }
 0x3da   : > { %8234 = vmatprep.subr.bf16.mxu0 %v11957_v6  ;;  %v11985_v1 = vld [vmem:[%s16779_s3 + $0xec8] ss:$40 sps:$4 sm:$0xff]   ;;  %v11990_v6 = vld [vmem:[%s16779_s3 + $0x1824] ss:$40 sps:$4 sm:$0xff]  }
 0x3dc   : > { %8100 = vmatpush1.bf16.msra.mxu1 %v11952_v32  ;;  %v11993_v32 = vld [vmem:[%s16779_s3 + $0xf1c] ss:$40 sps:$4 sm:$0xff]  }
 0x3dd   : > { %8235 = vmatpush1.bf16.msra.mxu0 %v11955_v34  ;;  %8101 = vmatprep.subr.bf16.mxu1 %v11960_v48  ;;  %v11988_v34 = vld [vmem:[%s16779_s3 + $0x1820] ss:$40 sps:$4 sm:$0xff]  }
 0x3de   : > { %8236 = vmatprep.subr.bf16.mxu0 %v11963_v53  ;;  %v11991_v48 = vld [vmem:[%s16779_s3 + $0xf18] ss:$40 sps:$4 sm:$0xff]   ;;  %v11996_v53 = vld [vmem:[%s16779_s3 + $0x1874] ss:$40 sps:$4 sm:$0xff]  }
 0x3e0   : > { %8102 = vmatpush1.bf16.msra.mxu1 %v11958_v58  ;;  %v11999_v58 = vld [vmem:[%s16779_s3 + $0xf6c] ss:$40 sps:$4 sm:$0xff]  }
 0x3e1   : > { %8237 = vmatpush1.bf16.msra.mxu0 %v11961_v43  ;;  %8103 = vmatprep.subr.bf16.mxu1 %v11966_v35  ;;  %v11994_v43 = vld [vmem:[%s16779_s3 + $0x1870] ss:$40 sps:$4 sm:$0xff]  }
 0x3e2   : > { %8238 = vmatprep.subr.bf16.mxu0 %v11969_v0  ;;  %v11997_v35 = vld [vmem:[%s16779_s3 + $0xf68] ss:$40 sps:$4 sm:$0xff]   ;;  %v12002_v0 = vld [vmem:[%s16779_s3 + $0x18c4] ss:$40 sps:$4 sm:$0xff]  }
 0x3e4   : > { %8104 = vmatpush1.bf16.msra.mxu1 %v11964_v63  ;;  %v12005_v63 = vld [vmem:[%s16779_s3 + $0xfbc] ss:$40 sps:$4 sm:$0xff]  }
 0x3e5   : > { %8239 = vmatpush1.bf16.msra.mxu0 %v11967_v62  ;;  %8105 = vmatprep.subr.bf16.mxu1 %v11972_v59  ;;  %v12000_v62 = vld [vmem:[%s16779_s3 + $0x18c0] ss:$40 sps:$4 sm:$0xff]  }
 0x3e6   : > { %8240 = vmatprep.subr.bf16.mxu0 %v11975_v38  ;;  %v12003_v59 = vld [vmem:[%s16779_s3 + $0xfb8] ss:$40 sps:$4 sm:$0xff]   ;;  %v12008_v38 = vld [vmem:[%s16779_s3 + $0x24] ss:$40 sps:$4 sm:$0xff]  }
 0x3e8   : > { %8106 = vmatpush1.bf16.msra.mxu1 %v11970_v56  ;;  %v12011_v56 = vld [vmem:[%s16779_s3 + $0x100c] ss:$40 sps:$4 sm:$0xff]  }
 0x3e9   : > { %8241 = vmatpush1.bf16.msra.mxu0 %v11973_v25  ;;  %8107 = vmatprep.subr.bf16.mxu1 %v11978_v15  ;;  %v12006_v25 = vld [vmem:[%s16779_s3 + $0x20] ss:$40 sps:$4 sm:$0xff]  }
 0x3ea   : > { %8242 = vmatprep.subr.bf16.mxu0 %v11981_v36  ;;  %v12009_v15 = vld [vmem:[%s16779_s3 + $0x1008] ss:$40 sps:$4 sm:$0xff]   ;;  %v12014_v36 = vld [vmem:[%s16779_s3 + $0x74] ss:$40 sps:$4 sm:$0xff]  }
 0x3ec   : > { %8108 = vmatpush1.bf16.msra.mxu1 %v11976_v55  ;;  %v12017_v55 = vld [vmem:[%s16779_s3 + $0x105c] ss:$40 sps:$4 sm:$0xff]  }
 0x3ed   : > { %8243 = vmatpush1.bf16.msra.mxu0 %v11979_v18  ;;  %8109 = vmatprep.subr.bf16.mxu1 %v11984_v10  ;;  %v12012_v18 = vld [vmem:[%s16779_s3 + $0x70] ss:$40 sps:$4 sm:$0xff]  }
 0x3ee   : > { %8244 = vmatprep.subr.bf16.mxu0 %v11987_v45  ;;  %v12015_v10 = vld [vmem:[%s16779_s3 + $0x1058] ss:$40 sps:$4 sm:$0xff]   ;;  %v12020_v45 = vld [vmem:[%s16779_s3 + $0xc4] ss:$40 sps:$4 sm:$0xff]  }
 0x3f0   : > { %8110 = vmatpush1.bf16.msra.mxu1 %v11982_v12  ;;  %v12023_v12 = vld [vmem:[%s16779_s3 + $0x10ac] ss:$40 sps:$4 sm:$0xff]  }
 0x3f1   : > { %8245 = vmatpush1.bf16.msra.mxu0 %v11985_v1  ;;  %8111 = vmatprep.subr.bf16.mxu1 %v11990_v6  ;;  %v12018_v6 = vld [vmem:[%s16779_s3 + $0xc0] ss:$40 sps:$4 sm:$0xff]  }
 0x3f2   : > { %8257 = vmatprep.subr.bf16.mxu0 %v11993_v32  ;;  %v16800_v32 = vsub.s32 3, %v13089_v7 }
 0x3f4   : > { %8112 = vmatpush1.bf16.msra.mxu1 %v11988_v34  ;;  %8247 = vmatmul.mubr.bf16.vlgmr.msra.gmra.mrb[80].mxu0 %v14246_v5  ;;  %v3448_v34 = vrot.slane %v15327_v13, %v16800_v32  ;;  %v12036_v32 = vld [vmem:[%s16779_s3 + $0x1b0] ss:$40 sps:$4 sm:$0xff]  }
 0x3f5   : > { %8258 = vmatpush1.bf16.msra.mxu0 %v11991_v48  ;;  %8289 = vmatprep.mubr.bf16.mxu0 %v14258_v51  ;;  %v12021_v48 = vld [vmem:[%s16779_s3 + $0x10a8] ss:$40 sps:$4 sm:$0xff]  }
 0x3f6   : > { %8113 = vmatprep.subr.bf16.mxu1 %v11996_v53  ;;  %8259 = vmatprep.subr.bf16.mxu0 %v11999_v58  ;;  %v12026_v53 = vld [vmem:[%s16779_s3 + $0x114] ss:$40 sps:$4 sm:$0xff]  }
 0x3f7   : > { %v12029_v58 = vld [vmem:[%s16779_s3 + $0x10fc] ss:$40 sps:$4 sm:$0xff]  }
 0x3f8   : > { %8114 = vmatpush1.bf16.msra.mxu1 %v11994_v43 }
 0x3f9   : > { %8260 = vmatpush1.bf16.msra.mxu0 %v11997_v35  ;;  %8115 = vmatprep.subr.bf16.mxu1 %v12002_v0 }
 0x3fa   : > { %8261 = vmatprep.subr.bf16.mxu0 %v12005_v63 }
 0x3fc   : > { %8116 = vmatpush1.bf16.msra.mxu1 %v12000_v62 }
 0x3fd   : > { %8262 = vmatpush1.bf16.msra.mxu0 %v12003_v59  ;;  %8343 = vmatprep.subr.bf16.mxu1 %v12008_v38  ;;  %v12027_v59 = vld [vmem:[%s16779_s3 + $0x10f8] ss:$40 sps:$4 sm:$0xff]   ;;  %v12032_v38 = vld [vmem:[%s16779_s3 + $0x164] ss:$40 sps:$4 sm:$0xff]  }
 0x3fe   : > { %8263 = vmatprep.subr.bf16.mxu0 %v12011_v56 }
 0x3ff   : > { %8118 = vmatmul.mubr.bf16.vlgmr.msra.gmra.mrb[72].mxu1 %v14682_v9 }
 0x400   : > { %8344 = vmatpush1.bf16.msra.mxu1 %v12006_v25  ;;  %8375 = vmatprep.mubr.bf16.mxu1 %v13972_v28  ;;  %v16799_v28 = vsub.s32 2, %v13089_v7 }
 0x401   : > { %8264 = vmatpush1.bf16.msra.mxu0 %v12009_v15  ;;  %8345 = vmatprep.subr.bf16.mxu1 %v12014_v36  ;;  %v12035_v36 = vld [vmem:[%s16779_s3 + $0x114c] ss:$40 sps:$4 sm:$0xff]  }
 0x402   : > { %8265 = vmatprep.subr.bf16.mxu0 %v12017_v55  ;;  %v3444_v1 = vrot.slane %v15327_v13, %v16799_v28  ;;  %v12024_v13 = vld [vmem:[%s16779_s3 + $0x110] ss:$40 sps:$4 sm:$0xff]  }
 0x403   : > { %v12033_v28 = vld [vmem:[%s16779_s3 + $0x1148] ss:$40 sps:$4 sm:$0xff]  }
 0x404   : > { %8346 = vmatpush1.bf16.msra.mxu1 %v12012_v18 }
 0x405   : > { %8266 = vmatpush1.bf16.msra.mxu0 %v12015_v10  ;;  %8347 = vmatprep.subr.bf16.mxu1 %v12020_v45  ;;  %v12030_v45 = vld [vmem:[%s16779_s3 + $0x160] ss:$40 sps:$4 sm:$0xff]  }
 0x406   : > { %8267 = vmatprep.subr.bf16.mxu0 %v12023_v12 }
 0x407   : > { %v7904_v43 = vpop.f32.mrb[76].mxu0 }
 0x408   : > { %v15758_v35 = vadd.f32 %v7904_v43, %v3444_v1  ;;  %v7906_v0 = vpop.f32.mrb[77].mxu0  ;;  %8348 = vmatpush1.bf16.msra.mxu1 %v12018_v6  ;;  %v12041_v6 = vld [vmem:[%s16779_s3 + $0x119c] ss:$40 sps:$4 sm:$0xff]   ;;  %v12045_v43 = vld [vmem:[%s16779_s3 + $0x11e8] ss:$40 sps:$4 sm:$0xff]  }
 0x409   : > { %v15763_v63 = vadd.f32 %v7906_v0, %v3448_v34  ;;  %v7908_v62 = vpop.f32.mrb[78].mxu0  ;;  %8268 = vmatpush1.bf16.msra.mxu0 %v12021_v48  ;;  %8349 = vmatprep.subr.bf16.mxu1 %v12026_v53  ;;  %v12044_v48 = vld [vmem:[%s16779_s3 + $0x204] ss:$40 sps:$4 sm:$0xff]   ;;  %v12050_v0 = vld [vmem:[%s16779_s3 + $0x254] ss:$40 sps:$4 sm:$0xff]  }
 0x40a   : > { %v10723_v56 = vmul.f32 -1.442695, %v15758_v35  ;;  %v15772_v25 = vadd.f32 %v7908_v62, %v3444_v1  ;;  %v7910_v15 = vpop.f32.mrb[79].mxu0  ;;  %8269 = vmatprep.subr.bf16.mxu0 %v12029_v58  ;;  %v12038_v1 = vld [vmem:[%s16779_s3 + $0x1b4] ss:$40 sps:$4 sm:$0xff]  }
 0x40b   : > { %v10724_v55 = vmul.f32 -1.442695, %v15763_v63  ;;  %v15778_v18 = vadd.f32 %v7910_v15, %v3448_v34  ;;  %v12039_v34 = vld [vmem:[%s16779_s3 + $0x1198] ss:$40 sps:$4 sm:$0xff]   ;;  %v12047_v53 = vld [vmem:[%s16779_s3 + $0x11ec] ss:$40 sps:$4 sm:$0xff]  }
 0x40c   : > { %12437 = vpow2.f32 %v10723_v56  ;;  %v10733_v10 = vmul.f32 -1.442695, %v15772_v25  ;;  %8350 = vmatpush1.bf16.msra.mxu1 %v12024_v13  ;;  %v12042_v58 = vld [vmem:[%s16779_s3 + $0x200] ss:$40 sps:$4 sm:$0xff]   ;;  %v12053_v62 = vld [vmem:[%s16779_s3 + $0x123c] ss:$40 sps:$4 sm:$0xff]  }
 0x40d   : > { %12439 = vpow2.f32 %v10724_v55  ;;  %v10734_v12 = vmul.f32 -1.442695, %v15778_v18  ;;  %8270 = vmatpush1.bf16.msra.mxu0 %v12027_v59  ;;  %8351 = vmatprep.subr.bf16.mxu1 %v12032_v38 }
 0x40e   : > { %12441 = vpow2.f32 %v10733_v10  ;;  %8271 = vmatprep.subr.bf16.mxu0 %v12035_v36  ;;  %v12048_v36 = vld [vmem:[%s16779_s3 + $0x250] ss:$40 sps:$4 sm:$0xff]  }
 0x40f   : > { %12443 = vpow2.f32 %v10734_v12  ;;  %v12056_v12 = vld [vmem:[%s16779_s3 + $0x2a4] ss:$40 sps:$4 sm:$0xff]  }
 0x410   : > { %8352 = vmatpush1.bf16.msra.mxu1 %v12030_v45  ;;  %v12051_v45 = vld [vmem:[%s16779_s3 + $0x1238] ss:$40 sps:$4 sm:$0xff]  }
 0x411   : > { %8272 = vmatpush1.bf16.msra.mxu0 %v12033_v28  ;;  %8353 = vmatprep.subr.bf16.mxu1 %v12038_v1  ;;  %v12059_v1 = vld [vmem:[%s16779_s3 + $0x128c] ss:$40 sps:$4 sm:$0xff]  }
 0x412   : > { %8273 = vmatprep.subr.bf16.mxu0 %v12041_v6  ;;  %v12054_v6 = vld [vmem:[%s16779_s3 + $0x2a0] ss:$40 sps:$4 sm:$0xff]  }
 0x414   : > { %8354 = vmatpush1.bf16.msra.mxu1 %v12036_v32  ;;  %v12057_v32 = vld [vmem:[%s16779_s3 + $0x1288] ss:$40 sps:$4 sm:$0xff]  }
 0x415   : > { %8274 = vmatpush1.bf16.msra.mxu0 %v12039_v34  ;;  %8355 = vmatprep.subr.bf16.mxu1 %v12044_v48  ;;  %v12062_v34 = vld [vmem:[%s16779_s3 + $0x2f4] ss:$40 sps:$4 sm:$0xff]  }
 0x416   : > { %v12438_v13 = vpop.eup %12437  ;;  %8275 = vmatprep.subr.bf16.mxu0 %v12047_v53  ;;  %v12065_v48 = vld [vmem:[%s16779_s3 + $0x12dc] ss:$40 sps:$4 sm:$0xff]   ;;  %v12060_v53 = vld [vmem:[%s16779_s3 + $0x2f0] ss:$40 sps:$4 sm:$0xff]  }
 0x417   : > { %v12440_v59 = vpop.eup %12439  ;;  %v8620_v38 = vadd.f32 1.0, %v12438_v13 }
 0x418   : > { %v12442_v56 = vpop.eup %12441  ;;  %v8621_v15 = vadd.f32 1.0, %v12440_v59  ;;  %8356 = vmatpush1.bf16.msra.mxu1 %v12042_v58  ;;  %v12063_v58 = vld [vmem:[%s16779_s3 + $0x12d8] ss:$40 sps:$4 sm:$0xff]  }
 0x419   : > { %v12444_v55 = vpop.eup %12443  ;;  %12445 = vrcp.f32 %v8620_v38  ;;  %v8630_v10 = vadd.f32 1.0, %v12442_v56  ;;  %8276 = vmatpush1.bf16.msra.mxu0 %v12045_v43  ;;  %8357 = vmatprep.subr.bf16.mxu1 %v12050_v0  ;;  %v12068_v43 = vld [vmem:[%s16779_s3 + $0x344] ss:$40 sps:$4 sm:$0xff]   ;;  %v12066_v38 = vld [vmem:[%s16779_s3 + $0x340] ss:$40 sps:$4 sm:$0xff]  }
 0x41a   : > { %12447 = vrcp.f32 %v8621_v15  ;;  %v8631_v28 = vadd.f32 1.0, %v12444_v55  ;;  %8277 = vmatprep.subr.bf16.mxu0 %v12053_v62  ;;  %v12071_v0 = vld [vmem:[%s16779_s3 + $0x132c] ss:$40 sps:$4 sm:$0xff]   ;;  %v12069_v15 = vld [vmem:[%s16779_s3 + $0x1328] ss:$40 sps:$4 sm:$0xff]  }
 0x41b   : > { %12449 = vrcp.f32 %v8630_v10 }
 0x41c   : > { %12451 = vrcp.f32 %v8631_v28  ;;  %8358 = vmatpush1.bf16.msra.mxu1 %v12048_v36  ;;  %v12074_v36 = vld [vmem:[%s16779_s3 + $0x394] ss:$40 sps:$4 sm:$0xff]   ;;  %v8690_v28 = vmax.f32 %v15772_v25, 0.0  ;;  %v12072_v25 = vld [vmem:[%s16779_s3 + $0x390] ss:$40 sps:$4 sm:$0xff]  }
 0x41d   : > { %8278 = vmatpush1.bf16.msra.mxu0 %v12051_v45  ;;  %8359 = vmatprep.subr.bf16.mxu1 %v12056_v12  ;;  %v8680_v45 = vmax.f32 %v15758_v35, 0.0 }
 0x41e   : > { %8279 = vmatprep.subr.bf16.mxu0 %v12059_v1 }
 0x420   : > { %8360 = vmatpush1.bf16.msra.mxu1 %v12054_v6  ;;  %v12077_v6 = vld [vmem:[%s16779_s3 + $0x137c] ss:$40 sps:$4 sm:$0xff]  }
 0x421   : > { %8280 = vmatpush1.bf16.msra.mxu0 %v12057_v32  ;;  %8361 = vmatprep.subr.bf16.mxu1 %v12062_v34  ;;  %v8681_v32 = vmax.f32 %v15763_v63, 0.0  ;;  %v8691_v34 = vmax.f32 %v15778_v18, 0.0  ;;  %v12075_v63 = vld [vmem:[%s16779_s3 + $0x1378] ss:$40 sps:$4 sm:$0xff]  }
 0x422   : > { %8281 = vmatprep.subr.bf16.mxu0 %v12065_v48 }
 0x423   : > { %v12446_v13 = vpop.eup %12445 }
 0x424   : > { %v12448_v62 = vpop.eup %12447  ;;  %v8720_v59 = vsub.f32 1.0, %v12446_v13  ;;  %8362 = vmatpush1.bf16.msra.mxu1 %v12060_v53 }
 0x425   : > { %v12450_v56 = vpop.eup %12449  ;;  %8282 = vmatpush1.bf16.msra.mxu0 %v12063_v58  ;;  %8363 = vmatprep.subr.bf16.mxu1 %v12068_v43  ;;  %v8721_v55 = vsub.f32 1.0, %v12448_v62  ;;  %v8700_v58 = vmul.f32 %v12446_v13, %v8680_v45  ;;  %v8701_v43 = vmul.f32 %v12448_v62, %v8681_v32  ;;  %v12083_v13 = vld [vmem:[%s16779_s3 + $0x13cc] ss:$40 sps:$4 sm:$0xff]   ;;  %v12101_v32 = vld [vmem:[%s16779_s3 + $0x14bc] ss:$40 sps:$4 sm:$0xff]  }
 0x426   : > { %v12452_v10 = vpop.eup %12451  ;;  %v8740_v12 = vmul.f32 %v8720_v59, %v13999_v11  ;;  %v8730_v1 = vsub.f32 1.0, %v12450_v56  ;;  %8283 = vmatprep.subr.bf16.mxu0 %v12071_v0  ;;  %v8710_v35 = vmul.f32 %v12450_v56, %v8690_v28  ;;  %v12086_v56 = vld [vmem:[%s16779_s3 + $0x434] ss:$40 sps:$4 sm:$0xff]   ;;  %v12092_v45 = vld [vmem:[%s16779_s3 + $0x484] ss:$40 sps:$4 sm:$0xff]  }
 0x427   : > { %v8731_v48 = vsub.f32 1.0, %v12452_v10  ;;  %v8741_v53 = vmul.f32 %v8721_v55, %v2602_v20  ;;  %v8711_v0 = vmul.f32 %v12452_v10, %v8691_v34  ;;  %v12084_v55 = vld [vmem:[%s16779_s3 + $0x430] ss:$40 sps:$4 sm:$0xff]   ;;  %v12090_v28 = vld [vmem:[%s16779_s3 + $0x480] ss:$40 sps:$4 sm:$0xff]  }
 0x428   : > { %v8750_v11 = vmul.f32 %v8730_v1, %v14011_v47  ;;  %8364 = vmatpush1.bf16.msra.mxu1 %v12066_v38  ;;  %v15885_v47 = vadd.f32 %v8740_v12, %v8700_v58  ;;  %v12078_v38 = vld [vmem:[%s16779_s3 + $0x3e0] ss:$40 sps:$4 sm:$0xff]   ;;  %v12095_v12 = vld [vmem:[%s16779_s3 + $0x146c] ss:$40 sps:$4 sm:$0xff]   ;;  %v12096_v34 = vld [vmem:[%s16779_s3 + $0x4d0] ss:$40 sps:$4 sm:$0xff]  }
 0x429   : > { %8284 = vmatpush1.bf16.msra.mxu0 %v12069_v15  ;;  %8365 = vmatprep.subr.bf16.mxu1 %v12074_v36  ;;  %v8751_v20 = vmul.f32 %v8731_v48, %v2612_v50  ;;  %v15892_v62 = vadd.f32 %v8741_v53, %v8701_v43  ;;  %v12081_v50 = vld [vmem:[%s16779_s3 + $0x13c8] ss:$40 sps:$4 sm:$0xff]   ;;  %v12089_v36 = vld [vmem:[%s16779_s3 + $0x141c] ss:$40 sps:$4 sm:$0xff]   ;;  %v12087_v10 = vld [vmem:[%s16779_s3 + $0x1418] ss:$40 sps:$4 sm:$0xff]  }
 0x42a   : > { %v15887_v18 = vadd.f32 %v8750_v11, %v8710_v35  ;;  %8285 = vmatprep.subr.bf16.mxu0 %v12077_v6  ;;  %v12093_v1 = vld [vmem:[%s16779_s3 + $0x1468] ss:$40 sps:$4 sm:$0xff]   ;;  %v12098_v6 = vld [vmem:[%s16779_s3 + $0x4d4] ss:$40 sps:$4 sm:$0xff]   ;;  %v12099_v48 = vld [vmem:[%s16779_s3 + $0x14b8] ss:$40 sps:$4 sm:$0xff]  }
 0x42b   : > { %v15894_v59 = vadd.f32 %v8751_v20, %v8711_v0  ;;  %v12104_v53 = vld [vmem:[%s16779_s3 + $0x524] ss:$40 sps:$4 sm:$0xff]   ;;  %v12102_v35 = vld [vmem:[%s16779_s3 + $0x520] ss:$40 sps:$4 sm:$0xff]   ;;  %v12108_v0 = vld [vmem:[%s16779_s3 + $0x570] ss:$40 sps:$4 sm:$0xff]  }
 0x42c   : > { %8366 = vmatpush1.bf16.msra.mxu1 %v12072_v25  ;;  %v8780_v31 = vpack.c.bf16 %v15887_v18, %v15885_v47  ;;  %v12107_v58 = vld [vmem:[%s16779_s3 + $0x150c] ss:$40 sps:$4 sm:$0xff]   ;;  %v12105_v11 = vld [vmem:[%s16779_s3 + $0x1508] ss:$40 sps:$4 sm:$0xff]   ;;  %v12113_v43 = vld [vmem:[%s16779_s3 + $0x155c] ss:$40 sps:$4 sm:$0xff]  }
 0x42d   : > { %8286 = vmatpush1.bf16.msra.mxu0 %v12075_v63  ;;  %8367 = vmatprep.subr.bf16.mxu1 %v12080_v21  ;;  %v8781_v15 = vpack.c.bf16 %v15894_v59, %v15892_v62  ;;  %v12110_v25 = vld [vmem:[%s16779_s3 + $0x574] ss:$40 sps:$4 sm:$0xff]   ;;  %v12111_v63 = vld [vmem:[%s16779_s3 + $0x1558] ss:$40 sps:$4 sm:$0xff]   ;;  %v12116_v21 = vld [vmem:[%s16779_s3 + $0x5c4] ss:$40 sps:$4 sm:$0xff]  }
 0x42e   : > { %8287 = vmatprep.subr.bf16.mxu0 %v12083_v13  ;;  %v12117_v20 = vld [vmem:[%s16779_s3 + $0x15a8] ss:$40 sps:$4 sm:$0xff]   ;;  %v12122_v13 = vld [vmem:[%s16779_s3 + $0x614] ss:$40 sps:$4 sm:$0xff]   ;;  %v12237_v62 = vld [vmem:[%s16779_s3 + $0xca4] ss:$40 sps:$4 sm:$0xff]  }
 0x42f   : > { %v12238_v59 = vld [vmem:[%s16781_s5 + $0xd8] sm:$0xff]   ;;  %v12303_v47 = vld [vmem:[%s16781_s5 + $0x150] sm:$0xff]  }
 0x430   : > { %8368 = vmatpush1.bf16.msra.mxu1 %v12078_v38  ;;  %v12125_v38 = vld [vmem:[%s16779_s3 + $0x15fc] ss:$40 sps:$4 sm:$0xff]   ;;  %v12266_v18 = vld [vmem:[%s16779_s3 + $0xed0] ss:$40 sps:$4 sm:$0xff]  }
 0x431   : > { %8288 = vmatpush1.bf16.msra.mxu0 %v12081_v50  ;;  %8369 = vmatprep.subr.bf16.mxu1 %v12086_v56  ;;  %v12120_v50 = vld [vmem:[%s16779_s3 + $0x610] ss:$40 sps:$4 sm:$0xff]  }
 0x432   : > { %8300 = vmatprep.subr.bf16.mxu0 %v12089_v36  ;;  %v12123_v56 = vld [vmem:[%s16779_s3 + $0x15f8] ss:$40 sps:$4 sm:$0xff]   ;;  %v12128_v36 = vld [vmem:[%s16779_s3 + $0x664] ss:$40 sps:$4 sm:$0xff]  }
 0x434   : > { %8290 = vmatmul.mubr.bf16.vlgmr.msra.gmra.mrb[80].mxu0 %v14466_v24  ;;  %8370 = vmatpush1.bf16.msra.mxu1 %v12084_v55  ;;  %v12131_v55 = vld [vmem:[%s16779_s3 + $0x164c] ss:$40 sps:$4 sm:$0xff]  }
 0x435   : > { %8301 = vmatpush1.bf16.msra.mxu0 %v12087_v10  ;;  %8332 = vmatprep.mubr.bf16.mxu0 %v14478_v29  ;;  %v12126_v10 = vld [vmem:[%s16779_s3 + $0x660] ss:$40 sps:$4 sm:$0xff]  }
 0x436   : > { %8371 = vmatprep.subr.bf16.mxu1 %v12092_v45  ;;  %8302 = vmatprep.subr.bf16.mxu0 %v12095_v12  ;;  %v12129_v45 = vld [vmem:[%s16779_s3 + $0x1648] ss:$40 sps:$4 sm:$0xff]   ;;  %v12134_v12 = vld [vmem:[%s16779_s3 + $0x6b4] ss:$40 sps:$4 sm:$0xff]  }
 0x438   : > { %8372 = vmatpush1.bf16.msra.mxu1 %v12090_v28  ;;  %v12137_v28 = vld [vmem:[%s16779_s3 + $0x169c] ss:$40 sps:$4 sm:$0xff]  }
 0x439   : > { %8303 = vmatpush1.bf16.msra.mxu0 %v12093_v1  ;;  %8373 = vmatprep.subr.bf16.mxu1 %v12098_v6  ;;  %v12132_v1 = vld [vmem:[%s16779_s3 + $0x6b0] ss:$40 sps:$4 sm:$0xff]  }
 0x43a   : > { %8304 = vmatprep.subr.bf16.mxu0 %v12101_v32  ;;  %v12135_v6 = vld [vmem:[%s16779_s3 + $0x1698] ss:$40 sps:$4 sm:$0xff]   ;;  %v12140_v32 = vld [vmem:[%s16779_s3 + $0x704] ss:$40 sps:$4 sm:$0xff]  }
 0x43c   : > { %8374 = vmatpush1.bf16.msra.mxu1 %v12096_v34  ;;  %v12143_v34 = vld [vmem:[%s16779_s3 + $0x16ec] ss:$40 sps:$4 sm:$0xff]  }
 0x43d   : > { %8305 = vmatpush1.bf16.msra.mxu0 %v12099_v48  ;;  %8386 = vmatprep.subr.bf16.mxu1 %v12104_v53  ;;  %v12138_v48 = vld [vmem:[%s16779_s3 + $0x700] ss:$40 sps:$4 sm:$0xff]  }
 0x43e   : > { %8306 = vmatprep.subr.bf16.mxu0 %v12107_v58  ;;  %v12141_v53 = vld [vmem:[%s16779_s3 + $0x16e8] ss:$40 sps:$4 sm:$0xff]   ;;  %v12146_v58 = vld [vmem:[%s16779_s3 + $0x754] ss:$40 sps:$4 sm:$0xff]  }
 0x43f   : > { %8376 = vmatmul.mubr.bf16.vlgmr.msra.gmra.mrb[76].mxu1 %v13979_v44  ;;  %v12119_v44 = vld [vmem:[%s16779_s3 + $0x15ac] ss:$40 sps:$4 sm:$0xff]  }
 0x440   : > { %8387 = vmatpush1.bf16.msra.mxu1 %v12102_v35  ;;  %8418 = vmatprep.mubr.bf16.mxu1 %v13944_v22  ;;  %v12114_v22 = vld [vmem:[%s16779_s3 + $0x5c0] ss:$40 sps:$4 sm:$0xff]   ;;  %v12149_v35 = vld [vmem:[%s16779_s3 + $0x173c] ss:$40 sps:$4 sm:$0xff]  }
 0x441   : > { %8307 = vmatpush1.bf16.msra.mxu0 %v12105_v11  ;;  %8388 = vmatprep.subr.bf16.mxu1 %v12110_v25  ;;  %v12144_v11 = vld [vmem:[%s16779_s3 + $0x750] ss:$40 sps:$4 sm:$0xff]  }
 0x442   : > { %8308 = vmatprep.subr.bf16.mxu0 %v12113_v43  ;;  %v12147_v25 = vld [vmem:[%s16779_s3 + $0x1738] ss:$40 sps:$4 sm:$0xff]   ;;  %v12152_v43 = vld [vmem:[%s16779_s3 + $0x7a4] ss:$40 sps:$4 sm:$0xff]  }
 0x444   : > { %8389 = vmatpush1.bf16.msra.mxu1 %v12108_v0  ;;  %v12155_v0 = vld [vmem:[%s16779_s3 + $0x178c] ss:$40 sps:$4 sm:$0xff]  }
 0x445   : > { %8309 = vmatpush1.bf16.msra.mxu0 %v12111_v63  ;;  %8390 = vmatprep.subr.bf16.mxu1 %v12116_v21  ;;  %v12150_v63 = vld [vmem:[%s16779_s3 + $0x7a0] ss:$40 sps:$4 sm:$0xff]  }
 0x446   : > { %8310 = vmatprep.subr.bf16.mxu0 %v12119_v44  ;;  %v12153_v21 = vld [vmem:[%s16779_s3 + $0x1788] ss:$40 sps:$4 sm:$0xff]   ;;  %v12158_v44 = vld [vmem:[%s16779_s3 + $0x7f4] ss:$40 sps:$4 sm:$0xff]  }
 0x448   : > { %8391 = vmatpush1.bf16.msra.mxu1 %v12114_v22  ;;  %v12161_v22 = vld [vmem:[%s16779_s3 + $0x17dc] ss:$40 sps:$4 sm:$0xff]  }
 0x449   : > { %8311 = vmatpush1.bf16.msra.mxu0 %v12117_v20  ;;  %8392 = vmatprep.subr.bf16.mxu1 %v12122_v13  ;;  %v12156_v20 = vld [vmem:[%s16779_s3 + $0x7f0] ss:$40 sps:$4 sm:$0xff]  }
 0x44a   : > { %8312 = vmatprep.subr.bf16.mxu0 %v12125_v38  ;;  %v12159_v13 = vld [vmem:[%s16779_s3 + $0x17d8] ss:$40 sps:$4 sm:$0xff]   ;;  %v12164_v38 = vld [vmem:[%s16779_s3 + $0x844] ss:$40 sps:$4 sm:$0xff]  }
 0x44c   : > { %8393 = vmatpush1.bf16.msra.mxu1 %v12120_v50  ;;  %v12167_v50 = vld [vmem:[%s16779_s3 + $0x182c] ss:$40 sps:$4 sm:$0xff]  }
 0x44d   : > { %8313 = vmatpush1.bf16.msra.mxu0 %v12123_v56  ;;  %8394 = vmatprep.subr.bf16.mxu1 %v12128_v36  ;;  %v12162_v56 = vld [vmem:[%s16779_s3 + $0x840] ss:$40 sps:$4 sm:$0xff]  }
 0x44e   : > { %8314 = vmatprep.subr.bf16.mxu0 %v12131_v55  ;;  %v12165_v36 = vld [vmem:[%s16779_s3 + $0x1828] ss:$40 sps:$4 sm:$0xff]   ;;  %v12170_v55 = vld [vmem:[%s16779_s3 + $0x894] ss:$40 sps:$4 sm:$0xff]  }
 0x450   : > { %8395 = vmatpush1.bf16.msra.mxu1 %v12126_v10  ;;  %v12173_v10 = vld [vmem:[%s16779_s3 + $0x187c] ss:$40 sps:$4 sm:$0xff]  }
 0x451   : > { %8315 = vmatpush1.bf16.msra.mxu0 %v12129_v45  ;;  %8396 = vmatprep.subr.bf16.mxu1 %v12134_v12  ;;  %v12168_v45 = vld [vmem:[%s16779_s3 + $0x890] ss:$40 sps:$4 sm:$0xff]  }
 0x452   : > { %8316 = vmatprep.subr.bf16.mxu0 %v12137_v28  ;;  %v12171_v12 = vld [vmem:[%s16779_s3 + $0x1878] ss:$40 sps:$4 sm:$0xff]   ;;  %v12176_v28 = vld [vmem:[%s16779_s3 + $0x8e4] ss:$40 sps:$4 sm:$0xff]  }
 0x454   : > { %8397 = vmatpush1.bf16.msra.mxu1 %v12132_v1  ;;  %v12179_v1 = vld [vmem:[%s16779_s3 + $0x18cc] ss:$40 sps:$4 sm:$0xff]  }
 0x455   : > { %8317 = vmatpush1.bf16.msra.mxu0 %v12135_v6  ;;  %8398 = vmatprep.subr.bf16.mxu1 %v12140_v32  ;;  %v12174_v6 = vld [vmem:[%s16779_s3 + $0x8e0] ss:$40 sps:$4 sm:$0xff]  }
 0x456   : > { %8318 = vmatprep.subr.bf16.mxu0 %v12143_v34  ;;  %v12177_v32 = vld [vmem:[%s16779_s3 + $0x18c8] ss:$40 sps:$4 sm:$0xff]   ;;  %v12182_v34 = vld [vmem:[%s16779_s3 + $0x934] ss:$40 sps:$4 sm:$0xff]  }
 0x458   : > { %8399 = vmatpush1.bf16.msra.mxu1 %v12138_v48  ;;  %v12183_v48 = vld [vmem:[%s16781_s5 + $0x40] sm:$0xff]  }
 0x459   : > { %8319 = vmatpush1.bf16.msra.mxu0 %v12141_v53  ;;  %8400 = vmatprep.subr.bf16.mxu1 %v12146_v58  ;;  %v12180_v53 = vld [vmem:[%s16779_s3 + $0x930] ss:$40 sps:$4 sm:$0xff]   ;;  %v12184_v58 = vld [vmem:[%s16781_s5] sm:$0xff]  }
 0x45a   : > { %8320 = vmatprep.subr.bf16.mxu0 %v12149_v35  ;;  %v12187_v35 = vld [vmem:[%s16779_s3 + $0x984] ss:$40 sps:$4 sm:$0xff]  }
 0x45c   : > { %8401 = vmatpush1.bf16.msra.mxu1 %v12144_v11  ;;  %v12188_v11 = vld [vmem:[%s16781_s5 + $0x48] sm:$0xff]  }
 0x45d   : > { %8321 = vmatpush1.bf16.msra.mxu0 %v12147_v25  ;;  %8402 = vmatprep.subr.bf16.mxu1 %v12152_v43  ;;  %v12185_v25 = vld [vmem:[%s16779_s3 + $0x980] ss:$40 sps:$4 sm:$0xff]  }
 0x45e   : > { %8322 = vmatprep.subr.bf16.mxu0 %v12155_v0  ;;  %v12189_v43 = vld [vmem:[%s16781_s5 + $0x8] sm:$0xff]   ;;  %v12192_v0 = vld [vmem:[%s16779_s3 + $0x9d4] ss:$40 sps:$4 sm:$0xff]  }
 0x460   : > { %8403 = vmatpush1.bf16.msra.mxu1 %v12150_v63  ;;  %v12193_v63 = vld [vmem:[%s16781_s5 + $0x50] sm:$0xff]  }
 0x461   : > { %8323 = vmatpush1.bf16.msra.mxu0 %v12153_v21  ;;  %8404 = vmatprep.subr.bf16.mxu1 %v12158_v44  ;;  %v12198_v21 = vld [vmem:[%s16781_s5 + $0x58] sm:$0xff]   ;;  %v12195_v44 = vld [vmem:[%s16779_s3 + $0xa20] ss:$40 sps:$4 sm:$0xff]  }
 0x462   : > { %8324 = vmatprep.subr.bf16.mxu0 %v12161_v22  ;;  %v12199_v22 = vld [vmem:[%s16781_s5 + $0x18] sm:$0xff]  }
 0x464   : > { %8405 = vmatpush1.bf16.msra.mxu1 %v12156_v20  ;;  %v12202_v20 = vld [vmem:[%s16779_s3 + $0xa74] ss:$40 sps:$4 sm:$0xff]  }
 0x465   : > { %8325 = vmatpush1.bf16.msra.mxu0 %v12159_v13  ;;  %8406 = vmatprep.subr.bf16.mxu1 %v12164_v38  ;;  %v12203_v13 = vld [vmem:[%s16781_s5 + $0x60] sm:$0xff]   ;;  %v12200_v38 = vld [vmem:[%s16779_s3 + $0xa70] ss:$40 sps:$4 sm:$0xff]  }
 0x466   : > { %8326 = vmatprep.subr.bf16.mxu0 %v12167_v50  ;;  %v12204_v50 = vld [vmem:[%s16781_s5 + $0x20] sm:$0xff]  }
 0x468   : > { %8407 = vmatpush1.bf16.msra.mxu1 %v12162_v56  ;;  %v12207_v56 = vld [vmem:[%s16779_s3 + $0xac4] ss:$40 sps:$4 sm:$0xff]  }
 0x469   : > { %8327 = vmatpush1.bf16.msra.mxu0 %v12165_v36  ;;  %8408 = vmatprep.subr.bf16.mxu1 %v12170_v55  ;;  %v12209_v36 = vld [vmem:[%s16781_s5 + $0x28] sm:$0xff]   ;;  %v12212_v55 = vld [vmem:[%s16779_s3 + $0xb14] ss:$40 sps:$4 sm:$0xff]  }
 0x46a   : > { %8328 = vmatprep.subr.bf16.mxu0 %v12173_v10  ;;  %v12213_v10 = vld [vmem:[%s16781_s5 + $0x70] sm:$0xff]  }
 0x46c   : > { %8409 = vmatpush1.bf16.msra.mxu1 %v12168_v45  ;;  %v12210_v45 = vld [vmem:[%s16779_s3 + $0xb10] ss:$40 sps:$4 sm:$0xff]  }
 0x46d   : > { %8329 = vmatpush1.bf16.msra.mxu0 %v12171_v12  ;;  %8410 = vmatprep.subr.bf16.mxu1 %v12176_v28  ;;  %v12214_v12 = vld [vmem:[%s16781_s5 + $0x30] sm:$0xff]   ;;  %v12217_v28 = vld [vmem:[%s16779_s3 + $0xb64] ss:$40 sps:$4 sm:$0xff]  }
 0x46e   : > { %8330 = vmatprep.subr.bf16.mxu0 %v12179_v1  ;;  %v12218_v1 = vld [vmem:[%s16781_s5 + $0x78] sm:$0xff]  }
 0x470   : > { %8411 = vmatpush1.bf16.msra.mxu1 %v12174_v6  ;;  %v12215_v6 = vld [vmem:[%s16779_s3 + $0xb60] ss:$40 sps:$4 sm:$0xff]  }
 0x471   : > { %8331 = vmatpush1.bf16.msra.mxu0 %v12177_v32  ;;  %8412 = vmatprep.subr.bf16.mxu1 %v12182_v34  ;;  %v12219_v32 = vld [vmem:[%s16781_s5 + $0x38] sm:$0xff]  }
 0x472   : > { %10833 = vmatprep.subr.bf16.mxu0 %v12183_v48  ;;  %v12222_v34 = vld [vmem:[%s16779_s3 + $0xbb4] ss:$40 sps:$4 sm:$0xff]   ;;  %v12223_v48 = vld [vmem:[%s16781_s5 + $0xc0] sm:$0xff]  }
 0x474   : > { %8333 = vmatmul.mubr.bf16.vlgmr.msra.gmra.mrb[80].mxu0 %v14682_v9  ;;  %8413 = vmatpush1.bf16.msra.mxu1 %v12180_v53  ;;  %v12220_v53 = vld [vmem:[%s16779_s3 + $0xbb0] ss:$40 sps:$4 sm:$0xff]  }
 0x475   : > { %10834 = vmatpush3.bf16.msra.mxu0 %v12184_v58  ;;  %9467 = vmatprep.mubr.bf16.mxu0 %v8779_v40  ;;  %v12197_v40 = vld [vmem:[%s16779_s3 + $0xa24] ss:$40 sps:$4 sm:$0xff]  }
 0x476   : > { %8414 = vmatprep.subr.bf16.mxu1 %v12187_v35  ;;  %10835 = vmatprep.subr.bf16.mxu0 %v12188_v11  ;;  %v12224_v58 = vld [vmem:[%s16781_s5 + $0x80] sm:$0xff]   ;;  %v12228_v11 = vld [vmem:[%s16781_s5 + $0xc8] sm:$0xff]  }
 0x477   : > { %v12227_v35 = vld [vmem:[%s16779_s3 + $0xc04] ss:$40 sps:$4 sm:$0xff]  }
 0x478   : > { %8415 = vmatpush1.bf16.msra.mxu1 %v12185_v25  ;;  %v12225_v25 = vld [vmem:[%s16779_s3 + $0xc00] ss:$40 sps:$4 sm:$0xff]  }
 0x479   : > { %10836 = vmatpush3.bf16.msra.mxu0 %v12189_v43  ;;  %8416 = vmatprep.subr.bf16.mxu1 %v12192_v0  ;;  %v12229_v43 = vld [vmem:[%s16781_s5 + $0x88] sm:$0xff]   ;;  %v12232_v0 = vld [vmem:[%s16779_s3 + $0xc54] ss:$40 sps:$4 sm:$0xff]  }
 0x47a   : > { %10837 = vmatprep.subr.bf16.mxu0 %v12193_v63  ;;  %v12239_v63 = vld [vmem:[%s16781_s5 + $0x98] sm:$0xff]  }
 0x47c   : > { %8417 = vmatpush1.bf16.msra.mxu1 %v12190_v60  ;;  %v12242_v60 = vld [vmem:[%s16779_s3 + $0xcf4] ss:$40 sps:$4 sm:$0xff]  }
 0x47d   : > { %10838 = vmatpush3.bf16.msra.mxu0 %v12194_v26  ;;  %8429 = vmatprep.subr.bf16.mxu1 %v12197_v40  ;;  %v12243_v26 = vld [vmem:[%s16781_s5 + $0xe0] sm:$0xff]   ;;  %v12240_v40 = vld [vmem:[%s16779_s3 + $0xcf0] ss:$40 sps:$4 sm:$0xff]  }
 0x47e   : > { %10839 = vmatprep.subr.bf16.mxu0 %v12198_v21  ;;  %v12244_v21 = vld [vmem:[%s16781_s5 + $0xa0] sm:$0xff]  }
 0x47f   : > { %8419 = vmatmul.mubr.bf16.vlgmr.msra.gmra.mrb[76].mxu1 %v14020_v14  ;;  %v12208_v14 = vld [vmem:[%s16781_s5 + $0x68] sm:$0xff]  }
 0x480   : > { %8430 = vmatpush1.bf16.msra.mxu1 %v12195_v44  ;;  %8461 = vmatprep.mubr.bf16.mxu1 %v14030_v33  ;;  %v12205_v33 = vld [vmem:[%s16779_s3 + $0xac0] ss:$40 sps:$4 sm:$0xff]   ;;  %v12247_v44 = vld [vmem:[%s16779_s3 + $0xd44] ss:$40 sps:$4 sm:$0xff]  }
 0x481   : > { %10840 = vmatpush3.bf16.msra.mxu0 %v12199_v22  ;;  %8431 = vmatprep.subr.bf16.mxu1 %v12202_v20  ;;  %v12248_v22 = vld [vmem:[%s16781_s5 + $0xe8] sm:$0xff]  }
 0x482   : > { %10841 = vmatprep.subr.bf16.mxu0 %v12203_v13  ;;  %v12245_v20 = vld [vmem:[%s16779_s3 + $0xd40] ss:$40 sps:$4 sm:$0xff]  }
 0x483   : > { %v12249_v13 = vld [vmem:[%s16781_s5 + $0xa8] sm:$0xff]  }
 0x484   : > { %8432 = vmatpush1.bf16.msra.mxu1 %v12200_v38  ;;  %v12252_v38 = vld [vmem:[%s16779_s3 + $0xd94] ss:$40 sps:$4 sm:$0xff]  }
 0x485   : > { %10842 = vmatpush3.bf16.msra.mxu0 %v12204_v50  ;;  %8433 = vmatprep.subr.bf16.mxu1 %v12207_v56  ;;  %v12253_v50 = vld [vmem:[%s16781_s5 + $0xf0] sm:$0xff]  }
 0x486   : > { %10843 = vmatprep.subr.bf16.mxu0 %v12208_v14  ;;  %v12250_v56 = vld [vmem:[%s16779_s3 + $0xd90] ss:$40 sps:$4 sm:$0xff]  }
 0x487   : > { %v12254_v14 = vld [vmem:[%s16781_s5 + $0xb0] sm:$0xff]  }
 0x488   : > { %8434 = vmatpush1.bf16.msra.mxu1 %v12205_v33  ;;  %v12257_v33 = vld [vmem:[%s16779_s3 + $0xde4] ss:$40 sps:$4 sm:$0xff]  }
 0x489   : > { %10844 = vmatpush3.bf16.msra.mxu0 %v12209_v36  ;;  %8435 = vmatprep.subr.bf16.mxu1 %v12212_v55  ;;  %v12258_v36 = vld [vmem:[%s16781_s5 + $0xf8] sm:$0xff]   ;;  %v12255_v55 = vld [vmem:[%s16779_s3 + $0xde0] ss:$40 sps:$4 sm:$0xff]  }
 0x48a   : > { %10845 = vmatprep.subr.bf16.mxu0 %v12213_v10  ;;  %v12259_v10 = vld [vmem:[%s16781_s5 + $0xb8] sm:$0xff]  }
 0x48c   : > { %8436 = vmatpush1.bf16.msra.mxu1 %v12210_v45  ;;  %v12262_v45 = vld [vmem:[%s16779_s3 + $0xe34] ss:$40 sps:$4 sm:$0xff]  }
 0x48d   : > { %10846 = vmatpush3.bf16.msra.mxu0 %v12214_v12  ;;  %8437 = vmatprep.subr.bf16.mxu1 %v12217_v28  ;;  %v12293_v12 = vld [vmem:[%s16781_s5 + $0x140] sm:$0xff]   ;;  %v12260_v28 = vld [vmem:[%s16779_s3 + $0xe30] ss:$40 sps:$4 sm:$0xff]  }
 0x48e   : > { %10847 = vmatprep.subr.bf16.mxu0 %v12218_v1  ;;  %v12265_v1 = vld [vmem:[%s16779_s3 + $0xe84] ss:$40 sps:$4 sm:$0xff]  }
 0x490   : > { %8438 = vmatpush1.bf16.msra.mxu1 %v12215_v6  ;;  %v12294_v6 = vld [vmem:[%s16781_s5 + $0x100] sm:$0xff]  }
 0x491   : > { %10848 = vmatpush3.bf16.msra.mxu0 %v12219_v32  ;;  %8439 = vmatprep.subr.bf16.mxu1 %v12222_v34  ;;  %v12298_v32 = vld [vmem:[%s16781_s5 + $0x148] sm:$0xff]  }
 0x492   : > { %10855 = vmatprep.subr.bf16.mxu0 %v12223_v48  ;;  %v12263_v34 = vld [vmem:[%s16779_s3 + $0xe80] ss:$40 sps:$4 sm:$0xff]   ;;  %v12268_v48 = vld [vmem:[%s16779_s3 + $0xed4] ss:$40 sps:$4 sm:$0xff]  }
 0x494   : > { %8440 = vmatpush1.bf16.msra.mxu1 %v12220_v53  ;;  %9468 = vmatmul.mubr.bf16.vlgmr.msra.gmra.mrb[84].mxu0 %v8778_v30  ;;  %v12234_v30 = vld [vmem:[%s16781_s5 + $0x90] sm:$0xff]   ;;  %v12299_v53 = vld [vmem:[%s16781_s5 + $0x108] sm:$0xff]  }
 0x495   : > { %10856 = vmatpush3.bf16.msra.mxu0 %v12224_v58  ;;  %9508 = vmatprep.mubr.bf16.mxu0 %v8781_v15  ;;  %v12235_v15 = vld [vmem:[%s16779_s3 + $0xca0] ss:$40 sps:$4 sm:$0xff]   ;;  %v12304_v58 = vld [vmem:[%s16781_s5 + $0x110] sm:$0xff]  }
 0x496   : > { %8441 = vmatprep.subr.bf16.mxu1 %v12227_v35  ;;  %10857 = vmatprep.subr.bf16.mxu0 %v12228_v11  ;;  %v12308_v35 = vld [vmem:[%s16781_s5 + $0x158] sm:$0xff]   ;;  %v12269_v11 = vld [vmem:[%s16779_s3 + $0xf20] ss:$40 sps:$4 sm:$0xff]  }
 0x498   : > { %8442 = vmatpush1.bf16.msra.mxu1 %v12225_v25  ;;  %v12274_v25 = vld [vmem:[%s16779_s3 + $0xf74] ss:$40 sps:$4 sm:$0xff]  }
 0x499   : > { %10858 = vmatpush3.bf16.msra.mxu0 %v12229_v43  ;;  %8443 = vmatprep.subr.bf16.mxu1 %v12232_v0  ;;  %v12309_v43 = vld [vmem:[%s16781_s5 + $0x118] sm:$0xff]   ;;  %v12313_v0 = vld [vmem:[%s16781_s5 + $0x160] sm:$0xff]  }
 0x49a   : > { %10859 = vmatprep.subr.bf16.mxu0 %v12233_v4  ;;  %v12272_v4 = vld [vmem:[%s16779_s3 + $0xf70] ss:$40 sps:$4 sm:$0xff]  }
 0x49c   : > { %8444 = vmatpush1.bf16.msra.mxu1 %v12230_v61  ;;  %v12277_v61 = vld [vmem:[%s16779_s3 + $0xfc4] ss:$40 sps:$4 sm:$0xff]  }
 0x49d   : > { %10860 = vmatpush3.bf16.msra.mxu0 %v12234_v30  ;;  %8445 = vmatprep.subr.bf16.mxu1 %v12237_v62  ;;  %v12314_v30 = vld [vmem:[%s16781_s5 + $0x120] sm:$0xff]   ;;  %v12280_v62 = vld [vmem:[%s16779_s3 + $0x1014] ss:$40 sps:$4 sm:$0xff]  }
 0x49e   : > { %10861 = vmatprep.subr.bf16.mxu0 %v12238_v59  ;;  %v12319_v59 = vld [vmem:[%s16781_s5 + $0x128] sm:$0xff]  }
 0x4a0   : > { %8446 = vmatpush1.bf16.msra.mxu1 %v12235_v15  ;;  %v12323_v15 = vld [vmem:[%s16781_s5 + $0x170] sm:$0xff]  }
 0x4a1   : > { %10862 = vmatpush3.bf16.msra.mxu0 %v12239_v63  ;;  %8447 = vmatprep.subr.bf16.mxu1 %v12242_v60  ;;  %v12278_v63 = vld [vmem:[%s16779_s3 + $0x1010] ss:$40 sps:$4 sm:$0xff]   ;;  %v12283_v60 = vld [vmem:[%s16779_s3 + $0x1064] ss:$40 sps:$4 sm:$0xff]  }
 0x4a2   : > { %10863 = vmatprep.subr.bf16.mxu0 %v12243_v26  ;;  %v12324_v26 = vld [vmem:[%s16781_s5 + $0x130] sm:$0xff]  }
 0x4a4   : > { %8448 = vmatpush1.bf16.msra.mxu1 %v12240_v40  ;;  %v12328_v40 = vld [vmem:[%s16781_s5 + $0x178] sm:$0xff]  }
 0x4a5   : > { %10864 = vmatpush3.bf16.msra.mxu0 %v12244_v21  ;;  %8449 = vmatprep.subr.bf16.mxu1 %v12247_v44  ;;  %v12281_v21 = vld [vmem:[%s16779_s3 + $0x1060] ss:$40 sps:$4 sm:$0xff]   ;;  %v12286_v44 = vld [vmem:[%s16779_s3 + $0x10b4] ss:$40 sps:$4 sm:$0xff]  }
 0x4a6   : > { %10865 = vmatprep.subr.bf16.mxu0 %v12248_v22  ;;  %v12329_v22 = vld [vmem:[%s16781_s5 + $0x138] sm:$0xff]  }
 0x4a8   : > { %8450 = vmatpush1.bf16.msra.mxu1 %v12245_v20  ;;  %v16413_v20 = vld [vmem:[%s16780_s4] sm:$0xff] }
 0x4a9   : > { %10866 = vmatpush3.bf16.msra.mxu0 %v12249_v13  ;;  %8451 = vmatprep.subr.bf16.mxu1 %v12252_v38  ;;  %v16801_v13 = vsub.s32 4, %v13089_v7 }
 0x4aa   : > { %10867 = vmatprep.subr.bf16.mxu0 %v12253_v50  ;;  %v12381_v50 = vld [vmem:[%s16781_s5 + $0x1c0] sm:$0xff]  }
 0x4ab   : > { %v3452_v38 = vrot.slane %v16413_v20, %v16801_v13 }
 0x4ac   : > { %8452 = vmatpush1.bf16.msra.mxu1 %v12250_v56  ;;  %v16802_v56 = vsub.s32 5, %v13089_v7 }
 0x4ad   : > { %10868 = vmatpush3.bf16.msra.mxu0 %v12254_v14  ;;  %8453 = vmatprep.subr.bf16.mxu1 %v12257_v33  ;;  %v12284_v33 = vld [vmem:[%s16779_s3 + $0x10b0] ss:$40 sps:$4 sm:$0xff]  }
 0x4ae   : > { %10869 = vmatprep.subr.bf16.mxu0 %v12258_v36  ;;  %v3456_v14 = vrot.slane %v16413_v20, %v16802_v56  ;;  %v12289_v36 = vld [vmem:[%s16779_s3 + $0x1104] ss:$40 sps:$4 sm:$0xff]   ;;  %v12320_v56 = vld [vmem:[%s16779_s3 + $0x1330] ss:$40 sps:$4 sm:$0xff]  }
 0x4b0   : > { %8454 = vmatpush1.bf16.msra.mxu1 %v12255_v55 }
 0x4b1   : > { %10870 = vmatpush3.bf16.msra.mxu0 %v12259_v10  ;;  %8455 = vmatprep.subr.bf16.mxu1 %v12262_v45 }
 0x4b2   : > { %10877 = vmatprep.subr.bf16.mxu0 %v12293_v12 }
 0x4b4   : > { %8456 = vmatpush1.bf16.msra.mxu1 %v12260_v28  ;;  %9509 = vmatmul.mubr.bf16.vlgmr.msra.gmra.mrb[88].mxu0 %v8780_v31  ;;  %v12271_v31 = vld [vmem:[%s16779_s3 + $0xf24] ss:$40 sps:$4 sm:$0xff]  }
 0x4b5   : > { %8457 = vmatprep.subr.bf16.mxu1 %v12265_v1  ;;  %10878 = vmatpush3.bf16.msra.mxu0 %v12294_v6  ;;  %v12287_v1 = vld [vmem:[%s16779_s3 + $0x1100] ss:$40 sps:$4 sm:$0xff]  }
 0x4b6   : > { %10879 = vmatprep.subr.bf16.mxu0 %v12298_v32 }
 0x4b8   : > { %8458 = vmatpush1.bf16.msra.mxu1 %v12263_v34 }
 0x4b9   : > { %8459 = vmatprep.subr.bf16.mxu1 %v12268_v48  ;;  %10880 = vmatpush3.bf16.msra.mxu0 %v12299_v53  ;;  %v12292_v48 = vld [vmem:[%s16779_s3 + $0x1154] ss:$40 sps:$4 sm:$0xff]  }
 0x4ba   : > { %10881 = vmatprep.subr.bf16.mxu0 %v12303_v47 }
 0x4bc   : > { %8460 = vmatpush1.bf16.msra.mxu1 %v12266_v18 }
 0x4bd   : > { %8472 = vmatprep.subr.bf16.mxu1 %v12271_v31  ;;  %10882 = vmatpush3.bf16.msra.mxu0 %v12304_v58  ;;  %v12290_v58 = vld [vmem:[%s16779_s3 + $0x1150] ss:$40 sps:$4 sm:$0xff]  }
 0x4be   : > { %10883 = vmatprep.subr.bf16.mxu0 %v12308_v35  ;;  %v12297_v35 = vld [vmem:[%s16779_s3 + $0x11a4] ss:$40 sps:$4 sm:$0xff]  }
 0x4bf   : > { %8462 = vmatmul.mubr.bf16.vlgmr.msra.gmra.mrb[76].mxu1 %v14246_v5  ;;  %v12318_v5 = vld [vmem:[%s16781_s5 + $0x168] sm:$0xff]  }
 0x4c0   : > { %8473 = vmatpush1.bf16.msra.mxu1 %v12269_v11  ;;  %8504 = vmatprep.mubr.bf16.mxu1 %v14258_v51  ;;  %v12275_v51 = vld [vmem:[%s16779_s3 + $0xfc0] ss:$40 sps:$4 sm:$0xff]  }
 0x4c1   : > { %8474 = vmatprep.subr.bf16.mxu1 %v12274_v25  ;;  %10884 = vmatpush3.bf16.msra.mxu0 %v12309_v43  ;;  %v12295_v11 = vld [vmem:[%s16779_s3 + $0x11a0] ss:$40 sps:$4 sm:$0xff]   ;;  %v12302_v25 = vld [vmem:[%s16779_s3 + $0x11f4] ss:$40 sps:$4 sm:$0xff]   ;;  %v12300_v43 = vld [vmem:[%s16779_s3 + $0x11f0] ss:$40 sps:$4 sm:$0xff]  }
 0x4c2   : > { %10885 = vmatprep.subr.bf16.mxu0 %v12313_v0 }
 0x4c4   : > { %8475 = vmatpush1.bf16.msra.mxu1 %v12272_v4  ;;  %v12307_v4 = vld [vmem:[%s16779_s3 + $0x1244] ss:$40 sps:$4 sm:$0xff]  }
 0x4c5   : > { %8476 = vmatprep.subr.bf16.mxu1 %v12277_v61  ;;  %10886 = vmatpush3.bf16.msra.mxu0 %v12314_v30 }
 0x4c6   : > { %10887 = vmatprep.subr.bf16.mxu0 %v12318_v5 }
 0x4c8   : > { %8477 = vmatpush1.bf16.msra.mxu1 %v12275_v51 }
 0x4c9   : > { %8478 = vmatprep.subr.bf16.mxu1 %v12280_v62  ;;  %10888 = vmatpush3.bf16.msra.mxu0 %v12319_v59 }
 0x4ca   : > { %10889 = vmatprep.subr.bf16.mxu0 %v12323_v15  ;;  %v12305_v15 = vld [vmem:[%s16779_s3 + $0x1240] ss:$40 sps:$4 sm:$0xff]  }
 0x4cc   : > { %8479 = vmatpush1.bf16.msra.mxu1 %v12278_v63 }
 0x4cd   : > { %8480 = vmatprep.subr.bf16.mxu1 %v12283_v60  ;;  %10890 = vmatpush3.bf16.msra.mxu0 %v12324_v26  ;;  %v12312_v60 = vld [vmem:[%s16779_s3 + $0x1294] ss:$40 sps:$4 sm:$0xff]   ;;  %v12310_v26 = vld [vmem:[%s16779_s3 + $0x1290] ss:$40 sps:$4 sm:$0xff]  }
 0x4ce   : > { %10891 = vmatprep.subr.bf16.mxu0 %v12328_v40  ;;  %v12317_v40 = vld [vmem:[%s16779_s3 + $0x12e4] ss:$40 sps:$4 sm:$0xff]  }
 0x4d0   : > { %8481 = vmatpush1.bf16.msra.mxu1 %v12281_v21  ;;  %v12315_v21 = vld [vmem:[%s16779_s3 + $0x12e0] ss:$40 sps:$4 sm:$0xff]  }
 0x4d1   : > { %8482 = vmatprep.subr.bf16.mxu1 %v12286_v44  ;;  %10892 = vmatpush3.bf16.msra.mxu0 %v12329_v22  ;;  %v12322_v44 = vld [vmem:[%s16779_s3 + $0x1334] ss:$40 sps:$4 sm:$0xff]  }
 0x4d2   : > { %v8119_v55 = vpop.f32.mrb[72].mxu1  ;;  %10899 = vmatprep.subr.bf16.mxu0 %v12381_v50 }
 0x4d3   : > { %v16430_v10 = vadd.f32 %v8119_v55, %v3452_v38  ;;  %v8121_v45 = vpop.f32.mrb[73].mxu1 }
 0x4d4   : > { %v16432_v12 = vadd.f32 %v8121_v45, %v3456_v14  ;;  %v8123_v28 = vpop.f32.mrb[74].mxu1  ;;  %8483 = vmatpush1.bf16.msra.mxu1 %v12284_v33 }
 0x4d5   : > { %v10725_v6 = vmul.f32 -1.442695, %v16430_v10  ;;  %v16438_v32 = vadd.f32 %v8123_v28, %v3452_v38  ;;  %v8125_v34 = vpop.f32.mrb[75].mxu1  ;;  %8484 = vmatprep.subr.bf16.mxu1 %v12289_v36  ;;  %v8682_v36 = vmax.f32 %v16430_v10, 0.0 }
 0x4d6   : > { %v10726_v53 = vmul.f32 -1.442695, %v16432_v12  ;;  %v16444_v47 = vadd.f32 %v8125_v34, %v3456_v14 }
 0x4d7   : > { %12453 = vpow2.f32 %v10725_v6  ;;  %v10735_v18 = vmul.f32 -1.442695, %v16438_v32  ;;  %v8692_v45 = vmax.f32 %v16438_v32, 0.0  ;;  %v8683_v6 = vmax.f32 %v16432_v12, 0.0  ;;  %v12325_v32 = vld [vmem:[%s16779_s3 + $0x1380] ss:$40 sps:$4 sm:$0xff]  }
 0x4d8   : > { %12455 = vpow2.f32 %v10726_v53  ;;  %v10736_v31 = vmul.f32 -1.442695, %v16444_v47  ;;  %8485 = vmatpush1.bf16.msra.mxu1 %v12287_v1  ;;  %v12327_v1 = vld [vmem:[%s16779_s3 + $0x1384] ss:$40 sps:$4 sm:$0xff]   ;;  %v8693_v34 = vmax.f32 %v16444_v47, 0.0 }
 0x4d9   : > { %12457 = vpow2.f32 %v10735_v18  ;;  %8486 = vmatprep.subr.bf16.mxu1 %v12292_v48 }
 0x4da   : > { %12459 = vpow2.f32 %v10736_v31 }
 0x4dc   : > { %8487 = vmatpush1.bf16.msra.mxu1 %v12290_v58 }
 0x4dd   : > { %8488 = vmatprep.subr.bf16.mxu1 %v12297_v35 }
 0x4e0   : > { %8489 = vmatpush1.bf16.msra.mxu1 %v12295_v11 }
 0x4e1   : > { %v12454_v0 = vpop.eup %12453  ;;  %8490 = vmatprep.subr.bf16.mxu1 %v12302_v25 }
 0x4e2   : > { %v12456_v61 = vpop.eup %12455  ;;  %v8622_v30 = vadd.f32 1.0, %v12454_v0  ;;  %v12330_v0 = vld [vmem:[%s16779_s3 + $0x13d0] ss:$40 sps:$4 sm:$0xff]  }
 0x4e3   : > { %v12458_v5 = vpop.eup %12457  ;;  %v8623_v51 = vadd.f32 1.0, %v12456_v61  ;;  %v12383_v61 = vld [vmem:[%s16781_s5 + $0x1c8] sm:$0xff]  }
 0x4e4   : > { %v12460_v62 = vpop.eup %12459  ;;  %12461 = vrcp.f32 %v8622_v30  ;;  %v8632_v59 = vadd.f32 1.0, %v12458_v5  ;;  %8491 = vmatpush1.bf16.msra.mxu1 %v12300_v43  ;;  %v12333_v30 = vld [vmem:[%s16779_s3 + $0x1420] ss:$40 sps:$4 sm:$0xff]   ;;  %v12338_v5 = vld [vmem:[%s16779_s3 + $0x1474] ss:$40 sps:$4 sm:$0xff]  }
 0x4e5   : > { %12463 = vrcp.f32 %v8623_v51  ;;  %v8633_v63 = vadd.f32 1.0, %v12460_v62  ;;  %8492 = vmatprep.subr.bf16.mxu1 %v12307_v4  ;;  %v12335_v4 = vld [vmem:[%s16779_s3 + $0x1424] ss:$40 sps:$4 sm:$0xff]   ;;  %v12385_v62 = vld [vmem:[%s16781_s5 + $0x1d0] sm:$0xff]  }
 0x4e6   : > { %12465 = vrcp.f32 %v8632_v59  ;;  %v12384_v51 = vld [vmem:[%s16781_s5 + $0x188] sm:$0xff]   ;;  %v12336_v59 = vld [vmem:[%s16779_s3 + $0x1470] ss:$40 sps:$4 sm:$0xff]  }
 0x4e7   : > { %12467 = vrcp.f32 %v8633_v63  ;;  %v12386_v63 = vld [vmem:[%s16781_s5 + $0x190] sm:$0xff]  }
 0x4e8   : > { %8493 = vmatpush1.bf16.msra.mxu1 %v12305_v15  ;;  %v12341_v15 = vld [vmem:[%s16779_s3 + $0x14c4] ss:$40 sps:$4 sm:$0xff]  }
 0x4e9   : > { %8494 = vmatprep.subr.bf16.mxu1 %v12312_v60  ;;  %v12344_v60 = vld [vmem:[%s16779_s3 + $0x1514] ss:$40 sps:$4 sm:$0xff]  }
 0x4ec   : > { %8495 = vmatpush1.bf16.msra.mxu1 %v12310_v26  ;;  %v12388_v26 = vld [vmem:[%s16781_s5 + $0x198] sm:$0xff]  }
 0x4ed   : > { %8496 = vmatprep.subr.bf16.mxu1 %v12317_v40  ;;  %v12389_v40 = vld [vmem:[%s16781_s5 + $0x1e0] sm:$0xff]  }
 0x4ee   : > { %v12462_v22 = vpop.eup %12461 }
 0x4ef   : > { %v12464_v13 = vpop.eup %12463  ;;  %v8722_v38 = vsub.f32 1.0, %v12462_v22  ;;  %v8702_v18 = vmul.f32 %v12462_v22, %v8682_v36  ;;  %v12390_v22 = vld [vmem:[%s16781_s5 + $0x1a0] sm:$0xff]  }
 0x4f0   : > { %v12466_v50 = vpop.eup %12465  ;;  %8497 = vmatpush1.bf16.msra.mxu1 %v12315_v21  ;;  %v8723_v14 = vsub.f32 1.0, %v12464_v13  ;;  %v12342_v21 = vld [vmem:[%s16779_s3 + $0x1510] ss:$40 sps:$4 sm:$0xff]   ;;  %v12353_v36 = vld [vmem:[%s16779_s3 + $0x1604] ss:$40 sps:$4 sm:$0xff]  }
 0x4f1   : > { %v12468_v33 = vpop.eup %12467  ;;  %v8742_v55 = vmul.f32 %v8722_v38, %v14238_v49  ;;  %v8732_v28 = vsub.f32 1.0, %v12466_v50  ;;  %8498 = vmatprep.subr.bf16.mxu1 %v12322_v44  ;;  %v8712_v31 = vmul.f32 %v12466_v50, %v8692_v45  ;;  %v8703_v49 = vmul.f32 %v12464_v13, %v8683_v6  ;;  %v12347_v44 = vld [vmem:[%s16779_s3 + $0x1564] ss:$40 sps:$4 sm:$0xff]   ;;  %v12345_v38 = vld [vmem:[%s16779_s3 + $0x1560] ss:$40 sps:$4 sm:$0xff]   ;;  %v12395_v45 = vld [vmem:[%s16781_s5 + $0x1f8] sm:$0xff]  }
 0x4f2   : > { %v8733_v48 = vsub.f32 1.0, %v12468_v33  ;;  %v8743_v53 = vmul.f32 %v8723_v14, %v14013_v52  ;;  %v8713_v58 = vmul.f32 %v12468_v33, %v8693_v34  ;;  %v12332_v52 = vld [vmem:[%s16779_s3 + $0x13d4] ss:$40 sps:$4 sm:$0xff]   ;;  %v12391_v13 = vld [vmem:[%s16781_s5 + $0x1e8] sm:$0xff]   ;;  %v12348_v33 = vld [vmem:[%s16779_s3 + $0x15b0] ss:$40 sps:$4 sm:$0xff]  }
 0x4f3   : > { %v8752_v10 = vmul.f32 %v8732_v28, %v14223_v46  ;;  %v8762_v11 = vadd.f32 %v8742_v55, %v8702_v18  ;;  %v12350_v50 = vld [vmem:[%s16779_s3 + $0x15b4] ss:$40 sps:$4 sm:$0xff]   ;;  %v12351_v28 = vld [vmem:[%s16779_s3 + $0x1600] ss:$40 sps:$4 sm:$0xff]   ;;  %v12354_v34 = vld [vmem:[%s16779_s3 + $0x1650] ss:$40 sps:$4 sm:$0xff]  }
 0x4f4   : > { %8499 = vmatpush1.bf16.msra.mxu1 %v12320_v56  ;;  %v8753_v35 = vmul.f32 %v8733_v48, %v14004_v8  ;;  %v8763_v47 = vadd.f32 %v8743_v53, %v8703_v49  ;;  %v12382_v8 = vld [vmem:[%s16781_s5 + $0x180] sm:$0xff]   ;;  %v12392_v56 = vld [vmem:[%s16781_s5 + $0x1a8] sm:$0xff]   ;;  %v12393_v14 = vld [vmem:[%s16781_s5 + $0x1f0] sm:$0xff]  }
 0x4f5   : > { %v8772_v12 = vadd.f32 %v8752_v10, %v8712_v31  ;;  %8500 = vmatprep.subr.bf16.mxu1 %v12327_v1  ;;  %v12394_v55 = vld [vmem:[%s16781_s5 + $0x1b0] sm:$0xff]   ;;  %v12396_v6 = vld [vmem:[%s16781_s5 + $0x1b8] sm:$0xff]   ;;  %v12359_v48 = vld [vmem:[%s16779_s3 + $0x16a4] ss:$40 sps:$4 sm:$0xff]  }
 0x4f6   : > { %v8773_v25 = vadd.f32 %v8753_v35, %v8713_v58  ;;  %v12356_v1 = vld [vmem:[%s16779_s3 + $0x1654] ss:$40 sps:$4 sm:$0xff]   ;;  %v12357_v53 = vld [vmem:[%s16779_s3 + $0x16a0] ss:$40 sps:$4 sm:$0xff]   ;;  %v12360_v31 = vld [vmem:[%s16779_s3 + $0x16f0] ss:$40 sps:$4 sm:$0xff]  }
 0x4f7   : > { %v8782_v43 = vpack.c.bf16 %v8772_v12, %v8762_v11  ;;  %v12362_v18 = vld [vmem:[%s16779_s3 + $0x16f4] ss:$40 sps:$4 sm:$0xff]   ;;  %v12365_v10 = vld [vmem:[%s16779_s3 + $0x1744] ss:$40 sps:$4 sm:$0xff]   ;;  %v12363_v49 = vld [vmem:[%s16779_s3 + $0x1740] ss:$40 sps:$4 sm:$0xff]  }
 0x4f8   : > { %8501 = vmatpush1.bf16.msra.mxu1 %v12325_v32  ;;  %v8783_v46 = vpack.c.bf16 %v8773_v25, %v8763_v47  ;;  %v12368_v58 = vld [vmem:[%s16779_s3 + $0x1794] ss:$40 sps:$4 sm:$0xff]   ;;  %v12366_v32 = vld [vmem:[%s16779_s3 + $0x1790] ss:$40 sps:$4 sm:$0xff]   ;;  %v12371_v35 = vld [vmem:[%s16779_s3 + $0x17e4] ss:$40 sps:$4 sm:$0xff]  }
 0x4f9   : > { %8502 = vmatprep.subr.bf16.mxu1 %v12332_v52  ;;  %v12369_v11 = vld [vmem:[%s16779_s3 + $0x17e0] ss:$40 sps:$4 sm:$0xff]   ;;  %v12374_v12 = vld [vmem:[%s16779_s3 + $0x1834] ss:$40 sps:$4 sm:$0xff]   ;;  %v12372_v52 = vld [vmem:[%s16779_s3 + $0x1830] ss:$40 sps:$4 sm:$0xff]  }
 0x4fa   : > { %9549 = vmatprep.mubr.bf16.mxu0 %v8783_v46  ;;  %v12377_v47 = vld [vmem:[%s16779_s3 + $0x1884] ss:$40 sps:$4 sm:$0xff]   ;;  %v12375_v25 = vld [vmem:[%s16779_s3 + $0x1880] ss:$40 sps:$4 sm:$0xff]   ;;  %v12378_v46 = vld [vmem:[%s16779_s3 + $0x18d0] ss:$40 sps:$4 sm:$0xff]  }
 0x4fb   : > { %9550 = vmatmul.mubr.bf16.vlgmr.msra.gmra.mrb[92].mxu0 %v8782_v43  ;;  %v12380_v43 = vld [vmem:[%s16779_s3 + $0x18d4] ss:$40 sps:$4 sm:$0xff]  }
 0x4fc   : > { %8503 = vmatpush1.bf16.msra.mxu1 %v12330_v0  ;;  %10900 = vmatpush3.bf16.msra.mxu0 %v12382_v8  ;;  %v16803_v0 = vsub.s32 6, %v13089_v7 }
 0x4fd   : > { %8515 = vmatprep.subr.bf16.mxu1 %v12335_v4  ;;  %10901 = vmatprep.subr.bf16.mxu0 %v12383_v61  ;;  %v16804_v4 = vsub.s32 7, %v13089_v7 }
 0x4fe   : > { %v3460_v8 = vrot.slane %v16413_v20, %v16803_v0 }
 0x4ff   : > { %8505 = vmatmul.mubr.bf16.vlgmr.msra.gmra.mrb[76].mxu1 %v14466_v24  ;;  %v12387_v24 = vld [vmem:[%s16781_s5 + $0x1d8] sm:$0xff]   ;;  %v3464_v61 = vrot.slane %v16413_v20, %v16804_v4 }
 0x500   : > { %8516 = vmatpush1.bf16.msra.mxu1 %v12333_v30  ;;  %8547 = vmatprep.mubr.bf16.mxu1 %v14478_v29  ;;  %v12339_v29 = vld [vmem:[%s16779_s3 + $0x14c0] ss:$40 sps:$4 sm:$0xff]  }
 0x501   : > { %8517 = vmatprep.subr.bf16.mxu1 %v12338_v5  ;;  %10902 = vmatpush3.bf16.msra.mxu0 %v12384_v51 }
 0x502   : > { %10903 = vmatprep.subr.bf16.mxu0 %v12385_v62 }
 0x504   : > { %8518 = vmatpush1.bf16.msra.mxu1 %v12336_v59 }
 0x505   : > { %8519 = vmatprep.subr.bf16.mxu1 %v12341_v15  ;;  %10904 = vmatpush3.bf16.msra.mxu0 %v12386_v63 }
 0x506   : > { %10905 = vmatprep.subr.bf16.mxu0 %v12387_v24 }
 0x508   : > { %8520 = vmatpush1.bf16.msra.mxu1 %v12339_v29 }
 0x509   : > { %8521 = vmatprep.subr.bf16.mxu1 %v12344_v60  ;;  %10906 = vmatpush3.bf16.msra.mxu0 %v12388_v26 }
 0x50a   : > { %10907 = vmatprep.subr.bf16.mxu0 %v12389_v40 }
 0x50c   : > { %8522 = vmatpush1.bf16.msra.mxu1 %v12342_v21 }
 0x50d   : > { %8523 = vmatprep.subr.bf16.mxu1 %v12347_v44  ;;  %10908 = vmatpush3.bf16.msra.mxu0 %v12390_v22 }
 0x50e   : > { %10909 = vmatprep.subr.bf16.mxu0 %v12391_v13 }
 0x510   : > { %8524 = vmatpush1.bf16.msra.mxu1 %v12345_v38 }
 0x511   : > { %8525 = vmatprep.subr.bf16.mxu1 %v12350_v50  ;;  %10910 = vmatpush3.bf16.msra.mxu0 %v12392_v56 }
 0x512   : > { %10911 = vmatprep.subr.bf16.mxu0 %v12393_v14 }
 0x514   : > { %8526 = vmatpush1.bf16.msra.mxu1 %v12348_v33 }
 0x515   : > { %8527 = vmatprep.subr.bf16.mxu1 %v12353_v36  ;;  %10912 = vmatpush3.bf16.msra.mxu0 %v12394_v55 }
 0x516   : > { %10913 = vmatprep.subr.bf16.mxu0 %v12395_v45 }
 0x518   : > { %8528 = vmatpush1.bf16.msra.mxu1 %v12351_v28 }
 0x519   : > { %8529 = vmatprep.subr.bf16.mxu1 %v12356_v1  ;;  %10914 = vmatpush3.bf16.msra.mxu0 %v12396_v6 }
 0x51c   : > { %8530 = vmatpush1.bf16.msra.mxu1 %v12354_v34 }
 0x51d   : > { %8531 = vmatprep.subr.bf16.mxu1 %v12359_v48 }
 0x520   : > { %8532 = vmatpush1.bf16.msra.mxu1 %v12357_v53 }
 0x521   : > { %8533 = vmatprep.subr.bf16.mxu1 %v12362_v18 }
 0x524   : > { %8534 = vmatpush1.bf16.msra.mxu1 %v12360_v31 }
 0x525   : > { %8535 = vmatprep.subr.bf16.mxu1 %v12365_v10 }
 0x528   : > { %8536 = vmatpush1.bf16.msra.mxu1 %v12363_v49 }
 0x529   : > { %8537 = vmatprep.subr.bf16.mxu1 %v12368_v58 }
 0x52c   : > { %8538 = vmatpush1.bf16.msra.mxu1 %v12366_v32 }
 0x52d   : > { %8539 = vmatprep.subr.bf16.mxu1 %v12371_v35 }
 0x530   : > { %8540 = vmatpush1.bf16.msra.mxu1 %v12369_v11 }
 0x531   : > { %8541 = vmatprep.subr.bf16.mxu1 %v12374_v12 }
 0x534   : > { %8542 = vmatpush1.bf16.msra.mxu1 %v12372_v52 }
 0x535   : > { %8543 = vmatprep.subr.bf16.mxu1 %v12377_v47 }
 0x538   : > { %8544 = vmatpush1.bf16.msra.mxu1 %v12375_v25 }
 0x539   : > { %8545 = vmatprep.subr.bf16.mxu1 %v12380_v43 }
 0x53c   : > { %8546 = vmatpush1.bf16.msra.mxu1 %v12378_v46 }
 0x53f   : > { %8548 = vmatmul.mubr.bf16.vlgmr.msra.gmra.mrb[76].mxu1 %v14682_v9 }
 0x547   : > { %v8334_v30 = vpop.f32.mrb[80].mxu0 }
 0x548   : > { %v10988_v5 = vadd.f32 %v8334_v30, %v3460_v8  ;;  %v8336_v51 = vpop.f32.mrb[81].mxu0 }
 0x549   : > { %v10989_v62 = vadd.f32 %v8336_v51, %v3464_v61  ;;  %v8338_v59 = vpop.f32.mrb[82].mxu0 }
 0x54a   : > { %v10727_v15 = vmul.f32 -1.442695, %v10988_v5  ;;  %v10990_v63 = vadd.f32 %v8338_v59, %v3460_v8  ;;  %v8340_v24 = vpop.f32.mrb[83].mxu0  ;;  %v8684_v45 = vmax.f32 %v10988_v5, 0.0 }
 0x54b   : > { %v10728_v29 = vmul.f32 -1.442695, %v10989_v62  ;;  %v10991_v60 = vadd.f32 %v8340_v24, %v3464_v61  ;;  %v8685_v34 = vmax.f32 %v10989_v62, 0.0  ;;  %v12398_v24 = vld [vmem:[%s16781_s5 + $0x200] sm:$0xff]  }
 0x54c   : > { %12469 = vpow2.f32 %v10727_v15  ;;  %v10737_v9 = vmul.f32 -1.442695, %v10990_v63  ;;  %v8694_v1 = vmax.f32 %v10990_v63, 0.0  ;;  %v12397_v63 = vld [vmem:[%s16781_s5 + $0x240] sm:$0xff]  }
 0x54d   : > { %12471 = vpow2.f32 %v10728_v29  ;;  %v10738_v26 = vmul.f32 -1.442695, %v10991_v60  ;;  %v8695_v48 = vmax.f32 %v10991_v60, 0.0  ;;  %10921 = vmatprep.subr.bf16.mxu0 %v12397_v63  ;;  %v12399_v29 = vld [vmem:[%s16781_s5 + $0x248] sm:$0xff]  }
 0x54e   : > { %12473 = vpow2.f32 %v10737_v9  ;;  %v12400_v60 = vld [vmem:[%s16781_s5 + $0x208] sm:$0xff]   ;;  %v12401_v9 = vld [vmem:[%s16781_s5 + $0x250] sm:$0xff]  }
 0x54f   : > { %12475 = vpow2.f32 %v10738_v26  ;;  %v12402_v26 = vld [vmem:[%s16781_s5 + $0x210] sm:$0xff]  }
 0x556   : > { %v12470_v40 = vpop.eup %12469 }
 0x557   : > { %v12472_v7 = vpop.eup %12471  ;;  %v8624_v21 = vadd.f32 1.0, %v12470_v40  ;;  %v12403_v40 = vld [vmem:[%s16781_s5 + $0x258] sm:$0xff]  }
 0x558   : > { %v12474_v20 = vpop.eup %12473  ;;  %v8625_v44 = vadd.f32 1.0, %v12472_v7  ;;  %v12404_v7 = vld [vmem:[%s16781_s5 + $0x218] sm:$0xff]  }
 0x559   : > { %v12476_v22 = vpop.eup %12475  ;;  %12477 = vrcp.f32 %v8624_v21  ;;  %v8634_v13 = vadd.f32 1.0, %v12474_v20  ;;  %v12405_v21 = vld [vmem:[%s16781_s5 + $0x260] sm:$0xff]  }
 0x55a   : > { %12479 = vrcp.f32 %v8625_v44  ;;  %v8635_v38 = vadd.f32 1.0, %v12476_v22  ;;  %v12406_v20 = vld [vmem:[%s16781_s5 + $0x220] sm:$0xff]   ;;  %v12407_v44 = vld [vmem:[%s16781_s5 + $0x268] sm:$0xff]  }
 0x55b   : > { %12481 = vrcp.f32 %v8634_v13  ;;  %v12408_v22 = vld [vmem:[%s16781_s5 + $0x228] sm:$0xff]   ;;  %v12409_v13 = vld [vmem:[%s16781_s5 + $0x270] sm:$0xff]  }
 0x55c   : > { %12483 = vrcp.f32 %v8635_v38  ;;  %v12410_v38 = vld [vmem:[%s16781_s5 + $0x230] sm:$0xff]  }
 0x563   : > { %v12478_v50 = vpop.eup %12477 }
 0x564   : > { %v12480_v56 = vpop.eup %12479  ;;  %v8724_v14 = vsub.f32 1.0, %v12478_v50  ;;  %v8704_v10 = vmul.f32 %v12478_v50, %v8684_v45  ;;  %v12411_v50 = vld [vmem:[%s16781_s5 + $0x278] sm:$0xff]  }
 0x565   : > { %v12482_v33 = vpop.eup %12481  ;;  %v8725_v36 = vsub.f32 1.0, %v12480_v56  ;;  %v8705_v35 = vmul.f32 %v12480_v56, %v8685_v34  ;;  %v12412_v56 = vld [vmem:[%s16781_s5 + $0x238] sm:$0xff]  }
 0x566   : > { %v12484_v55 = vpop.eup %12483  ;;  %v8744_v28 = vmul.f32 %v8724_v14, %v14458_v27  ;;  %v8734_v6 = vsub.f32 1.0, %v12482_v33  ;;  %v8714_v49 = vmul.f32 %v12482_v33, %v8694_v1  ;;  %v12558_v14 = vmov 0.0  }
 0x567   : > { %v10849_v53 = vpop.f32.mrb[84].mxu0  ;;  %v8735_v18 = vsub.f32 1.0, %v12484_v55  ;;  %v8745_v31 = vmul.f32 %v8725_v36, %v2606_v23  ;;  %v8715_v11 = vmul.f32 %v12484_v55, %v8695_v48  ;;  %v3430_v48 = vld [vmem:[%s16780_s4 + $0x8] sm:$0x3] }
 0x568   : > { %v8754_v58 = vmul.f32 %v8734_v6, %v14446_v17  ;;  %v10850_v32 = vpop.f32.mrb[85].mxu0  ;;  %v8764_v47 = vadd.f32 %v8744_v28, %v8704_v10  ;;  %v10741_v17 = vld [vmem:[%s16782_s6] ss:$0 sm:$0xff] }
 0x569   : > { %v10851_v12 = vadd.f32 %v10850_v32, %v10849_v53  ;;  %v10852_v52 = vpop.f32.mrb[86].mxu0  ;;  %v8755_v27 = vmul.f32 %v8735_v18, %v2616_v37  ;;  %v8765_v0 = vadd.f32 %v8745_v31, %v8705_v35  ;;  %v3468_v53 = vrot.slane %v3430_v48, %v13297_v39 }
 0x56a   : > { %v8774_v25 = vadd.f32 %v8754_v58, %v8714_v49  ;;  %v10853_v43 = vpop.f32.mrb[87].mxu0  ;;  %v3472_v18 = vrot.slane %v3430_v48, %v13300_v41 }
 0x56b   : > { %v10854_v46 = vadd.f32 %v10853_v43, %v10852_v52  ;;  %v8775_v8 = vadd.f32 %v8755_v27, %v8715_v11  ;;  %v9470_v30 = vadd.f32 %v10851_v12, %v10741_v17 }
 0x56c   : > { %v8784_v54 = vpack.c.bf16 %v8774_v25, %v8764_v47 }
 0x56d   : > { %v8785_v23 = vpack.c.bf16 %v8775_v8, %v8765_v0  ;;  %v9473_v51 = vadd.f32 %v10854_v46, %v10741_v17 }
 0x56f   : > { %9590 = vmatprep.mubr.bf16.mxu0 %v8785_v23 }
 0x570   : > { %9591 = vmatmul.mubr.bf16.vlgmr.msra.gmra.mrb[96].mxu0 %v8784_v54 }
 0x571   : > { %10922 = vmatpush3.bf16.msra.mxu0 %v12398_v24 }
 0x572   : > { %10923 = vmatprep.subr.bf16.mxu0 %v12399_v29  ;;  %v16805_v29 = vmax.f32 %v14441_v3, 0.0  ;;  %v12413_v3 = vld [vmem:[%s16783_s7] sm:$0xff]  }
 0x575   : > { %10924 = vmatpush3.bf16.msra.mxu0 %v12400_v60 }
 0x576   : > { %10925 = vmatprep.subr.bf16.mxu0 %v12401_v9 }
 0x579   : > { %10926 = vmatpush3.bf16.msra.mxu0 %v12402_v26 }
 0x57a   : > { %10927 = vmatprep.subr.bf16.mxu0 %v12403_v40  ;;  %v16806_v40 = vmax.f32 %v14647_v2, 0.0  ;;  %v12414_v2 = vld [vmem:[%s16783_s7 + $0x8] sm:$0xff]  }
 0x57d   : > { %10928 = vmatpush3.bf16.msra.mxu0 %v12404_v7 }
 0x57e   : > { %10929 = vmatprep.subr.bf16.mxu0 %v12405_v21 }
 0x581   : > { %10930 = vmatpush3.bf16.msra.mxu0 %v12406_v20 }
 0x582   : > { %10931 = vmatprep.subr.bf16.mxu0 %v12407_v44  ;;  %v16807_v44 = vmax.f32 %v14435_v42, 0.0  ;;  %v12415_v42 = vld [vmem:[%s16783_s7 + $0x10] sm:$0xff]  }
 0x585   : > { %10932 = vmatpush3.bf16.msra.mxu0 %v12408_v22 }
 0x586   : > { %10933 = vmatprep.subr.bf16.mxu0 %v12409_v13 }
 0x587   : > { %v10871_v4 = vpop.f32.mrb[88].mxu0 }
 0x588   : > { %v10872_v61 = vpop.f32.mrb[89].mxu0 }
 0x589   : > { %v10873_v5 = vadd.f32 %v10872_v61, %v10871_v4  ;;  %v10874_v19 = vpop.f32.mrb[90].mxu0  ;;  %10934 = vmatpush3.bf16.msra.mxu0 %v12410_v38 }
 0x58a   : > { %v10875_v37 = vpop.f32.mrb[91].mxu0  ;;  %10935 = vmatprep.subr.bf16.mxu0 %v12411_v50 }
 0x58b   : > { %v9511_v62 = vadd.f32 %v10873_v5, %v9470_v30  ;;  %v10876_v59 = vadd.f32 %v10875_v37, %v10874_v19 }
 0x58d   : > { %v9514_v15 = vadd.f32 %v10876_v59, %v9473_v51  ;;  %10936 = vmatpush3.bf16.msra.mxu0 %v12412_v56 }
 0x58e   : > { %10952 = vmatprep.subr.bf16.mxu0 %v12558_v14 }
 0x5ce   : > { %v10893_v33 = vpop.f32.mrb[92].mxu0 }
 0x5cf   : > { %v10894_v36 = vpop.f32.mrb[93].mxu0 }
 0x5d0   : > { %v10895_v55 = vadd.f32 %v10894_v36, %v10893_v33  ;;  %v10896_v45 = vpop.f32.mrb[94].mxu0 }
 0x5d1   : > { %v10897_v28 = vpop.f32.mrb[95].mxu0 }
 0x5d2   : > { %v16715_v1 = vadd.f32 %v10895_v55, %v9511_v62  ;;  %v10898_v6 = vadd.f32 %v10897_v28, %v10896_v45  ;;  %v12416_v55 = vld [vmem:[%s16783_s7 + $0x18] sm:$0xff]  }
 0x5d4   : > { %v16717_v34 = vadd.f32 %v10898_v6, %v9514_v15 }
 0x612   : > { %v8549_v31 = vpop.f32.mrb[76].mxu1 }
 0x613   : > { %v10992_v10 = vadd.f32 %v8549_v31, %v3468_v53  ;;  %v8551_v49 = vpop.f32.mrb[77].mxu1 }
 0x614   : > { %v10993_v58 = vadd.f32 %v8551_v49, %v3472_v18  ;;  %v8553_v32 = vpop.f32.mrb[78].mxu1 }
 0x615   : > { %v10729_v35 = vmul.f32 -1.442695, %v10992_v10  ;;  %v10994_v11 = vadd.f32 %v8553_v32, %v3468_v53  ;;  %v8555_v12 = vpop.f32.mrb[79].mxu1  ;;  %v8686_v37 = vmax.f32 %v10992_v10, 0.0  ;;  %v12418_v10 = vld [vmem:[%s16783_s7 + $0x28] sm:$0xff]  }
 0x616   : > { %v10730_v52 = vmul.f32 -1.442695, %v10993_v58  ;;  %v10995_v27 = vadd.f32 %v8555_v12, %v3472_v18  ;;  %v8687_v15 = vmax.f32 %v10993_v58, 0.0  ;;  %v12417_v18 = vld [vmem:[%s16783_s7 + $0x20] sm:$0xff]  }
 0x617   : > { %12485 = vpow2.f32 %v10729_v35  ;;  %v10739_v47 = vmul.f32 -1.442695, %v10994_v11  ;;  %v8696_v62 = vmax.f32 %v10994_v11, 0.0 }
 0x618   : > { %12487 = vpow2.f32 %v10730_v52  ;;  %v10740_v25 = vmul.f32 -1.442695, %v10995_v27  ;;  %v8697_v63 = vmax.f32 %v10995_v27, 0.0 }
 0x619   : > { %12489 = vpow2.f32 %v10739_v47 }
 0x61a   : > { %12491 = vpow2.f32 %v10740_v25  ;;  %v10822_v25 = vld [vmem:[%s16784_s8] ss:$0 sm:$0xff] }
 0x621   : > { %v12486_v43 = vpop.eup %12485 }
 0x622   : > { %v12488_v39 = vpop.eup %12487  ;;  %v8626_v46 = vadd.f32 1.0, %v12486_v43 }
 0x623   : > { %v12490_v41 = vpop.eup %12489  ;;  %v8627_v0 = vadd.f32 1.0, %v12488_v39 }
 0x624   : > { %v12492_v8 = vpop.eup %12491  ;;  %12493 = vrcp.f32 %v8626_v46  ;;  %v8636_v54 = vadd.f32 1.0, %v12490_v41 }
 0x625   : > { %12495 = vrcp.f32 %v8627_v0  ;;  %v8637_v23 = vadd.f32 1.0, %v12492_v8 }
 0x626   : > { %12497 = vrcp.f32 %v8636_v54 }
 0x627   : > { %12499 = vrcp.f32 %v8637_v23 }
 0x62e   : > { %v12494_v17 = vpop.eup %12493 }
 0x62f   : > { %v12496_v4 = vpop.eup %12495  ;;  %v8726_v61 = vsub.f32 1.0, %v12494_v17  ;;  %v8706_v9 = vmul.f32 %v12494_v17, %v8686_v37 }
 0x630   : > { %v12498_v30 = vpop.eup %12497  ;;  %v8727_v5 = vsub.f32 1.0, %v12496_v4  ;;  %v8707_v21 = vmul.f32 %v12496_v4, %v8687_v15 }
 0x631   : > { %v12500_v19 = vpop.eup %12499  ;;  %v8746_v51 = vmul.f32 %v8726_v61, %v2607_v57  ;;  %v8736_v59 = vsub.f32 1.0, %v12498_v30  ;;  %v8716_v26 = vmul.f32 %v12498_v30, %v8696_v62 }
 0x632   : > { %v8737_v24 = vsub.f32 1.0, %v12500_v19  ;;  %v8747_v60 = vmul.f32 %v8727_v5, %v16805_v29  ;;  %v8717_v20 = vmul.f32 %v12500_v19, %v8697_v63 }
 0x633   : > { %v8756_v7 = vmul.f32 %v8736_v59, %v16806_v40  ;;  %v8766_v16 = vadd.f32 %v8746_v51, %v8706_v9 }
 0x634   : > { %v8757_v22 = vmul.f32 %v8737_v24, %v16807_v44  ;;  %v8767_v13 = vadd.f32 %v8747_v60, %v8707_v21 }
 0x635   : > { %v8776_v57 = vadd.f32 %v8756_v7, %v8716_v26 }
 0x636   : > { %v8777_v38 = vadd.f32 %v8757_v22, %v8717_v20 }
 0x637   : > { %v8786_v50 = vpack.c.bf16 %v8776_v57, %v8766_v16 }
 0x638   : > { %v8787_v56 = vpack.c.bf16 %v8777_v38, %v8767_v13 }
 0x63a   : > { %9631 = vmatprep.mubr.bf16.mxu0 %v8787_v56 }
 0x63b   : > { %9632 = vmatmul.mubr.bf16.vlgmr.msra.gmra.mrb[100].mxu0 %v8786_v50 }
 0x63c   : > { %10953 = vmatpush3.bf16.msra.mxu0 %v12413_v3  ;;  %10968 = vmatprep.mubr.msk.bf16.mxu0 %vm12559_vm8, %v12558_v14 }
 0x63d   : > { %10954 = vmatprep.subr.bf16.mxu0 %v12558_v14 }
 0x640   : > { %10955 = vmatpush3.bf16.msra.mxu0 %v12414_v2 }
 0x641   : > { %10956 = vmatprep.subr.bf16.mxu0 %v12558_v14 }
 0x643   : > { %v10915_v33 = vpop.f32.mrb[96].mxu0 }
 0x644   : > { %v10916_v36 = vpop.f32.mrb[97].mxu0  ;;  %10957 = vmatpush3.bf16.msra.mxu0 %v12415_v42 }
 0x645   : > { %v10917_v45 = vadd.f32 %v10916_v36, %v10915_v33  ;;  %v10918_v28 = vpop.f32.mrb[98].mxu0  ;;  %10958 = vmatprep.subr.bf16.mxu0 %v12558_v14 }
 0x646   : > { %v10919_v6 = vpop.f32.mrb[99].mxu0 }
 0x647   : > { %v9593_v48 = vadd.f32 %v10917_v45, %v16715_v1  ;;  %v10920_v53 = vadd.f32 %v10919_v6, %v10918_v28  ;;  %v12419_v1 = vld [vmem:[%s16783_s7 + $0x30] sm:$0xff]  }
 0x648   : > { %10959 = vmatpush3.bf16.msra.mxu0 %v12416_v55 }
 0x649   : > { %v9596_v31 = vadd.f32 %v10920_v53, %v16717_v34  ;;  %10960 = vmatprep.subr.bf16.mxu0 %v12558_v14  ;;  %v12420_v34 = vld [vmem:[%s16783_s7 + $0x38] sm:$0xff]  }
 0x64c   : > { %10961 = vmatpush3.bf16.msra.mxu0 %v12417_v18 }
 0x64d   : > { %10962 = vmatprep.subr.bf16.mxu0 %v12558_v14 }
 0x650   : > { %10963 = vmatpush3.bf16.msra.mxu0 %v12418_v10 }
 0x651   : > { %10964 = vmatprep.subr.bf16.mxu0 %v12558_v14 }
 0x654   : > { %10965 = vmatpush3.bf16.msra.mxu0 %v12419_v1 }
 0x655   : > { %10966 = vmatprep.subr.bf16.mxu0 %v12558_v14 }
 0x658   : > { %10967 = vmatpush3.bf16.msra.mxu0 %v12420_v34 }
 0x70e   : > { %v10937_v49 = vpop.f32.mrb[100].mxu0 }
 0x70f   : > { %v10938_v58 = vpop.f32.mrb[101].mxu0 }
 0x710   : > { %v10939_v32 = vadd.f32 %v10938_v58, %v10937_v49  ;;  %v10940_v35 = vpop.f32.mrb[102].mxu0 }
 0x711   : > { %v10941_v11 = vpop.f32.mrb[103].mxu0 }
 0x712   : > { %v9634_v12 = vadd.f32 %v10939_v32, %v9593_v48  ;;  %v10942_v52 = vadd.f32 %v10941_v11, %v10940_v35 }
 0x714   : > { %v9637_v27 = vadd.f32 %v10942_v52, %v9596_v31 }
 0x716   : > { %v9640_v47 = vpack.c.bf16 %v9637_v27, %v9634_v12 }
 0x718   : > { %10969 = vmatmul.mubr.bf16.vlgmr.msra.gmra.mrb[104].mxu0 %v9640_v47 }
 0x7eb   : > { %v9746_v14 = vpop.f32.mrb[104].mxu0 }
 0x7ec   : > { %v9747_v43 = vadd.f32 %v10822_v25, %v9746_v14  ;;  %v10970_v39 = vpop.f32.mrb[105].mxu0 }
 0x7ed   : > { %v9749_v46 = vpop.f32.mrb[106].mxu0 }
 0x7ee   : > { %9753 = vst [vmem:[%s334_s22] sm:$0xff] %v9747_v43  ;;  %v9750_v41 = vadd.f32 %v10822_v25, %v9749_v46  ;;  %v10971_v0 = vpop.f32.mrb[107].mxu0 }
 0x7f0   : > { %9754 = vst [vmem:[%s334_s22 + $0x8] sm:$0xff] %v9750_v41 }
 0x7f1 PF: > { %s19_s30 = sadd.s32 1, %s12546_s30  }
 0x7f2   : > { %p16_p4 = scmp.ge.s32.totalorder %s19_s30, 4  }
 0x7f4   :  { %18 = sbr.rel (!%p16_p4) target bundleno = 1 (0x1), region = 86 }

</bundles_post_ra>
